<compile_context>
chip_gen: v5e
topology: v5e:2x2
jax: 0.10.0
libtpu: 0.0.40
codegen_flags: <defaults>
</compile_context>

<pallas_src>
import functools

import jax
import jax.numpy as jnp
from jax.experimental import pallas as pl
from jax.experimental.pallas import tpu as pltpu


def _conv2d_roll_kernel(x_ref, w_ref, b_ref, o_ref, patches_ref, *,
                        N, Cin, W, HW, KH, KW, K, K_pad,
                        relu_factor, do_relu):
    """Valid, stride-1 conv + bias + LeakyReLU for the whole batch.

    x_ref:       (N*Cin, H*W)     VMEM  lane-flat NCHW input
    w_ref:       (Cout, K_pad)    VMEM  matmul-ready weight slab, K=(kh,kw,cin)
    b_ref:       (Cout, 1)        VMEM  f32 bias column
    o_ref:       (N, Cout, H*W)   VMEM  lane-dense output slab
    patches_ref: (N, K_pad, H*W)  VMEM  scratch im2col matrix per image
    """
    x = x_ref[...]                                    # (N*Cin, HW)

    # Zero the K padding rows (w columns there are zero too, but the scratch
    # is uninitialized VMEM and NaN * 0 = NaN).
    pad = K_pad - K
    if pad > 0:
        for n in range(N):
            patches_ref[n, pl.ds(K, pad), :] = jnp.zeros(
                (pad, HW), dtype=patches_ref.dtype)

    # Roll-based im2col: one XLU lane rotation per tap covers every image and
    # every channel at once (each row of x is one (n, cin) channel).  A left
    # rotation by s = kh*W + kw is expressed as a non-negative roll by HW - s
    # (jnp.roll semantics).  For valid output positions (i < Ho, j < Wo) the
    # rolled value at lane i*W + j is exactly x[n, cin, i+kh, j+kw]; the
    # wrapped lanes are discarded by the wrapper.
    for kh in range(KH):
        for kw in range(KW):
            s = kh * W + kw
            rolled = x if s == 0 else pltpu.roll(x, HW - s, axis=1)
            row = (kh * KW + kw) * Cin
            for n in range(N):
                patches_ref[n, pl.ds(row, Cin), :] = \
                    rolled[n * Cin:(n + 1) * Cin, :]

    w = w_ref[...]                                    # (Cout, K_pad)
    b = b_ref[...]                                    # (Cout, 1) f32

    # One MXU matmul per image: (Cout, K_pad) @ (K_pad, HW), f32 accumulation.
    # MXU is non-binding at these shapes; the win is the lane-dense layout.
    for n in range(N):
        acc = jax.lax.dot_general(
            w, patches_ref[n],
            dimension_numbers=(((1,), (0,)), ((), ())),
            preferred_element_type=jnp.float32)       # (Cout, HW)
        acc = acc + b                                 # bias broadcast
        if do_relu:
            # LeakyReLU(negative_slope=relu_factor); relu_factor=0 -> ReLU.
            acc = jnp.where(acc >= 0, acc, jnp.float32(relu_factor) * acc)
        o_ref[n] = acc.astype(o_ref.dtype)            # (Cout, HW) lane-dense


def convolution2d_forward(x_nchw, weight_oihw, bias, *,
                          relu_factor=0.0, do_relu=True, compute_dtype=None):
    """Forward pass matching Convolution2D with default ctor args.

    x_nchw:      (N, Cin, H, W)        -- PyTorch layout (consumed directly)
    weight_oihw: (Cout, Cin, KH, KW)   -- PyTorch layout
    bias:        (Cout,)
    compute_dtype: optional MXU operand dtype (e.g. jnp.bfloat16 on v6e/v7x).
    returns:     (N, Cout, Ho, Wo)     -- PyTorch layout
    """
    N, Cin, H, W = x_nchw.shape
    Cout, Cin_w, KH, KW = weight_oihw.shape
    assert Cin == Cin_w
    Ho, Wo = H - KH + 1, W - KW + 1          # 'valid' padding, stride 1
    HW = H * W
    K = KH * KW * Cin
    K_pad = ((K + 7) // 8) * 8               # sublane-aligned contraction dim

    cdt = compute_dtype if compute_dtype is not None else x_nchw.dtype

    # Lane-flat view of the NCHW input: free (contiguous) reshape in HBM.
    x_flat = x_nchw.reshape(N * Cin, HW).astype(cdt)

    # Matmul-ready weight slab (Cout, K_pad), K ordered (kh, kw, cin); tiny
    # tensor, done once in the wrapper.
    w_mat = jnp.transpose(weight_oihw, (0, 2, 3, 1)).reshape(Cout, K)
    if K_pad > K:
        w_mat = jnp.pad(w_mat, ((0, 0), (0, K_pad - K)))
    w_mat = w_mat.astype(cdt)
    b_col = bias.reshape(Cout, 1).astype(jnp.float32)

    kernel = functools.partial(
        _conv2d_roll_kernel,
        N=N, Cin=Cin, W=W, HW=HW, KH=KH, KW=KW, K=K, K_pad=K_pad,
        relu_factor=relu_factor, do_relu=do_relu)

    out_flat = pl.pallas_call(
        kernel,
        out_shape=jax.ShapeDtypeStruct((N, Cout, HW), x_nchw.dtype),
        grid_spec=pltpu.PrefetchScalarGridSpec(
            num_scalar_prefetch=0,
            grid=(1,),                                   # single program
            in_specs=[
                pl.BlockSpec((N * Cin, HW), lambda i: (0, 0)),
                pl.BlockSpec((Cout, K_pad), lambda i: (0, 0)),
                pl.BlockSpec((Cout, 1), lambda i: (0, 0)),
            ],
            out_specs=pl.BlockSpec((N, Cout, HW), lambda i: (0, 0, 0)),
            scratch_shapes=[pltpu.VMEM((N, K_pad, HW), cdt)],
        ),
        compiler_params=pltpu.CompilerParams(
            dimension_semantics=("arbitrary",)),
    )(x_flat, w_mat, b_col)

    # Free reshape back to NCHW, then extract the valid Ho x Wo window
    # (the kernel writes the full lane-dense H*W slab).
    return out_flat.reshape(N, Cout, H, W)[:, :, :Ho, :Wo]


if __name__ == "__main__":
    key = jax.random.PRNGKey(0)
    k_x, k_w, k_b = jax.random.split(key, 3)

    # Module config (defaults): input_ch=4, output_ch=8, kernel_size=7,
    # stride=1, padding='valid', deviation=0.01
    N, Cin, H, W = 2, 4, 16, 16
    Cout, Ksz = 8, 7
    deviation = 0.01

    x = jax.random.normal(k_x, (N, Cin, H, W), dtype=jnp.float32)
    # nn.init.normal_(weight, std=deviation)
    weight = deviation * jax.random.normal(k_w, (Cout, Cin, Ksz, Ksz), jnp.float32)
    # deterministic stand-in for Conv2d's default bias init
    bias = 0.1 * jax.random.normal(k_b, (Cout,), jnp.float32)

    out = convolution2d_forward(x, weight, bias, relu_factor=0.0, do_relu=True)
    out = jax.block_until_ready(out)

    # Silent correctness check against XLA's conv (same semantics).
    ref = jax.lax.conv_general_dilated(
        x, weight, window_strides=(1, 1), padding="VALID",
        dimension_numbers=("NCHW", "OIHW", "NCHW"))
    ref = ref + bias[None, :, None, None]
    ref = jnp.where(ref >= 0, ref, 0.0 * ref)
    assert out.shape == (N, Cout, H - Ksz + 1, W - Ksz + 1)
    assert jnp.allclose(out, ref, atol=1e-5, rtol=1e-5)

    print("KERNEL_OK")
</pallas_src>

<mosaic_0001>
module attributes {stable_mosaic.version = 11 : i64} {
  func.func @_conv2d_roll_kernel(%arg0: i32, %arg1: memref<8x256xf32, #tpu.memory_space<vmem>>, %arg2: memref<8x200xf32, #tpu.memory_space<vmem>>, %arg3: memref<8x1xf32, #tpu.memory_space<vmem>>, %arg4: memref<2x8x256xf32, #tpu.memory_space<vmem>>, %arg5: memref<2x200x256xf32, #tpu.memory_space<vmem>>) attributes {dimension_semantics = [#tpu.dimension_semantics<arbitrary>], iteration_bounds = array<i64: 1>, scalar_prefetch = 0 : i64, scratch_operands = 1 : i64, tpu.core_type = #tpu.core_type<tc>, window_params = [{pipeline_mode = #tpu.pipeline_mode<synchronous>, transform_indices = @transform_0, window_bounds = array<i64: 8, 256>}, {pipeline_mode = #tpu.pipeline_mode<synchronous>, transform_indices = @transform_1, window_bounds = array<i64: 8, 200>}, {pipeline_mode = #tpu.pipeline_mode<synchronous>, transform_indices = @transform_2, window_bounds = array<i64: 8, 1>}, {pipeline_mode = #tpu.pipeline_mode<synchronous>, transform_indices = @transform_3, window_bounds = array<i64: 2, 8, 256>}]} {
    %c0 = arith.constant 0 : index
    %c0_0 = arith.constant 0 : index
    %0 = vector.load %arg1[%c0, %c0_0] : memref<8x256xf32, #tpu.memory_space<vmem>>, vector<8x256xf32>
    %cst = arith.constant 0.000000e+00 : f32
    %1 = vector.broadcast %cst : f32 to vector<4x256xf32>
    %c0_1 = arith.constant 0 : index
    %c196 = arith.constant 196 : index
    %c0_2 = arith.constant 0 : index
    %2 = vector.load %arg5[%c0_1, %c196, %c0_2] : memref<2x200x256xf32, #tpu.memory_space<vmem>>, vector<1x4x256xf32>
    %3 = vector.shape_cast %2 : vector<1x4x256xf32> to vector<4x256xf32>
    %4 = vector.shape_cast %1 : vector<4x256xf32> to vector<1x4x256xf32>
    tpu.vector_store %arg5[%c0_1, %c196, %c0_2], %4 {strides = array<i32>} : memref<2x200x256xf32, #tpu.memory_space<vmem>>, vector<1x4x256xf32>,
    %cst_3 = arith.constant 0.000000e+00 : f32
    %5 = vector.broadcast %cst_3 : f32 to vector<4x256xf32>
    %c1 = arith.constant 1 : index
    %c196_4 = arith.constant 196 : index
    %c0_5 = arith.constant 0 : index
    %6 = vector.load %arg5[%c1, %c196_4, %c0_5] : memref<2x200x256xf32, #tpu.memory_space<vmem>>, vector<1x4x256xf32>
    %7 = vector.shape_cast %6 : vector<1x4x256xf32> to vector<4x256xf32>
    %8 = vector.shape_cast %5 : vector<4x256xf32> to vector<1x4x256xf32>
    tpu.vector_store %arg5[%c1, %c196_4, %c0_5], %8 {strides = array<i32>} : memref<2x200x256xf32, #tpu.memory_space<vmem>>, vector<1x4x256xf32>,
    %9 = vector.extract_strided_slice %0 {offsets = [0, 0], sizes = [4, 256], strides = [1, 1]} : vector<8x256xf32> to vector<4x256xf32>
    %c0_6 = arith.constant 0 : index
    %c0_7 = arith.constant 0 : index
    %c0_8 = arith.constant 0 : index
    %10 = vector.load %arg5[%c0_6, %c0_7, %c0_8] : memref<2x200x256xf32, #tpu.memory_space<vmem>>, vector<1x4x256xf32>
    %11 = vector.shape_cast %10 : vector<1x4x256xf32> to vector<4x256xf32>
    %12 = vector.shape_cast %9 : vector<4x256xf32> to vector<1x4x256xf32>
    tpu.vector_store %arg5[%c0_6, %c0_7, %c0_8], %12 {strides = array<i32>} : memref<2x200x256xf32, #tpu.memory_space<vmem>>, vector<1x4x256xf32>,
    %13 = vector.extract_strided_slice %0 {offsets = [4, 0], sizes = [4, 256], strides = [1, 1]} : vector<8x256xf32> to vector<4x256xf32>
    %c1_9 = arith.constant 1 : index
    %c0_10 = arith.constant 0 : index
    %c0_11 = arith.constant 0 : index
    %14 = vector.load %arg5[%c1_9, %c0_10, %c0_11] : memref<2x200x256xf32, #tpu.memory_space<vmem>>, vector<1x4x256xf32>
    %15 = vector.shape_cast %14 : vector<1x4x256xf32> to vector<4x256xf32>
    %16 = vector.shape_cast %13 : vector<4x256xf32> to vector<1x4x256xf32>
    tpu.vector_store %arg5[%c1_9, %c0_10, %c0_11], %16 {strides = array<i32>} : memref<2x200x256xf32, #tpu.memory_space<vmem>>, vector<1x4x256xf32>,
    %c255_i32 = arith.constant 255 : i32
    %17 = tpu.dynamic_rotate %0 by %c255_i32 dim 1 : vector<8x256xf32>, i32 -> vector<8x256xf32>
    %18 = vector.extract_strided_slice %17 {offsets = [0, 0], sizes = [4, 256], strides = [1, 1]} : vector<8x256xf32> to vector<4x256xf32>
    %c0_12 = arith.constant 0 : index
    %c4 = arith.constant 4 : index
    %c0_13 = arith.constant 0 : index
    %19 = vector.load %arg5[%c0_12, %c4, %c0_13] : memref<2x200x256xf32, #tpu.memory_space<vmem>>, vector<1x4x256xf32>
    %20 = vector.shape_cast %19 : vector<1x4x256xf32> to vector<4x256xf32>
    %21 = vector.shape_cast %18 : vector<4x256xf32> to vector<1x4x256xf32>
    tpu.vector_store %arg5[%c0_12, %c4, %c0_13], %21 {strides = array<i32>} : memref<2x200x256xf32, #tpu.memory_space<vmem>>, vector<1x4x256xf32>,
    %22 = vector.extract_strided_slice %17 {offsets = [4, 0], sizes = [4, 256], strides = [1, 1]} : vector<8x256xf32> to vector<4x256xf32>
    %c1_14 = arith.constant 1 : index
    %c4_15 = arith.constant 4 : index
    %c0_16 = arith.constant 0 : index
    %23 = vector.load %arg5[%c1_14, %c4_15, %c0_16] : memref<2x200x256xf32, #tpu.memory_space<vmem>>, vector<1x4x256xf32>
    %24 = vector.shape_cast %23 : vector<1x4x256xf32> to vector<4x256xf32>
    %25 = vector.shape_cast %22 : vector<4x256xf32> to vector<1x4x256xf32>
    tpu.vector_store %arg5[%c1_14, %c4_15, %c0_16], %25 {strides = array<i32>} : memref<2x200x256xf32, #tpu.memory_space<vmem>>, vector<1x4x256xf32>,
    %c254_i32 = arith.constant 254 : i32
    %26 = tpu.dynamic_rotate %0 by %c254_i32 dim 1 : vector<8x256xf32>, i32 -> vector<8x256xf32>
    %27 = vector.extract_strided_slice %26 {offsets = [0, 0], sizes = [4, 256], strides = [1, 1]} : vector<8x256xf32> to vector<4x256xf32>
    %c0_17 = arith.constant 0 : index
    %c8 = arith.constant 8 : index
    %c0_18 = arith.constant 0 : index
    %28 = vector.load %arg5[%c0_17, %c8, %c0_18] : memref<2x200x256xf32, #tpu.memory_space<vmem>>, vector<1x4x256xf32>
    %29 = vector.shape_cast %28 : vector<1x4x256xf32> to vector<4x256xf32>
    %30 = vector.shape_cast %27 : vector<4x256xf32> to vector<1x4x256xf32>
    tpu.vector_store %arg5[%c0_17, %c8, %c0_18], %30 {strides = array<i32>} : memref<2x200x256xf32, #tpu.memory_space<vmem>>, vector<1x4x256xf32>,
    %31 = vector.extract_strided_slice %26 {offsets = [4, 0], sizes = [4, 256], strides = [1, 1]} : vector<8x256xf32> to vector<4x256xf32>
    %c1_19 = arith.constant 1 : index
    %c8_20 = arith.constant 8 : index
    %c0_21 = arith.constant 0 : index
    %32 = vector.load %arg5[%c1_19, %c8_20, %c0_21] : memref<2x200x256xf32, #tpu.memory_space<vmem>>, vector<1x4x256xf32>
    %33 = vector.shape_cast %32 : vector<1x4x256xf32> to vector<4x256xf32>
    %34 = vector.shape_cast %31 : vector<4x256xf32> to vector<1x4x256xf32>
    tpu.vector_store %arg5[%c1_19, %c8_20, %c0_21], %34 {strides = array<i32>} : memref<2x200x256xf32, #tpu.memory_space<vmem>>, vector<1x4x256xf32>,
    %c253_i32 = arith.constant 253 : i32
    %35 = tpu.dynamic_rotate %0 by %c253_i32 dim 1 : vector<8x256xf32>, i32 -> vector<8x256xf32>
    %36 = vector.extract_strided_slice %35 {offsets = [0, 0], sizes = [4, 256], strides = [1, 1]} : vector<8x256xf32> to vector<4x256xf32>
    %c0_22 = arith.constant 0 : index
    %c12 = arith.constant 12 : index
    %c0_23 = arith.constant 0 : index
    %37 = vector.load %arg5[%c0_22, %c12, %c0_23] : memref<2x200x256xf32, #tpu.memory_space<vmem>>, vector<1x4x256xf32>
    %38 = vector.shape_cast %37 : vector<1x4x256xf32> to vector<4x256xf32>
    %39 = vector.shape_cast %36 : vector<4x256xf32> to vector<1x4x256xf32>
    tpu.vector_store %arg5[%c0_22, %c12, %c0_23], %39 {strides = array<i32>} : memref<2x200x256xf32, #tpu.memory_space<vmem>>, vector<1x4x256xf32>,
    %40 = vector.extract_strided_slice %35 {offsets = [4, 0], sizes = [4, 256], strides = [1, 1]} : vector<8x256xf32> to vector<4x256xf32>
    %c1_24 = arith.constant 1 : index
    %c12_25 = arith.constant 12 : index
    %c0_26 = arith.constant 0 : index
    %41 = vector.load %arg5[%c1_24, %c12_25, %c0_26] : memref<2x200x256xf32, #tpu.memory_space<vmem>>, vector<1x4x256xf32>
    %42 = vector.shape_cast %41 : vector<1x4x256xf32> to vector<4x256xf32>
    %43 = vector.shape_cast %40 : vector<4x256xf32> to vector<1x4x256xf32>
    tpu.vector_store %arg5[%c1_24, %c12_25, %c0_26], %43 {strides = array<i32>} : memref<2x200x256xf32, #tpu.memory_space<vmem>>, vector<1x4x256xf32>,
    %c252_i32 = arith.constant 252 : i32
    %44 = tpu.dynamic_rotate %0 by %c252_i32 dim 1 : vector<8x256xf32>, i32 -> vector<8x256xf32>
    %45 = vector.extract_strided_slice %44 {offsets = [0, 0], sizes = [4, 256], strides = [1, 1]} : vector<8x256xf32> to vector<4x256xf32>
    %c0_27 = arith.constant 0 : index
    %c16 = arith.constant 16 : index
    %c0_28 = arith.constant 0 : index
    %46 = vector.load %arg5[%c0_27, %c16, %c0_28] : memref<2x200x256xf32, #tpu.memory_space<vmem>>, vector<1x4x256xf32>
    %47 = vector.shape_cast %46 : vector<1x4x256xf32> to vector<4x256xf32>
    %48 = vector.shape_cast %45 : vector<4x256xf32> to vector<1x4x256xf32>
    tpu.vector_store %arg5[%c0_27, %c16, %c0_28], %48 {strides = array<i32>} : memref<2x200x256xf32, #tpu.memory_space<vmem>>, vector<1x4x256xf32>,
    %49 = vector.extract_strided_slice %44 {offsets = [4, 0], sizes = [4, 256], strides = [1, 1]} : vector<8x256xf32> to vector<4x256xf32>
    %c1_29 = arith.constant 1 : index
    %c16_30 = arith.constant 16 : index
    %c0_31 = arith.constant 0 : index
    %50 = vector.load %arg5[%c1_29, %c16_30, %c0_31] : memref<2x200x256xf32, #tpu.memory_space<vmem>>, vector<1x4x256xf32>
    %51 = vector.shape_cast %50 : vector<1x4x256xf32> to vector<4x256xf32>
    %52 = vector.shape_cast %49 : vector<4x256xf32> to vector<1x4x256xf32>
    tpu.vector_store %arg5[%c1_29, %c16_30, %c0_31], %52 {strides = array<i32>} : memref<2x200x256xf32, #tpu.memory_space<vmem>>, vector<1x4x256xf32>,
    %c251_i32 = arith.constant 251 : i32
    %53 = tpu.dynamic_rotate %0 by %c251_i32 dim 1 : vector<8x256xf32>, i32 -> vector<8x256xf32>
    %54 = vector.extract_strided_slice %53 {offsets = [0, 0], sizes = [4, 256], strides = [1, 1]} : vector<8x256xf32> to vector<4x256xf32>
    %c0_32 = arith.constant 0 : index
    %c20 = arith.constant 20 : index
    %c0_33 = arith.constant 0 : index
    %55 = vector.load %arg5[%c0_32, %c20, %c0_33] : memref<2x200x256xf32, #tpu.memory_space<vmem>>, vector<1x4x256xf32>
    %56 = vector.shape_cast %55 : vector<1x4x256xf32> to vector<4x256xf32>
    %57 = vector.shape_cast %54 : vector<4x256xf32> to vector<1x4x256xf32>
    tpu.vector_store %arg5[%c0_32, %c20, %c0_33], %57 {strides = array<i32>} : memref<2x200x256xf32, #tpu.memory_space<vmem>>, vector<1x4x256xf32>,
    %58 = vector.extract_strided_slice %53 {offsets = [4, 0], sizes = [4, 256], strides = [1, 1]} : vector<8x256xf32> to vector<4x256xf32>
    %c1_34 = arith.constant 1 : index
    %c20_35 = arith.constant 20 : index
    %c0_36 = arith.constant 0 : index
    %59 = vector.load %arg5[%c1_34, %c20_35, %c0_36] : memref<2x200x256xf32, #tpu.memory_space<vmem>>, vector<1x4x256xf32>
    %60 = vector.shape_cast %59 : vector<1x4x256xf32> to vector<4x256xf32>
    %61 = vector.shape_cast %58 : vector<4x256xf32> to vector<1x4x256xf32>
    tpu.vector_store %arg5[%c1_34, %c20_35, %c0_36], %61 {strides = array<i32>} : memref<2x200x256xf32, #tpu.memory_space<vmem>>, vector<1x4x256xf32>,
    %c250_i32 = arith.constant 250 : i32
    %62 = tpu.dynamic_rotate %0 by %c250_i32 dim 1 : vector<8x256xf32>, i32 -> vector<8x256xf32>
    %63 = vector.extract_strided_slice %62 {offsets = [0, 0], sizes = [4, 256], strides = [1, 1]} : vector<8x256xf32> to vector<4x256xf32>
    %c0_37 = arith.constant 0 : index
    %c24 = arith.constant 24 : index
    %c0_38 = arith.constant 0 : index
    %64 = vector.load %arg5[%c0_37, %c24, %c0_38] : memref<2x200x256xf32, #tpu.memory_space<vmem>>, vector<1x4x256xf32>
    %65 = vector.shape_cast %64 : vector<1x4x256xf32> to vector<4x256xf32>
    %66 = vector.shape_cast %63 : vector<4x256xf32> to vector<1x4x256xf32>
    tpu.vector_store %arg5[%c0_37, %c24, %c0_38], %66 {strides = array<i32>} : memref<2x200x256xf32, #tpu.memory_space<vmem>>, vector<1x4x256xf32>,
    %67 = vector.extract_strided_slice %62 {offsets = [4, 0], sizes = [4, 256], strides = [1, 1]} : vector<8x256xf32> to vector<4x256xf32>
    %c1_39 = arith.constant 1 : index
    %c24_40 = arith.constant 24 : index
    %c0_41 = arith.constant 0 : index
    %68 = vector.load %arg5[%c1_39, %c24_40, %c0_41] : memref<2x200x256xf32, #tpu.memory_space<vmem>>, vector<1x4x256xf32>
    %69 = vector.shape_cast %68 : vector<1x4x256xf32> to vector<4x256xf32>
    %70 = vector.shape_cast %67 : vector<4x256xf32> to vector<1x4x256xf32>
    tpu.vector_store %arg5[%c1_39, %c24_40, %c0_41], %70 {strides = array<i32>} : memref<2x200x256xf32, #tpu.memory_space<vmem>>, vector<1x4x256xf32>,
    %c240_i32 = arith.constant 240 : i32
    %71 = tpu.dynamic_rotate %0 by %c240_i32 dim 1 : vector<8x256xf32>, i32 -> vector<8x256xf32>
    %72 = vector.extract_strided_slice %71 {offsets = [0, 0], sizes = [4, 256], strides = [1, 1]} : vector<8x256xf32> to vector<4x256xf32>
    %c0_42 = arith.constant 0 : index
    %c28 = arith.constant 28 : index
    %c0_43 = arith.constant 0 : index
    %73 = vector.load %arg5[%c0_42, %c28, %c0_43] : memref<2x200x256xf32, #tpu.memory_space<vmem>>, vector<1x4x256xf32>
    %74 = vector.shape_cast %73 : vector<1x4x256xf32> to vector<4x256xf32>
    %75 = vector.shape_cast %72 : vector<4x256xf32> to vector<1x4x256xf32>
    tpu.vector_store %arg5[%c0_42, %c28, %c0_43], %75 {strides = array<i32>} : memref<2x200x256xf32, #tpu.memory_space<vmem>>, vector<1x4x256xf32>,
    %76 = vector.extract_strided_slice %71 {offsets = [4, 0], sizes = [4, 256], strides = [1, 1]} : vector<8x256xf32> to vector<4x256xf32>
    %c1_44 = arith.constant 1 : index
    %c28_45 = arith.constant 28 : index
    %c0_46 = arith.constant 0 : index
    %77 = vector.load %arg5[%c1_44, %c28_45, %c0_46] : memref<2x200x256xf32, #tpu.memory_space<vmem>>, vector<1x4x256xf32>
    %78 = vector.shape_cast %77 : vector<1x4x256xf32> to vector<4x256xf32>
    %79 = vector.shape_cast %76 : vector<4x256xf32> to vector<1x4x256xf32>
    tpu.vector_store %arg5[%c1_44, %c28_45, %c0_46], %79 {strides = array<i32>} : memref<2x200x256xf32, #tpu.memory_space<vmem>>, vector<1x4x256xf32>,
    %c239_i32 = arith.constant 239 : i32
    %80 = tpu.dynamic_rotate %0 by %c239_i32 dim 1 : vector<8x256xf32>, i32 -> vector<8x256xf32>
    %81 = vector.extract_strided_slice %80 {offsets = [0, 0], sizes = [4, 256], strides = [1, 1]} : vector<8x256xf32> to vector<4x256xf32>
    %c0_47 = arith.constant 0 : index
    %c32 = arith.constant 32 : index
    %c0_48 = arith.constant 0 : index
    %82 = vector.load %arg5[%c0_47, %c32, %c0_48] : memref<2x200x256xf32, #tpu.memory_space<vmem>>, vector<1x4x256xf32>
    %83 = vector.shape_cast %82 : vector<1x4x256xf32> to vector<4x256xf32>
    %84 = vector.shape_cast %81 : vector<4x256xf32> to vector<1x4x256xf32>
    tpu.vector_store %arg5[%c0_47, %c32, %c0_48], %84 {strides = array<i32>} : memref<2x200x256xf32, #tpu.memory_space<vmem>>, vector<1x4x256xf32>,
    %85 = vector.extract_strided_slice %80 {offsets = [4, 0], sizes = [4, 256], strides = [1, 1]} : vector<8x256xf32> to vector<4x256xf32>
    %c1_49 = arith.constant 1 : index
    %c32_50 = arith.constant 32 : index
    %c0_51 = arith.constant 0 : index
    %86 = vector.load %arg5[%c1_49, %c32_50, %c0_51] : memref<2x200x256xf32, #tpu.memory_space<vmem>>, vector<1x4x256xf32>
    %87 = vector.shape_cast %86 : vector<1x4x256xf32> to vector<4x256xf32>
    %88 = vector.shape_cast %85 : vector<4x256xf32> to vector<1x4x256xf32>
    tpu.vector_store %arg5[%c1_49, %c32_50, %c0_51], %88 {strides = array<i32>} : memref<2x200x256xf32, #tpu.memory_space<vmem>>, vector<1x4x256xf32>,
    %c238_i32 = arith.constant 238 : i32
    %89 = tpu.dynamic_rotate %0 by %c238_i32 dim 1 : vector<8x256xf32>, i32 -> vector<8x256xf32>
    %90 = vector.extract_strided_slice %89 {offsets = [0, 0], sizes = [4, 256], strides = [1, 1]} : vector<8x256xf32> to vector<4x256xf32>
    %c0_52 = arith.constant 0 : index
    %c36 = arith.constant 36 : index
    %c0_53 = arith.constant 0 : index
    %91 = vector.load %arg5[%c0_52, %c36, %c0_53] : memref<2x200x256xf32, #tpu.memory_space<vmem>>, vector<1x4x256xf32>
    %92 = vector.shape_cast %91 : vector<1x4x256xf32> to vector<4x256xf32>
    %93 = vector.shape_cast %90 : vector<4x256xf32> to vector<1x4x256xf32>
    tpu.vector_store %arg5[%c0_52, %c36, %c0_53], %93 {strides = array<i32>} : memref<2x200x256xf32, #tpu.memory_space<vmem>>, vector<1x4x256xf32>,
    %94 = vector.extract_strided_slice %89 {offsets = [4, 0], sizes = [4, 256], strides = [1, 1]} : vector<8x256xf32> to vector<4x256xf32>
    %c1_54 = arith.constant 1 : index
    %c36_55 = arith.constant 36 : index
    %c0_56 = arith.constant 0 : index
    %95 = vector.load %arg5[%c1_54, %c36_55, %c0_56] : memref<2x200x256xf32, #tpu.memory_space<vmem>>, vector<1x4x256xf32>
    %96 = vector.shape_cast %95 : vector<1x4x256xf32> to vector<4x256xf32>
    %97 = vector.shape_cast %94 : vector<4x256xf32> to vector<1x4x256xf32>
    tpu.vector_store %arg5[%c1_54, %c36_55, %c0_56], %97 {strides = array<i32>} : memref<2x200x256xf32, #tpu.memory_space<vmem>>, vector<1x4x256xf32>,
    %c237_i32 = arith.constant 237 : i32
    %98 = tpu.dynamic_rotate %0 by %c237_i32 dim 1 : vector<8x256xf32>, i32 -> vector<8x256xf32>
    %99 = vector.extract_strided_slice %98 {offsets = [0, 0], sizes = [4, 256], strides = [1, 1]} : vector<8x256xf32> to vector<4x256xf32>
    %c0_57 = arith.constant 0 : index
    %c40 = arith.constant 40 : index
    %c0_58 = arith.constant 0 : index
    %100 = vector.load %arg5[%c0_57, %c40, %c0_58] : memref<2x200x256xf32, #tpu.memory_space<vmem>>, vector<1x4x256xf32>
    %101 = vector.shape_cast %100 : vector<1x4x256xf32> to vector<4x256xf32>
    %102 = vector.shape_cast %99 : vector<4x256xf32> to vector<1x4x256xf32>
    tpu.vector_store %arg5[%c0_57, %c40, %c0_58], %102 {strides = array<i32>} : memref<2x200x256xf32, #tpu.memory_space<vmem>>, vector<1x4x256xf32>,
    %103 = vector.extract_strided_slice %98 {offsets = [4, 0], sizes = [4, 256], strides = [1, 1]} : vector<8x256xf32> to vector<4x256xf32>
    %c1_59 = arith.constant 1 : index
    %c40_60 = arith.constant 40 : index
    %c0_61 = arith.constant 0 : index
    %104 = vector.load %arg5[%c1_59, %c40_60, %c0_61] : memref<2x200x256xf32, #tpu.memory_space<vmem>>, vector<1x4x256xf32>
    %105 = vector.shape_cast %104 : vector<1x4x256xf32> to vector<4x256xf32>
    %106 = vector.shape_cast %103 : vector<4x256xf32> to vector<1x4x256xf32>
    tpu.vector_store %arg5[%c1_59, %c40_60, %c0_61], %106 {strides = array<i32>} : memref<2x200x256xf32, #tpu.memory_space<vmem>>, vector<1x4x256xf32>,
    %c236_i32 = arith.constant 236 : i32
    %107 = tpu.dynamic_rotate %0 by %c236_i32 dim 1 : vector<8x256xf32>, i32 -> vector<8x256xf32>
    %108 = vector.extract_strided_slice %107 {offsets = [0, 0], sizes = [4, 256], strides = [1, 1]} : vector<8x256xf32> to vector<4x256xf32>
    %c0_62 = arith.constant 0 : index
    %c44 = arith.constant 44 : index
    %c0_63 = arith.constant 0 : index
    %109 = vector.load %arg5[%c0_62, %c44, %c0_63] : memref<2x200x256xf32, #tpu.memory_space<vmem>>, vector<1x4x256xf32>
    %110 = vector.shape_cast %109 : vector<1x4x256xf32> to vector<4x256xf32>
    %111 = vector.shape_cast %108 : vector<4x256xf32> to vector<1x4x256xf32>
    tpu.vector_store %arg5[%c0_62, %c44, %c0_63], %111 {strides = array<i32>} : memref<2x200x256xf32, #tpu.memory_space<vmem>>, vector<1x4x256xf32>,
    %112 = vector.extract_strided_slice %107 {offsets = [4, 0], sizes = [4, 256], strides = [1, 1]} : vector<8x256xf32> to vector<4x256xf32>
    %c1_64 = arith.constant 1 : index
    %c44_65 = arith.constant 44 : index
    %c0_66 = arith.constant 0 : index
    %113 = vector.load %arg5[%c1_64, %c44_65, %c0_66] : memref<2x200x256xf32, #tpu.memory_space<vmem>>, vector<1x4x256xf32>
    %114 = vector.shape_cast %113 : vector<1x4x256xf32> to vector<4x256xf32>
    %115 = vector.shape_cast %112 : vector<4x256xf32> to vector<1x4x256xf32>
    tpu.vector_store %arg5[%c1_64, %c44_65, %c0_66], %115 {strides = array<i32>} : memref<2x200x256xf32, #tpu.memory_space<vmem>>, vector<1x4x256xf32>,
    %c235_i32 = arith.constant 235 : i32
    %116 = tpu.dynamic_rotate %0 by %c235_i32 dim 1 : vector<8x256xf32>, i32 -> vector<8x256xf32>
    %117 = vector.extract_strided_slice %116 {offsets = [0, 0], sizes = [4, 256], strides = [1, 1]} : vector<8x256xf32> to vector<4x256xf32>
    %c0_67 = arith.constant 0 : index
    %c48 = arith.constant 48 : index
    %c0_68 = arith.constant 0 : index
    %118 = vector.load %arg5[%c0_67, %c48, %c0_68] : memref<2x200x256xf32, #tpu.memory_space<vmem>>, vector<1x4x256xf32>
    %119 = vector.shape_cast %118 : vector<1x4x256xf32> to vector<4x256xf32>
    %120 = vector.shape_cast %117 : vector<4x256xf32> to vector<1x4x256xf32>
    tpu.vector_store %arg5[%c0_67, %c48, %c0_68], %120 {strides = array<i32>} : memref<2x200x256xf32, #tpu.memory_space<vmem>>, vector<1x4x256xf32>,
    %121 = vector.extract_strided_slice %116 {offsets = [4, 0], sizes = [4, 256], strides = [1, 1]} : vector<8x256xf32> to vector<4x256xf32>
    %c1_69 = arith.constant 1 : index
    %c48_70 = arith.constant 48 : index
    %c0_71 = arith.constant 0 : index
    %122 = vector.load %arg5[%c1_69, %c48_70, %c0_71] : memref<2x200x256xf32, #tpu.memory_space<vmem>>, vector<1x4x256xf32>
    %123 = vector.shape_cast %122 : vector<1x4x256xf32> to vector<4x256xf32>
    %124 = vector.shape_cast %121 : vector<4x256xf32> to vector<1x4x256xf32>
    tpu.vector_store %arg5[%c1_69, %c48_70, %c0_71], %124 {strides = array<i32>} : memref<2x200x256xf32, #tpu.memory_space<vmem>>, vector<1x4x256xf32>,
    %c234_i32 = arith.constant 234 : i32
    %125 = tpu.dynamic_rotate %0 by %c234_i32 dim 1 : vector<8x256xf32>, i32 -> vector<8x256xf32>
    %126 = vector.extract_strided_slice %125 {offsets = [0, 0], sizes = [4, 256], strides = [1, 1]} : vector<8x256xf32> to vector<4x256xf32>
    %c0_72 = arith.constant 0 : index
    %c52 = arith.constant 52 : index
    %c0_73 = arith.constant 0 : index
    %127 = vector.load %arg5[%c0_72, %c52, %c0_73] : memref<2x200x256xf32, #tpu.memory_space<vmem>>, vector<1x4x256xf32>
    %128 = vector.shape_cast %127 : vector<1x4x256xf32> to vector<4x256xf32>
    %129 = vector.shape_cast %126 : vector<4x256xf32> to vector<1x4x256xf32>
    tpu.vector_store %arg5[%c0_72, %c52, %c0_73], %129 {strides = array<i32>} : memref<2x200x256xf32, #tpu.memory_space<vmem>>, vector<1x4x256xf32>,
    %130 = vector.extract_strided_slice %125 {offsets = [4, 0], sizes = [4, 256], strides = [1, 1]} : vector<8x256xf32> to vector<4x256xf32>
    %c1_74 = arith.constant 1 : index
    %c52_75 = arith.constant 52 : index
    %c0_76 = arith.constant 0 : index
    %131 = vector.load %arg5[%c1_74, %c52_75, %c0_76] : memref<2x200x256xf32, #tpu.memory_space<vmem>>, vector<1x4x256xf32>
    %132 = vector.shape_cast %131 : vector<1x4x256xf32> to vector<4x256xf32>
    %133 = vector.shape_cast %130 : vector<4x256xf32> to vector<1x4x256xf32>
    tpu.vector_store %arg5[%c1_74, %c52_75, %c0_76], %133 {strides = array<i32>} : memref<2x200x256xf32, #tpu.memory_space<vmem>>, vector<1x4x256xf32>,
    %c224_i32 = arith.constant 224 : i32
    %134 = tpu.dynamic_rotate %0 by %c224_i32 dim 1 : vector<8x256xf32>, i32 -> vector<8x256xf32>
    %135 = vector.extract_strided_slice %134 {offsets = [0, 0], sizes = [4, 256], strides = [1, 1]} : vector<8x256xf32> to vector<4x256xf32>
    %c0_77 = arith.constant 0 : index
    %c56 = arith.constant 56 : index
    %c0_78 = arith.constant 0 : index
    %136 = vector.load %arg5[%c0_77, %c56, %c0_78] : memref<2x200x256xf32, #tpu.memory_space<vmem>>, vector<1x4x256xf32>
    %137 = vector.shape_cast %136 : vector<1x4x256xf32> to vector<4x256xf32>
    %138 = vector.shape_cast %135 : vector<4x256xf32> to vector<1x4x256xf32>
    tpu.vector_store %arg5[%c0_77, %c56, %c0_78], %138 {strides = array<i32>} : memref<2x200x256xf32, #tpu.memory_space<vmem>>, vector<1x4x256xf32>,
    %139 = vector.extract_strided_slice %134 {offsets = [4, 0], sizes = [4, 256], strides = [1, 1]} : vector<8x256xf32> to vector<4x256xf32>
    %c1_79 = arith.constant 1 : index
    %c56_80 = arith.constant 56 : index
    %c0_81 = arith.constant 0 : index
    %140 = vector.load %arg5[%c1_79, %c56_80, %c0_81] : memref<2x200x256xf32, #tpu.memory_space<vmem>>, vector<1x4x256xf32>
    %141 = vector.shape_cast %140 : vector<1x4x256xf32> to vector<4x256xf32>
    %142 = vector.shape_cast %139 : vector<4x256xf32> to vector<1x4x256xf32>
    tpu.vector_store %arg5[%c1_79, %c56_80, %c0_81], %142 {strides = array<i32>} : memref<2x200x256xf32, #tpu.memory_space<vmem>>, vector<1x4x256xf32>,
    %c223_i32 = arith.constant 223 : i32
    %143 = tpu.dynamic_rotate %0 by %c223_i32 dim 1 : vector<8x256xf32>, i32 -> vector<8x256xf32>
    %144 = vector.extract_strided_slice %143 {offsets = [0, 0], sizes = [4, 256], strides = [1, 1]} : vector<8x256xf32> to vector<4x256xf32>
    %c0_82 = arith.constant 0 : index
    %c60 = arith.constant 60 : index
    %c0_83 = arith.constant 0 : index
    %145 = vector.load %arg5[%c0_82, %c60, %c0_83] : memref<2x200x256xf32, #tpu.memory_space<vmem>>, vector<1x4x256xf32>
    %146 = vector.shape_cast %145 : vector<1x4x256xf32> to vector<4x256xf32>
    %147 = vector.shape_cast %144 : vector<4x256xf32> to vector<1x4x256xf32>
    tpu.vector_store %arg5[%c0_82, %c60, %c0_83], %147 {strides = array<i32>} : memref<2x200x256xf32, #tpu.memory_space<vmem>>, vector<1x4x256xf32>,
    %148 = vector.extract_strided_slice %143 {offsets = [4, 0], sizes = [4, 256], strides = [1, 1]} : vector<8x256xf32> to vector<4x256xf32>
    %c1_84 = arith.constant 1 : index
    %c60_85 = arith.constant 60 : index
    %c0_86 = arith.constant 0 : index
    %149 = vector.load %arg5[%c1_84, %c60_85, %c0_86] : memref<2x200x256xf32, #tpu.memory_space<vmem>>, vector<1x4x256xf32>
    %150 = vector.shape_cast %149 : vector<1x4x256xf32> to vector<4x256xf32>
    %151 = vector.shape_cast %148 : vector<4x256xf32> to vector<1x4x256xf32>
    tpu.vector_store %arg5[%c1_84, %c60_85, %c0_86], %151 {strides = array<i32>} : memref<2x200x256xf32, #tpu.memory_space<vmem>>, vector<1x4x256xf32>,
    %c222_i32 = arith.constant 222 : i32
    %152 = tpu.dynamic_rotate %0 by %c222_i32 dim 1 : vector<8x256xf32>, i32 -> vector<8x256xf32>
    %153 = vector.extract_strided_slice %152 {offsets = [0, 0], sizes = [4, 256], strides = [1, 1]} : vector<8x256xf32> to vector<4x256xf32>
    %c0_87 = arith.constant 0 : index
    %c64 = arith.constant 64 : index
    %c0_88 = arith.constant 0 : index
    %154 = vector.load %arg5[%c0_87, %c64, %c0_88] : memref<2x200x256xf32, #tpu.memory_space<vmem>>, vector<1x4x256xf32>
    %155 = vector.shape_cast %154 : vector<1x4x256xf32> to vector<4x256xf32>
    %156 = vector.shape_cast %153 : vector<4x256xf32> to vector<1x4x256xf32>
    tpu.vector_store %arg5[%c0_87, %c64, %c0_88], %156 {strides = array<i32>} : memref<2x200x256xf32, #tpu.memory_space<vmem>>, vector<1x4x256xf32>,
    %157 = vector.extract_strided_slice %152 {offsets = [4, 0], sizes = [4, 256], strides = [1, 1]} : vector<8x256xf32> to vector<4x256xf32>
    %c1_89 = arith.constant 1 : index
    %c64_90 = arith.constant 64 : index
    %c0_91 = arith.constant 0 : index
    %158 = vector.load %arg5[%c1_89, %c64_90, %c0_91] : memref<2x200x256xf32, #tpu.memory_space<vmem>>, vector<1x4x256xf32>
    %159 = vector.shape_cast %158 : vector<1x4x256xf32> to vector<4x256xf32>
    %160 = vector.shape_cast %157 : vector<4x256xf32> to vector<1x4x256xf32>
    tpu.vector_store %arg5[%c1_89, %c64_90, %c0_91], %160 {strides = array<i32>} : memref<2x200x256xf32, #tpu.memory_space<vmem>>, vector<1x4x256xf32>,
    %c221_i32 = arith.constant 221 : i32
    %161 = tpu.dynamic_rotate %0 by %c221_i32 dim 1 : vector<8x256xf32>, i32 -> vector<8x256xf32>
    %162 = vector.extract_strided_slice %161 {offsets = [0, 0], sizes = [4, 256], strides = [1, 1]} : vector<8x256xf32> to vector<4x256xf32>
    %c0_92 = arith.constant 0 : index
    %c68 = arith.constant 68 : index
    %c0_93 = arith.constant 0 : index
    %163 = vector.load %arg5[%c0_92, %c68, %c0_93] : memref<2x200x256xf32, #tpu.memory_space<vmem>>, vector<1x4x256xf32>
    %164 = vector.shape_cast %163 : vector<1x4x256xf32> to vector<4x256xf32>
    %165 = vector.shape_cast %162 : vector<4x256xf32> to vector<1x4x256xf32>
    tpu.vector_store %arg5[%c0_92, %c68, %c0_93], %165 {strides = array<i32>} : memref<2x200x256xf32, #tpu.memory_space<vmem>>, vector<1x4x256xf32>,
    %166 = vector.extract_strided_slice %161 {offsets = [4, 0], sizes = [4, 256], strides = [1, 1]} : vector<8x256xf32> to vector<4x256xf32>
    %c1_94 = arith.constant 1 : index
    %c68_95 = arith.constant 68 : index
    %c0_96 = arith.constant 0 : index
    %167 = vector.load %arg5[%c1_94, %c68_95, %c0_96] : memref<2x200x256xf32, #tpu.memory_space<vmem>>, vector<1x4x256xf32>
    %168 = vector.shape_cast %167 : vector<1x4x256xf32> to vector<4x256xf32>
    %169 = vector.shape_cast %166 : vector<4x256xf32> to vector<1x4x256xf32>
    tpu.vector_store %arg5[%c1_94, %c68_95, %c0_96], %169 {strides = array<i32>} : memref<2x200x256xf32, #tpu.memory_space<vmem>>, vector<1x4x256xf32>,
    %c220_i32 = arith.constant 220 : i32
    %170 = tpu.dynamic_rotate %0 by %c220_i32 dim 1 : vector<8x256xf32>, i32 -> vector<8x256xf32>
    %171 = vector.extract_strided_slice %170 {offsets = [0, 0], sizes = [4, 256], strides = [1, 1]} : vector<8x256xf32> to vector<4x256xf32>
    %c0_97 = arith.constant 0 : index
    %c72 = arith.constant 72 : index
    %c0_98 = arith.constant 0 : index
    %172 = vector.load %arg5[%c0_97, %c72, %c0_98] : memref<2x200x256xf32, #tpu.memory_space<vmem>>, vector<1x4x256xf32>
    %173 = vector.shape_cast %172 : vector<1x4x256xf32> to vector<4x256xf32>
    %174 = vector.shape_cast %171 : vector<4x256xf32> to vector<1x4x256xf32>
    tpu.vector_store %arg5[%c0_97, %c72, %c0_98], %174 {strides = array<i32>} : memref<2x200x256xf32, #tpu.memory_space<vmem>>, vector<1x4x256xf32>,
    %175 = vector.extract_strided_slice %170 {offsets = [4, 0], sizes = [4, 256], strides = [1, 1]} : vector<8x256xf32> to vector<4x256xf32>
    %c1_99 = arith.constant 1 : index
    %c72_100 = arith.constant 72 : index
    %c0_101 = arith.constant 0 : index
    %176 = vector.load %arg5[%c1_99, %c72_100, %c0_101] : memref<2x200x256xf32, #tpu.memory_space<vmem>>, vector<1x4x256xf32>
    %177 = vector.shape_cast %176 : vector<1x4x256xf32> to vector<4x256xf32>
    %178 = vector.shape_cast %175 : vector<4x256xf32> to vector<1x4x256xf32>
    tpu.vector_store %arg5[%c1_99, %c72_100, %c0_101], %178 {strides = array<i32>} : memref<2x200x256xf32, #tpu.memory_space<vmem>>, vector<1x4x256xf32>,
    %c219_i32 = arith.constant 219 : i32
    %179 = tpu.dynamic_rotate %0 by %c219_i32 dim 1 : vector<8x256xf32>, i32 -> vector<8x256xf32>
    %180 = vector.extract_strided_slice %179 {offsets = [0, 0], sizes = [4, 256], strides = [1, 1]} : vector<8x256xf32> to vector<4x256xf32>
    %c0_102 = arith.constant 0 : index
    %c76 = arith.constant 76 : index
    %c0_103 = arith.constant 0 : index
    %181 = vector.load %arg5[%c0_102, %c76, %c0_103] : memref<2x200x256xf32, #tpu.memory_space<vmem>>, vector<1x4x256xf32>
    %182 = vector.shape_cast %181 : vector<1x4x256xf32> to vector<4x256xf32>
    %183 = vector.shape_cast %180 : vector<4x256xf32> to vector<1x4x256xf32>
    tpu.vector_store %arg5[%c0_102, %c76, %c0_103], %183 {strides = array<i32>} : memref<2x200x256xf32, #tpu.memory_space<vmem>>, vector<1x4x256xf32>,
    %184 = vector.extract_strided_slice %179 {offsets = [4, 0], sizes = [4, 256], strides = [1, 1]} : vector<8x256xf32> to vector<4x256xf32>
    %c1_104 = arith.constant 1 : index
    %c76_105 = arith.constant 76 : index
    %c0_106 = arith.constant 0 : index
    %185 = vector.load %arg5[%c1_104, %c76_105, %c0_106] : memref<2x200x256xf32, #tpu.memory_space<vmem>>, vector<1x4x256xf32>
    %186 = vector.shape_cast %185 : vector<1x4x256xf32> to vector<4x256xf32>
    %187 = vector.shape_cast %184 : vector<4x256xf32> to vector<1x4x256xf32>
    tpu.vector_store %arg5[%c1_104, %c76_105, %c0_106], %187 {strides = array<i32>} : memref<2x200x256xf32, #tpu.memory_space<vmem>>, vector<1x4x256xf32>,
    %c218_i32 = arith.constant 218 : i32
    %188 = tpu.dynamic_rotate %0 by %c218_i32 dim 1 : vector<8x256xf32>, i32 -> vector<8x256xf32>
    %189 = vector.extract_strided_slice %188 {offsets = [0, 0], sizes = [4, 256], strides = [1, 1]} : vector<8x256xf32> to vector<4x256xf32>
    %c0_107 = arith.constant 0 : index
    %c80 = arith.constant 80 : index
    %c0_108 = arith.constant 0 : index
    %190 = vector.load %arg5[%c0_107, %c80, %c0_108] : memref<2x200x256xf32, #tpu.memory_space<vmem>>, vector<1x4x256xf32>
    %191 = vector.shape_cast %190 : vector<1x4x256xf32> to vector<4x256xf32>
    %192 = vector.shape_cast %189 : vector<4x256xf32> to vector<1x4x256xf32>
    tpu.vector_store %arg5[%c0_107, %c80, %c0_108], %192 {strides = array<i32>} : memref<2x200x256xf32, #tpu.memory_space<vmem>>, vector<1x4x256xf32>,
    %193 = vector.extract_strided_slice %188 {offsets = [4, 0], sizes = [4, 256], strides = [1, 1]} : vector<8x256xf32> to vector<4x256xf32>
    %c1_109 = arith.constant 1 : index
    %c80_110 = arith.constant 80 : index
    %c0_111 = arith.constant 0 : index
    %194 = vector.load %arg5[%c1_109, %c80_110, %c0_111] : memref<2x200x256xf32, #tpu.memory_space<vmem>>, vector<1x4x256xf32>
    %195 = vector.shape_cast %194 : vector<1x4x256xf32> to vector<4x256xf32>
    %196 = vector.shape_cast %193 : vector<4x256xf32> to vector<1x4x256xf32>
    tpu.vector_store %arg5[%c1_109, %c80_110, %c0_111], %196 {strides = array<i32>} : memref<2x200x256xf32, #tpu.memory_space<vmem>>, vector<1x4x256xf32>,
    %c208_i32 = arith.constant 208 : i32
    %197 = tpu.dynamic_rotate %0 by %c208_i32 dim 1 : vector<8x256xf32>, i32 -> vector<8x256xf32>
    %198 = vector.extract_strided_slice %197 {offsets = [0, 0], sizes = [4, 256], strides = [1, 1]} : vector<8x256xf32> to vector<4x256xf32>
    %c0_112 = arith.constant 0 : index
    %c84 = arith.constant 84 : index
    %c0_113 = arith.constant 0 : index
    %199 = vector.load %arg5[%c0_112, %c84, %c0_113] : memref<2x200x256xf32, #tpu.memory_space<vmem>>, vector<1x4x256xf32>
    %200 = vector.shape_cast %199 : vector<1x4x256xf32> to vector<4x256xf32>
    %201 = vector.shape_cast %198 : vector<4x256xf32> to vector<1x4x256xf32>
    tpu.vector_store %arg5[%c0_112, %c84, %c0_113], %201 {strides = array<i32>} : memref<2x200x256xf32, #tpu.memory_space<vmem>>, vector<1x4x256xf32>,
    %202 = vector.extract_strided_slice %197 {offsets = [4, 0], sizes = [4, 256], strides = [1, 1]} : vector<8x256xf32> to vector<4x256xf32>
    %c1_114 = arith.constant 1 : index
    %c84_115 = arith.constant 84 : index
    %c0_116 = arith.constant 0 : index
    %203 = vector.load %arg5[%c1_114, %c84_115, %c0_116] : memref<2x200x256xf32, #tpu.memory_space<vmem>>, vector<1x4x256xf32>
    %204 = vector.shape_cast %203 : vector<1x4x256xf32> to vector<4x256xf32>
    %205 = vector.shape_cast %202 : vector<4x256xf32> to vector<1x4x256xf32>
    tpu.vector_store %arg5[%c1_114, %c84_115, %c0_116], %205 {strides = array<i32>} : memref<2x200x256xf32, #tpu.memory_space<vmem>>, vector<1x4x256xf32>,
    %c207_i32 = arith.constant 207 : i32
    %206 = tpu.dynamic_rotate %0 by %c207_i32 dim 1 : vector<8x256xf32>, i32 -> vector<8x256xf32>
    %207 = vector.extract_strided_slice %206 {offsets = [0, 0], sizes = [4, 256], strides = [1, 1]} : vector<8x256xf32> to vector<4x256xf32>
    %c0_117 = arith.constant 0 : index
    %c88 = arith.constant 88 : index
    %c0_118 = arith.constant 0 : index
    %208 = vector.load %arg5[%c0_117, %c88, %c0_118] : memref<2x200x256xf32, #tpu.memory_space<vmem>>, vector<1x4x256xf32>
    %209 = vector.shape_cast %208 : vector<1x4x256xf32> to vector<4x256xf32>
    %210 = vector.shape_cast %207 : vector<4x256xf32> to vector<1x4x256xf32>
    tpu.vector_store %arg5[%c0_117, %c88, %c0_118], %210 {strides = array<i32>} : memref<2x200x256xf32, #tpu.memory_space<vmem>>, vector<1x4x256xf32>,
    %211 = vector.extract_strided_slice %206 {offsets = [4, 0], sizes = [4, 256], strides = [1, 1]} : vector<8x256xf32> to vector<4x256xf32>
    %c1_119 = arith.constant 1 : index
    %c88_120 = arith.constant 88 : index
    %c0_121 = arith.constant 0 : index
    %212 = vector.load %arg5[%c1_119, %c88_120, %c0_121] : memref<2x200x256xf32, #tpu.memory_space<vmem>>, vector<1x4x256xf32>
    %213 = vector.shape_cast %212 : vector<1x4x256xf32> to vector<4x256xf32>
    %214 = vector.shape_cast %211 : vector<4x256xf32> to vector<1x4x256xf32>
    tpu.vector_store %arg5[%c1_119, %c88_120, %c0_121], %214 {strides = array<i32>} : memref<2x200x256xf32, #tpu.memory_space<vmem>>, vector<1x4x256xf32>,
    %c206_i32 = arith.constant 206 : i32
    %215 = tpu.dynamic_rotate %0 by %c206_i32 dim 1 : vector<8x256xf32>, i32 -> vector<8x256xf32>
    %216 = vector.extract_strided_slice %215 {offsets = [0, 0], sizes = [4, 256], strides = [1, 1]} : vector<8x256xf32> to vector<4x256xf32>
    %c0_122 = arith.constant 0 : index
    %c92 = arith.constant 92 : index
    %c0_123 = arith.constant 0 : index
    %217 = vector.load %arg5[%c0_122, %c92, %c0_123] : memref<2x200x256xf32, #tpu.memory_space<vmem>>, vector<1x4x256xf32>
    %218 = vector.shape_cast %217 : vector<1x4x256xf32> to vector<4x256xf32>
    %219 = vector.shape_cast %216 : vector<4x256xf32> to vector<1x4x256xf32>
    tpu.vector_store %arg5[%c0_122, %c92, %c0_123], %219 {strides = array<i32>} : memref<2x200x256xf32, #tpu.memory_space<vmem>>, vector<1x4x256xf32>,
    %220 = vector.extract_strided_slice %215 {offsets = [4, 0], sizes = [4, 256], strides = [1, 1]} : vector<8x256xf32> to vector<4x256xf32>
    %c1_124 = arith.constant 1 : index
    %c92_125 = arith.constant 92 : index
    %c0_126 = arith.constant 0 : index
    %221 = vector.load %arg5[%c1_124, %c92_125, %c0_126] : memref<2x200x256xf32, #tpu.memory_space<vmem>>, vector<1x4x256xf32>
    %222 = vector.shape_cast %221 : vector<1x4x256xf32> to vector<4x256xf32>
    %223 = vector.shape_cast %220 : vector<4x256xf32> to vector<1x4x256xf32>
    tpu.vector_store %arg5[%c1_124, %c92_125, %c0_126], %223 {strides = array<i32>} : memref<2x200x256xf32, #tpu.memory_space<vmem>>, vector<1x4x256xf32>,
    %c205_i32 = arith.constant 205 : i32
    %224 = tpu.dynamic_rotate %0 by %c205_i32 dim 1 : vector<8x256xf32>, i32 -> vector<8x256xf32>
    %225 = vector.extract_strided_slice %224 {offsets = [0, 0], sizes = [4, 256], strides = [1, 1]} : vector<8x256xf32> to vector<4x256xf32>
    %c0_127 = arith.constant 0 : index
    %c96 = arith.constant 96 : index
    %c0_128 = arith.constant 0 : index
    %226 = vector.load %arg5[%c0_127, %c96, %c0_128] : memref<2x200x256xf32, #tpu.memory_space<vmem>>, vector<1x4x256xf32>
    %227 = vector.shape_cast %226 : vector<1x4x256xf32> to vector<4x256xf32>
    %228 = vector.shape_cast %225 : vector<4x256xf32> to vector<1x4x256xf32>
    tpu.vector_store %arg5[%c0_127, %c96, %c0_128], %228 {strides = array<i32>} : memref<2x200x256xf32, #tpu.memory_space<vmem>>, vector<1x4x256xf32>,
    %229 = vector.extract_strided_slice %224 {offsets = [4, 0], sizes = [4, 256], strides = [1, 1]} : vector<8x256xf32> to vector<4x256xf32>
    %c1_129 = arith.constant 1 : index
    %c96_130 = arith.constant 96 : index
    %c0_131 = arith.constant 0 : index
    %230 = vector.load %arg5[%c1_129, %c96_130, %c0_131] : memref<2x200x256xf32, #tpu.memory_space<vmem>>, vector<1x4x256xf32>
    %231 = vector.shape_cast %230 : vector<1x4x256xf32> to vector<4x256xf32>
    %232 = vector.shape_cast %229 : vector<4x256xf32> to vector<1x4x256xf32>
    tpu.vector_store %arg5[%c1_129, %c96_130, %c0_131], %232 {strides = array<i32>} : memref<2x200x256xf32, #tpu.memory_space<vmem>>, vector<1x4x256xf32>,
    %c204_i32 = arith.constant 204 : i32
    %233 = tpu.dynamic_rotate %0 by %c204_i32 dim 1 : vector<8x256xf32>, i32 -> vector<8x256xf32>
    %234 = vector.extract_strided_slice %233 {offsets = [0, 0], sizes = [4, 256], strides = [1, 1]} : vector<8x256xf32> to vector<4x256xf32>
    %c0_132 = arith.constant 0 : index
    %c100 = arith.constant 100 : index
    %c0_133 = arith.constant 0 : index
    %235 = vector.load %arg5[%c0_132, %c100, %c0_133] : memref<2x200x256xf32, #tpu.memory_space<vmem>>, vector<1x4x256xf32>
    %236 = vector.shape_cast %235 : vector<1x4x256xf32> to vector<4x256xf32>
    %237 = vector.shape_cast %234 : vector<4x256xf32> to vector<1x4x256xf32>
    tpu.vector_store %arg5[%c0_132, %c100, %c0_133], %237 {strides = array<i32>} : memref<2x200x256xf32, #tpu.memory_space<vmem>>, vector<1x4x256xf32>,
    %238 = vector.extract_strided_slice %233 {offsets = [4, 0], sizes = [4, 256], strides = [1, 1]} : vector<8x256xf32> to vector<4x256xf32>
    %c1_134 = arith.constant 1 : index
    %c100_135 = arith.constant 100 : index
    %c0_136 = arith.constant 0 : index
    %239 = vector.load %arg5[%c1_134, %c100_135, %c0_136] : memref<2x200x256xf32, #tpu.memory_space<vmem>>, vector<1x4x256xf32>
    %240 = vector.shape_cast %239 : vector<1x4x256xf32> to vector<4x256xf32>
    %241 = vector.shape_cast %238 : vector<4x256xf32> to vector<1x4x256xf32>
    tpu.vector_store %arg5[%c1_134, %c100_135, %c0_136], %241 {strides = array<i32>} : memref<2x200x256xf32, #tpu.memory_space<vmem>>, vector<1x4x256xf32>,
    %c203_i32 = arith.constant 203 : i32
    %242 = tpu.dynamic_rotate %0 by %c203_i32 dim 1 : vector<8x256xf32>, i32 -> vector<8x256xf32>
    %243 = vector.extract_strided_slice %242 {offsets = [0, 0], sizes = [4, 256], strides = [1, 1]} : vector<8x256xf32> to vector<4x256xf32>
    %c0_137 = arith.constant 0 : index
    %c104 = arith.constant 104 : index
    %c0_138 = arith.constant 0 : index
    %244 = vector.load %arg5[%c0_137, %c104, %c0_138] : memref<2x200x256xf32, #tpu.memory_space<vmem>>, vector<1x4x256xf32>
    %245 = vector.shape_cast %244 : vector<1x4x256xf32> to vector<4x256xf32>
    %246 = vector.shape_cast %243 : vector<4x256xf32> to vector<1x4x256xf32>
    tpu.vector_store %arg5[%c0_137, %c104, %c0_138], %246 {strides = array<i32>} : memref<2x200x256xf32, #tpu.memory_space<vmem>>, vector<1x4x256xf32>,
    %247 = vector.extract_strided_slice %242 {offsets = [4, 0], sizes = [4, 256], strides = [1, 1]} : vector<8x256xf32> to vector<4x256xf32>
    %c1_139 = arith.constant 1 : index
    %c104_140 = arith.constant 104 : index
    %c0_141 = arith.constant 0 : index
    %248 = vector.load %arg5[%c1_139, %c104_140, %c0_141] : memref<2x200x256xf32, #tpu.memory_space<vmem>>, vector<1x4x256xf32>
    %249 = vector.shape_cast %248 : vector<1x4x256xf32> to vector<4x256xf32>
    %250 = vector.shape_cast %247 : vector<4x256xf32> to vector<1x4x256xf32>
    tpu.vector_store %arg5[%c1_139, %c104_140, %c0_141], %250 {strides = array<i32>} : memref<2x200x256xf32, #tpu.memory_space<vmem>>, vector<1x4x256xf32>,
    %c202_i32 = arith.constant 202 : i32
    %251 = tpu.dynamic_rotate %0 by %c202_i32 dim 1 : vector<8x256xf32>, i32 -> vector<8x256xf32>
    %252 = vector.extract_strided_slice %251 {offsets = [0, 0], sizes = [4, 256], strides = [1, 1]} : vector<8x256xf32> to vector<4x256xf32>
    %c0_142 = arith.constant 0 : index
    %c108 = arith.constant 108 : index
    %c0_143 = arith.constant 0 : index
    %253 = vector.load %arg5[%c0_142, %c108, %c0_143] : memref<2x200x256xf32, #tpu.memory_space<vmem>>, vector<1x4x256xf32>
    %254 = vector.shape_cast %253 : vector<1x4x256xf32> to vector<4x256xf32>
    %255 = vector.shape_cast %252 : vector<4x256xf32> to vector<1x4x256xf32>
    tpu.vector_store %arg5[%c0_142, %c108, %c0_143], %255 {strides = array<i32>} : memref<2x200x256xf32, #tpu.memory_space<vmem>>, vector<1x4x256xf32>,
    %256 = vector.extract_strided_slice %251 {offsets = [4, 0], sizes = [4, 256], strides = [1, 1]} : vector<8x256xf32> to vector<4x256xf32>
    %c1_144 = arith.constant 1 : index
    %c108_145 = arith.constant 108 : index
    %c0_146 = arith.constant 0 : index
    %257 = vector.load %arg5[%c1_144, %c108_145, %c0_146] : memref<2x200x256xf32, #tpu.memory_space<vmem>>, vector<1x4x256xf32>
    %258 = vector.shape_cast %257 : vector<1x4x256xf32> to vector<4x256xf32>
    %259 = vector.shape_cast %256 : vector<4x256xf32> to vector<1x4x256xf32>
    tpu.vector_store %arg5[%c1_144, %c108_145, %c0_146], %259 {strides = array<i32>} : memref<2x200x256xf32, #tpu.memory_space<vmem>>, vector<1x4x256xf32>,
    %c192_i32 = arith.constant 192 : i32
    %260 = tpu.dynamic_rotate %0 by %c192_i32 dim 1 : vector<8x256xf32>, i32 -> vector<8x256xf32>
    %261 = vector.extract_strided_slice %260 {offsets = [0, 0], sizes = [4, 256], strides = [1, 1]} : vector<8x256xf32> to vector<4x256xf32>
    %c0_147 = arith.constant 0 : index
    %c112 = arith.constant 112 : index
    %c0_148 = arith.constant 0 : index
    %262 = vector.load %arg5[%c0_147, %c112, %c0_148] : memref<2x200x256xf32, #tpu.memory_space<vmem>>, vector<1x4x256xf32>
    %263 = vector.shape_cast %262 : vector<1x4x256xf32> to vector<4x256xf32>
    %264 = vector.shape_cast %261 : vector<4x256xf32> to vector<1x4x256xf32>
    tpu.vector_store %arg5[%c0_147, %c112, %c0_148], %264 {strides = array<i32>} : memref<2x200x256xf32, #tpu.memory_space<vmem>>, vector<1x4x256xf32>,
    %265 = vector.extract_strided_slice %260 {offsets = [4, 0], sizes = [4, 256], strides = [1, 1]} : vector<8x256xf32> to vector<4x256xf32>
    %c1_149 = arith.constant 1 : index
    %c112_150 = arith.constant 112 : index
    %c0_151 = arith.constant 0 : index
    %266 = vector.load %arg5[%c1_149, %c112_150, %c0_151] : memref<2x200x256xf32, #tpu.memory_space<vmem>>, vector<1x4x256xf32>
    %267 = vector.shape_cast %266 : vector<1x4x256xf32> to vector<4x256xf32>
    %268 = vector.shape_cast %265 : vector<4x256xf32> to vector<1x4x256xf32>
    tpu.vector_store %arg5[%c1_149, %c112_150, %c0_151], %268 {strides = array<i32>} : memref<2x200x256xf32, #tpu.memory_space<vmem>>, vector<1x4x256xf32>,
    %c191_i32 = arith.constant 191 : i32
    %269 = tpu.dynamic_rotate %0 by %c191_i32 dim 1 : vector<8x256xf32>, i32 -> vector<8x256xf32>
    %270 = vector.extract_strided_slice %269 {offsets = [0, 0], sizes = [4, 256], strides = [1, 1]} : vector<8x256xf32> to vector<4x256xf32>
    %c0_152 = arith.constant 0 : index
    %c116 = arith.constant 116 : index
    %c0_153 = arith.constant 0 : index
    %271 = vector.load %arg5[%c0_152, %c116, %c0_153] : memref<2x200x256xf32, #tpu.memory_space<vmem>>, vector<1x4x256xf32>
    %272 = vector.shape_cast %271 : vector<1x4x256xf32> to vector<4x256xf32>
    %273 = vector.shape_cast %270 : vector<4x256xf32> to vector<1x4x256xf32>
    tpu.vector_store %arg5[%c0_152, %c116, %c0_153], %273 {strides = array<i32>} : memref<2x200x256xf32, #tpu.memory_space<vmem>>, vector<1x4x256xf32>,
    %274 = vector.extract_strided_slice %269 {offsets = [4, 0], sizes = [4, 256], strides = [1, 1]} : vector<8x256xf32> to vector<4x256xf32>
    %c1_154 = arith.constant 1 : index
    %c116_155 = arith.constant 116 : index
    %c0_156 = arith.constant 0 : index
    %275 = vector.load %arg5[%c1_154, %c116_155, %c0_156] : memref<2x200x256xf32, #tpu.memory_space<vmem>>, vector<1x4x256xf32>
    %276 = vector.shape_cast %275 : vector<1x4x256xf32> to vector<4x256xf32>
    %277 = vector.shape_cast %274 : vector<4x256xf32> to vector<1x4x256xf32>
    tpu.vector_store %arg5[%c1_154, %c116_155, %c0_156], %277 {strides = array<i32>} : memref<2x200x256xf32, #tpu.memory_space<vmem>>, vector<1x4x256xf32>,
    %c190_i32 = arith.constant 190 : i32
    %278 = tpu.dynamic_rotate %0 by %c190_i32 dim 1 : vector<8x256xf32>, i32 -> vector<8x256xf32>
    %279 = vector.extract_strided_slice %278 {offsets = [0, 0], sizes = [4, 256], strides = [1, 1]} : vector<8x256xf32> to vector<4x256xf32>
    %c0_157 = arith.constant 0 : index
    %c120 = arith.constant 120 : index
    %c0_158 = arith.constant 0 : index
    %280 = vector.load %arg5[%c0_157, %c120, %c0_158] : memref<2x200x256xf32, #tpu.memory_space<vmem>>, vector<1x4x256xf32>
    %281 = vector.shape_cast %280 : vector<1x4x256xf32> to vector<4x256xf32>
    %282 = vector.shape_cast %279 : vector<4x256xf32> to vector<1x4x256xf32>
    tpu.vector_store %arg5[%c0_157, %c120, %c0_158], %282 {strides = array<i32>} : memref<2x200x256xf32, #tpu.memory_space<vmem>>, vector<1x4x256xf32>,
    %283 = vector.extract_strided_slice %278 {offsets = [4, 0], sizes = [4, 256], strides = [1, 1]} : vector<8x256xf32> to vector<4x256xf32>
    %c1_159 = arith.constant 1 : index
    %c120_160 = arith.constant 120 : index
    %c0_161 = arith.constant 0 : index
    %284 = vector.load %arg5[%c1_159, %c120_160, %c0_161] : memref<2x200x256xf32, #tpu.memory_space<vmem>>, vector<1x4x256xf32>
    %285 = vector.shape_cast %284 : vector<1x4x256xf32> to vector<4x256xf32>
    %286 = vector.shape_cast %283 : vector<4x256xf32> to vector<1x4x256xf32>
    tpu.vector_store %arg5[%c1_159, %c120_160, %c0_161], %286 {strides = array<i32>} : memref<2x200x256xf32, #tpu.memory_space<vmem>>, vector<1x4x256xf32>,
    %c189_i32 = arith.constant 189 : i32
    %287 = tpu.dynamic_rotate %0 by %c189_i32 dim 1 : vector<8x256xf32>, i32 -> vector<8x256xf32>
    %288 = vector.extract_strided_slice %287 {offsets = [0, 0], sizes = [4, 256], strides = [1, 1]} : vector<8x256xf32> to vector<4x256xf32>
    %c0_162 = arith.constant 0 : index
    %c124 = arith.constant 124 : index
    %c0_163 = arith.constant 0 : index
    %289 = vector.load %arg5[%c0_162, %c124, %c0_163] : memref<2x200x256xf32, #tpu.memory_space<vmem>>, vector<1x4x256xf32>
    %290 = vector.shape_cast %289 : vector<1x4x256xf32> to vector<4x256xf32>
    %291 = vector.shape_cast %288 : vector<4x256xf32> to vector<1x4x256xf32>
    tpu.vector_store %arg5[%c0_162, %c124, %c0_163], %291 {strides = array<i32>} : memref<2x200x256xf32, #tpu.memory_space<vmem>>, vector<1x4x256xf32>,
    %292 = vector.extract_strided_slice %287 {offsets = [4, 0], sizes = [4, 256], strides = [1, 1]} : vector<8x256xf32> to vector<4x256xf32>
    %c1_164 = arith.constant 1 : index
    %c124_165 = arith.constant 124 : index
    %c0_166 = arith.constant 0 : index
    %293 = vector.load %arg5[%c1_164, %c124_165, %c0_166] : memref<2x200x256xf32, #tpu.memory_space<vmem>>, vector<1x4x256xf32>
    %294 = vector.shape_cast %293 : vector<1x4x256xf32> to vector<4x256xf32>
    %295 = vector.shape_cast %292 : vector<4x256xf32> to vector<1x4x256xf32>
    tpu.vector_store %arg5[%c1_164, %c124_165, %c0_166], %295 {strides = array<i32>} : memref<2x200x256xf32, #tpu.memory_space<vmem>>, vector<1x4x256xf32>,
    %c188_i32 = arith.constant 188 : i32
    %296 = tpu.dynamic_rotate %0 by %c188_i32 dim 1 : vector<8x256xf32>, i32 -> vector<8x256xf32>
    %297 = vector.extract_strided_slice %296 {offsets = [0, 0], sizes = [4, 256], strides = [1, 1]} : vector<8x256xf32> to vector<4x256xf32>
    %c0_167 = arith.constant 0 : index
    %c128 = arith.constant 128 : index
    %c0_168 = arith.constant 0 : index
    %298 = vector.load %arg5[%c0_167, %c128, %c0_168] : memref<2x200x256xf32, #tpu.memory_space<vmem>>, vector<1x4x256xf32>
    %299 = vector.shape_cast %298 : vector<1x4x256xf32> to vector<4x256xf32>
    %300 = vector.shape_cast %297 : vector<4x256xf32> to vector<1x4x256xf32>
    tpu.vector_store %arg5[%c0_167, %c128, %c0_168], %300 {strides = array<i32>} : memref<2x200x256xf32, #tpu.memory_space<vmem>>, vector<1x4x256xf32>,
    %301 = vector.extract_strided_slice %296 {offsets = [4, 0], sizes = [4, 256], strides = [1, 1]} : vector<8x256xf32> to vector<4x256xf32>
    %c1_169 = arith.constant 1 : index
    %c128_170 = arith.constant 128 : index
    %c0_171 = arith.constant 0 : index
    %302 = vector.load %arg5[%c1_169, %c128_170, %c0_171] : memref<2x200x256xf32, #tpu.memory_space<vmem>>, vector<1x4x256xf32>
    %303 = vector.shape_cast %302 : vector<1x4x256xf32> to vector<4x256xf32>
    %304 = vector.shape_cast %301 : vector<4x256xf32> to vector<1x4x256xf32>
    tpu.vector_store %arg5[%c1_169, %c128_170, %c0_171], %304 {strides = array<i32>} : memref<2x200x256xf32, #tpu.memory_space<vmem>>, vector<1x4x256xf32>,
    %c187_i32 = arith.constant 187 : i32
    %305 = tpu.dynamic_rotate %0 by %c187_i32 dim 1 : vector<8x256xf32>, i32 -> vector<8x256xf32>
    %306 = vector.extract_strided_slice %305 {offsets = [0, 0], sizes = [4, 256], strides = [1, 1]} : vector<8x256xf32> to vector<4x256xf32>
    %c0_172 = arith.constant 0 : index
    %c132 = arith.constant 132 : index
    %c0_173 = arith.constant 0 : index
    %307 = vector.load %arg5[%c0_172, %c132, %c0_173] : memref<2x200x256xf32, #tpu.memory_space<vmem>>, vector<1x4x256xf32>
    %308 = vector.shape_cast %307 : vector<1x4x256xf32> to vector<4x256xf32>
    %309 = vector.shape_cast %306 : vector<4x256xf32> to vector<1x4x256xf32>
    tpu.vector_store %arg5[%c0_172, %c132, %c0_173], %309 {strides = array<i32>} : memref<2x200x256xf32, #tpu.memory_space<vmem>>, vector<1x4x256xf32>,
    %310 = vector.extract_strided_slice %305 {offsets = [4, 0], sizes = [4, 256], strides = [1, 1]} : vector<8x256xf32> to vector<4x256xf32>
    %c1_174 = arith.constant 1 : index
    %c132_175 = arith.constant 132 : index
    %c0_176 = arith.constant 0 : index
    %311 = vector.load %arg5[%c1_174, %c132_175, %c0_176] : memref<2x200x256xf32, #tpu.memory_space<vmem>>, vector<1x4x256xf32>
    %312 = vector.shape_cast %311 : vector<1x4x256xf32> to vector<4x256xf32>
    %313 = vector.shape_cast %310 : vector<4x256xf32> to vector<1x4x256xf32>
    tpu.vector_store %arg5[%c1_174, %c132_175, %c0_176], %313 {strides = array<i32>} : memref<2x200x256xf32, #tpu.memory_space<vmem>>, vector<1x4x256xf32>,
    %c186_i32 = arith.constant 186 : i32
    %314 = tpu.dynamic_rotate %0 by %c186_i32 dim 1 : vector<8x256xf32>, i32 -> vector<8x256xf32>
    %315 = vector.extract_strided_slice %314 {offsets = [0, 0], sizes = [4, 256], strides = [1, 1]} : vector<8x256xf32> to vector<4x256xf32>
    %c0_177 = arith.constant 0 : index
    %c136 = arith.constant 136 : index
    %c0_178 = arith.constant 0 : index
    %316 = vector.load %arg5[%c0_177, %c136, %c0_178] : memref<2x200x256xf32, #tpu.memory_space<vmem>>, vector<1x4x256xf32>
    %317 = vector.shape_cast %316 : vector<1x4x256xf32> to vector<4x256xf32>
    %318 = vector.shape_cast %315 : vector<4x256xf32> to vector<1x4x256xf32>
    tpu.vector_store %arg5[%c0_177, %c136, %c0_178], %318 {strides = array<i32>} : memref<2x200x256xf32, #tpu.memory_space<vmem>>, vector<1x4x256xf32>,
    %319 = vector.extract_strided_slice %314 {offsets = [4, 0], sizes = [4, 256], strides = [1, 1]} : vector<8x256xf32> to vector<4x256xf32>
    %c1_179 = arith.constant 1 : index
    %c136_180 = arith.constant 136 : index
    %c0_181 = arith.constant 0 : index
    %320 = vector.load %arg5[%c1_179, %c136_180, %c0_181] : memref<2x200x256xf32, #tpu.memory_space<vmem>>, vector<1x4x256xf32>
    %321 = vector.shape_cast %320 : vector<1x4x256xf32> to vector<4x256xf32>
    %322 = vector.shape_cast %319 : vector<4x256xf32> to vector<1x4x256xf32>
    tpu.vector_store %arg5[%c1_179, %c136_180, %c0_181], %322 {strides = array<i32>} : memref<2x200x256xf32, #tpu.memory_space<vmem>>, vector<1x4x256xf32>,
    %c176_i32 = arith.constant 176 : i32
    %323 = tpu.dynamic_rotate %0 by %c176_i32 dim 1 : vector<8x256xf32>, i32 -> vector<8x256xf32>
    %324 = vector.extract_strided_slice %323 {offsets = [0, 0], sizes = [4, 256], strides = [1, 1]} : vector<8x256xf32> to vector<4x256xf32>
    %c0_182 = arith.constant 0 : index
    %c140 = arith.constant 140 : index
    %c0_183 = arith.constant 0 : index
    %325 = vector.load %arg5[%c0_182, %c140, %c0_183] : memref<2x200x256xf32, #tpu.memory_space<vmem>>, vector<1x4x256xf32>
    %326 = vector.shape_cast %325 : vector<1x4x256xf32> to vector<4x256xf32>
    %327 = vector.shape_cast %324 : vector<4x256xf32> to vector<1x4x256xf32>
    tpu.vector_store %arg5[%c0_182, %c140, %c0_183], %327 {strides = array<i32>} : memref<2x200x256xf32, #tpu.memory_space<vmem>>, vector<1x4x256xf32>,
    %328 = vector.extract_strided_slice %323 {offsets = [4, 0], sizes = [4, 256], strides = [1, 1]} : vector<8x256xf32> to vector<4x256xf32>
    %c1_184 = arith.constant 1 : index
    %c140_185 = arith.constant 140 : index
    %c0_186 = arith.constant 0 : index
    %329 = vector.load %arg5[%c1_184, %c140_185, %c0_186] : memref<2x200x256xf32, #tpu.memory_space<vmem>>, vector<1x4x256xf32>
    %330 = vector.shape_cast %329 : vector<1x4x256xf32> to vector<4x256xf32>
    %331 = vector.shape_cast %328 : vector<4x256xf32> to vector<1x4x256xf32>
    tpu.vector_store %arg5[%c1_184, %c140_185, %c0_186], %331 {strides = array<i32>} : memref<2x200x256xf32, #tpu.memory_space<vmem>>, vector<1x4x256xf32>,
    %c175_i32 = arith.constant 175 : i32
    %332 = tpu.dynamic_rotate %0 by %c175_i32 dim 1 : vector<8x256xf32>, i32 -> vector<8x256xf32>
    %333 = vector.extract_strided_slice %332 {offsets = [0, 0], sizes = [4, 256], strides = [1, 1]} : vector<8x256xf32> to vector<4x256xf32>
    %c0_187 = arith.constant 0 : index
    %c144 = arith.constant 144 : index
    %c0_188 = arith.constant 0 : index
    %334 = vector.load %arg5[%c0_187, %c144, %c0_188] : memref<2x200x256xf32, #tpu.memory_space<vmem>>, vector<1x4x256xf32>
    %335 = vector.shape_cast %334 : vector<1x4x256xf32> to vector<4x256xf32>
    %336 = vector.shape_cast %333 : vector<4x256xf32> to vector<1x4x256xf32>
    tpu.vector_store %arg5[%c0_187, %c144, %c0_188], %336 {strides = array<i32>} : memref<2x200x256xf32, #tpu.memory_space<vmem>>, vector<1x4x256xf32>,
    %337 = vector.extract_strided_slice %332 {offsets = [4, 0], sizes = [4, 256], strides = [1, 1]} : vector<8x256xf32> to vector<4x256xf32>
    %c1_189 = arith.constant 1 : index
    %c144_190 = arith.constant 144 : index
    %c0_191 = arith.constant 0 : index
    %338 = vector.load %arg5[%c1_189, %c144_190, %c0_191] : memref<2x200x256xf32, #tpu.memory_space<vmem>>, vector<1x4x256xf32>
    %339 = vector.shape_cast %338 : vector<1x4x256xf32> to vector<4x256xf32>
    %340 = vector.shape_cast %337 : vector<4x256xf32> to vector<1x4x256xf32>
    tpu.vector_store %arg5[%c1_189, %c144_190, %c0_191], %340 {strides = array<i32>} : memref<2x200x256xf32, #tpu.memory_space<vmem>>, vector<1x4x256xf32>,
    %c174_i32 = arith.constant 174 : i32
    %341 = tpu.dynamic_rotate %0 by %c174_i32 dim 1 : vector<8x256xf32>, i32 -> vector<8x256xf32>
    %342 = vector.extract_strided_slice %341 {offsets = [0, 0], sizes = [4, 256], strides = [1, 1]} : vector<8x256xf32> to vector<4x256xf32>
    %c0_192 = arith.constant 0 : index
    %c148 = arith.constant 148 : index
    %c0_193 = arith.constant 0 : index
    %343 = vector.load %arg5[%c0_192, %c148, %c0_193] : memref<2x200x256xf32, #tpu.memory_space<vmem>>, vector<1x4x256xf32>
    %344 = vector.shape_cast %343 : vector<1x4x256xf32> to vector<4x256xf32>
    %345 = vector.shape_cast %342 : vector<4x256xf32> to vector<1x4x256xf32>
    tpu.vector_store %arg5[%c0_192, %c148, %c0_193], %345 {strides = array<i32>} : memref<2x200x256xf32, #tpu.memory_space<vmem>>, vector<1x4x256xf32>,
    %346 = vector.extract_strided_slice %341 {offsets = [4, 0], sizes = [4, 256], strides = [1, 1]} : vector<8x256xf32> to vector<4x256xf32>
    %c1_194 = arith.constant 1 : index
    %c148_195 = arith.constant 148 : index
    %c0_196 = arith.constant 0 : index
    %347 = vector.load %arg5[%c1_194, %c148_195, %c0_196] : memref<2x200x256xf32, #tpu.memory_space<vmem>>, vector<1x4x256xf32>
    %348 = vector.shape_cast %347 : vector<1x4x256xf32> to vector<4x256xf32>
    %349 = vector.shape_cast %346 : vector<4x256xf32> to vector<1x4x256xf32>
    tpu.vector_store %arg5[%c1_194, %c148_195, %c0_196], %349 {strides = array<i32>} : memref<2x200x256xf32, #tpu.memory_space<vmem>>, vector<1x4x256xf32>,
    %c173_i32 = arith.constant 173 : i32
    %350 = tpu.dynamic_rotate %0 by %c173_i32 dim 1 : vector<8x256xf32>, i32 -> vector<8x256xf32>
    %351 = vector.extract_strided_slice %350 {offsets = [0, 0], sizes = [4, 256], strides = [1, 1]} : vector<8x256xf32> to vector<4x256xf32>
    %c0_197 = arith.constant 0 : index
    %c152 = arith.constant 152 : index
    %c0_198 = arith.constant 0 : index
    %352 = vector.load %arg5[%c0_197, %c152, %c0_198] : memref<2x200x256xf32, #tpu.memory_space<vmem>>, vector<1x4x256xf32>
    %353 = vector.shape_cast %352 : vector<1x4x256xf32> to vector<4x256xf32>
    %354 = vector.shape_cast %351 : vector<4x256xf32> to vector<1x4x256xf32>
    tpu.vector_store %arg5[%c0_197, %c152, %c0_198], %354 {strides = array<i32>} : memref<2x200x256xf32, #tpu.memory_space<vmem>>, vector<1x4x256xf32>,
    %355 = vector.extract_strided_slice %350 {offsets = [4, 0], sizes = [4, 256], strides = [1, 1]} : vector<8x256xf32> to vector<4x256xf32>
    %c1_199 = arith.constant 1 : index
    %c152_200 = arith.constant 152 : index
    %c0_201 = arith.constant 0 : index
    %356 = vector.load %arg5[%c1_199, %c152_200, %c0_201] : memref<2x200x256xf32, #tpu.memory_space<vmem>>, vector<1x4x256xf32>
    %357 = vector.shape_cast %356 : vector<1x4x256xf32> to vector<4x256xf32>
    %358 = vector.shape_cast %355 : vector<4x256xf32> to vector<1x4x256xf32>
    tpu.vector_store %arg5[%c1_199, %c152_200, %c0_201], %358 {strides = array<i32>} : memref<2x200x256xf32, #tpu.memory_space<vmem>>, vector<1x4x256xf32>,
    %c172_i32 = arith.constant 172 : i32
    %359 = tpu.dynamic_rotate %0 by %c172_i32 dim 1 : vector<8x256xf32>, i32 -> vector<8x256xf32>
    %360 = vector.extract_strided_slice %359 {offsets = [0, 0], sizes = [4, 256], strides = [1, 1]} : vector<8x256xf32> to vector<4x256xf32>
    %c0_202 = arith.constant 0 : index
    %c156 = arith.constant 156 : index
    %c0_203 = arith.constant 0 : index
    %361 = vector.load %arg5[%c0_202, %c156, %c0_203] : memref<2x200x256xf32, #tpu.memory_space<vmem>>, vector<1x4x256xf32>
    %362 = vector.shape_cast %361 : vector<1x4x256xf32> to vector<4x256xf32>
    %363 = vector.shape_cast %360 : vector<4x256xf32> to vector<1x4x256xf32>
    tpu.vector_store %arg5[%c0_202, %c156, %c0_203], %363 {strides = array<i32>} : memref<2x200x256xf32, #tpu.memory_space<vmem>>, vector<1x4x256xf32>,
    %364 = vector.extract_strided_slice %359 {offsets = [4, 0], sizes = [4, 256], strides = [1, 1]} : vector<8x256xf32> to vector<4x256xf32>
    %c1_204 = arith.constant 1 : index
    %c156_205 = arith.constant 156 : index
    %c0_206 = arith.constant 0 : index
    %365 = vector.load %arg5[%c1_204, %c156_205, %c0_206] : memref<2x200x256xf32, #tpu.memory_space<vmem>>, vector<1x4x256xf32>
    %366 = vector.shape_cast %365 : vector<1x4x256xf32> to vector<4x256xf32>
    %367 = vector.shape_cast %364 : vector<4x256xf32> to vector<1x4x256xf32>
    tpu.vector_store %arg5[%c1_204, %c156_205, %c0_206], %367 {strides = array<i32>} : memref<2x200x256xf32, #tpu.memory_space<vmem>>, vector<1x4x256xf32>,
    %c171_i32 = arith.constant 171 : i32
    %368 = tpu.dynamic_rotate %0 by %c171_i32 dim 1 : vector<8x256xf32>, i32 -> vector<8x256xf32>
    %369 = vector.extract_strided_slice %368 {offsets = [0, 0], sizes = [4, 256], strides = [1, 1]} : vector<8x256xf32> to vector<4x256xf32>
    %c0_207 = arith.constant 0 : index
    %c160 = arith.constant 160 : index
    %c0_208 = arith.constant 0 : index
    %370 = vector.load %arg5[%c0_207, %c160, %c0_208] : memref<2x200x256xf32, #tpu.memory_space<vmem>>, vector<1x4x256xf32>
    %371 = vector.shape_cast %370 : vector<1x4x256xf32> to vector<4x256xf32>
    %372 = vector.shape_cast %369 : vector<4x256xf32> to vector<1x4x256xf32>
    tpu.vector_store %arg5[%c0_207, %c160, %c0_208], %372 {strides = array<i32>} : memref<2x200x256xf32, #tpu.memory_space<vmem>>, vector<1x4x256xf32>,
    %373 = vector.extract_strided_slice %368 {offsets = [4, 0], sizes = [4, 256], strides = [1, 1]} : vector<8x256xf32> to vector<4x256xf32>
    %c1_209 = arith.constant 1 : index
    %c160_210 = arith.constant 160 : index
    %c0_211 = arith.constant 0 : index
    %374 = vector.load %arg5[%c1_209, %c160_210, %c0_211] : memref<2x200x256xf32, #tpu.memory_space<vmem>>, vector<1x4x256xf32>
    %375 = vector.shape_cast %374 : vector<1x4x256xf32> to vector<4x256xf32>
    %376 = vector.shape_cast %373 : vector<4x256xf32> to vector<1x4x256xf32>
    tpu.vector_store %arg5[%c1_209, %c160_210, %c0_211], %376 {strides = array<i32>} : memref<2x200x256xf32, #tpu.memory_space<vmem>>, vector<1x4x256xf32>,
    %c170_i32 = arith.constant 170 : i32
    %377 = tpu.dynamic_rotate %0 by %c170_i32 dim 1 : vector<8x256xf32>, i32 -> vector<8x256xf32>
    %378 = vector.extract_strided_slice %377 {offsets = [0, 0], sizes = [4, 256], strides = [1, 1]} : vector<8x256xf32> to vector<4x256xf32>
    %c0_212 = arith.constant 0 : index
    %c164 = arith.constant 164 : index
    %c0_213 = arith.constant 0 : index
    %379 = vector.load %arg5[%c0_212, %c164, %c0_213] : memref<2x200x256xf32, #tpu.memory_space<vmem>>, vector<1x4x256xf32>
    %380 = vector.shape_cast %379 : vector<1x4x256xf32> to vector<4x256xf32>
    %381 = vector.shape_cast %378 : vector<4x256xf32> to vector<1x4x256xf32>
    tpu.vector_store %arg5[%c0_212, %c164, %c0_213], %381 {strides = array<i32>} : memref<2x200x256xf32, #tpu.memory_space<vmem>>, vector<1x4x256xf32>,
    %382 = vector.extract_strided_slice %377 {offsets = [4, 0], sizes = [4, 256], strides = [1, 1]} : vector<8x256xf32> to vector<4x256xf32>
    %c1_214 = arith.constant 1 : index
    %c164_215 = arith.constant 164 : index
    %c0_216 = arith.constant 0 : index
    %383 = vector.load %arg5[%c1_214, %c164_215, %c0_216] : memref<2x200x256xf32, #tpu.memory_space<vmem>>, vector<1x4x256xf32>
    %384 = vector.shape_cast %383 : vector<1x4x256xf32> to vector<4x256xf32>
    %385 = vector.shape_cast %382 : vector<4x256xf32> to vector<1x4x256xf32>
    tpu.vector_store %arg5[%c1_214, %c164_215, %c0_216], %385 {strides = array<i32>} : memref<2x200x256xf32, #tpu.memory_space<vmem>>, vector<1x4x256xf32>,
    %c160_i32 = arith.constant 160 : i32
    %386 = tpu.dynamic_rotate %0 by %c160_i32 dim 1 : vector<8x256xf32>, i32 -> vector<8x256xf32>
    %387 = vector.extract_strided_slice %386 {offsets = [0, 0], sizes = [4, 256], strides = [1, 1]} : vector<8x256xf32> to vector<4x256xf32>
    %c0_217 = arith.constant 0 : index
    %c168 = arith.constant 168 : index
    %c0_218 = arith.constant 0 : index
    %388 = vector.load %arg5[%c0_217, %c168, %c0_218] : memref<2x200x256xf32, #tpu.memory_space<vmem>>, vector<1x4x256xf32>
    %389 = vector.shape_cast %388 : vector<1x4x256xf32> to vector<4x256xf32>
    %390 = vector.shape_cast %387 : vector<4x256xf32> to vector<1x4x256xf32>
    tpu.vector_store %arg5[%c0_217, %c168, %c0_218], %390 {strides = array<i32>} : memref<2x200x256xf32, #tpu.memory_space<vmem>>, vector<1x4x256xf32>,
    %391 = vector.extract_strided_slice %386 {offsets = [4, 0], sizes = [4, 256], strides = [1, 1]} : vector<8x256xf32> to vector<4x256xf32>
    %c1_219 = arith.constant 1 : index
    %c168_220 = arith.constant 168 : index
    %c0_221 = arith.constant 0 : index
    %392 = vector.load %arg5[%c1_219, %c168_220, %c0_221] : memref<2x200x256xf32, #tpu.memory_space<vmem>>, vector<1x4x256xf32>
    %393 = vector.shape_cast %392 : vector<1x4x256xf32> to vector<4x256xf32>
    %394 = vector.shape_cast %391 : vector<4x256xf32> to vector<1x4x256xf32>
    tpu.vector_store %arg5[%c1_219, %c168_220, %c0_221], %394 {strides = array<i32>} : memref<2x200x256xf32, #tpu.memory_space<vmem>>, vector<1x4x256xf32>,
    %c159_i32 = arith.constant 159 : i32
    %395 = tpu.dynamic_rotate %0 by %c159_i32 dim 1 : vector<8x256xf32>, i32 -> vector<8x256xf32>
    %396 = vector.extract_strided_slice %395 {offsets = [0, 0], sizes = [4, 256], strides = [1, 1]} : vector<8x256xf32> to vector<4x256xf32>
    %c0_222 = arith.constant 0 : index
    %c172 = arith.constant 172 : index
    %c0_223 = arith.constant 0 : index
    %397 = vector.load %arg5[%c0_222, %c172, %c0_223] : memref<2x200x256xf32, #tpu.memory_space<vmem>>, vector<1x4x256xf32>
    %398 = vector.shape_cast %397 : vector<1x4x256xf32> to vector<4x256xf32>
    %399 = vector.shape_cast %396 : vector<4x256xf32> to vector<1x4x256xf32>
    tpu.vector_store %arg5[%c0_222, %c172, %c0_223], %399 {strides = array<i32>} : memref<2x200x256xf32, #tpu.memory_space<vmem>>, vector<1x4x256xf32>,
    %400 = vector.extract_strided_slice %395 {offsets = [4, 0], sizes = [4, 256], strides = [1, 1]} : vector<8x256xf32> to vector<4x256xf32>
    %c1_224 = arith.constant 1 : index
    %c172_225 = arith.constant 172 : index
    %c0_226 = arith.constant 0 : index
    %401 = vector.load %arg5[%c1_224, %c172_225, %c0_226] : memref<2x200x256xf32, #tpu.memory_space<vmem>>, vector<1x4x256xf32>
    %402 = vector.shape_cast %401 : vector<1x4x256xf32> to vector<4x256xf32>
    %403 = vector.shape_cast %400 : vector<4x256xf32> to vector<1x4x256xf32>
    tpu.vector_store %arg5[%c1_224, %c172_225, %c0_226], %403 {strides = array<i32>} : memref<2x200x256xf32, #tpu.memory_space<vmem>>, vector<1x4x256xf32>,
    %c158_i32 = arith.constant 158 : i32
    %404 = tpu.dynamic_rotate %0 by %c158_i32 dim 1 : vector<8x256xf32>, i32 -> vector<8x256xf32>
    %405 = vector.extract_strided_slice %404 {offsets = [0, 0], sizes = [4, 256], strides = [1, 1]} : vector<8x256xf32> to vector<4x256xf32>
    %c0_227 = arith.constant 0 : index
    %c176 = arith.constant 176 : index
    %c0_228 = arith.constant 0 : index
    %406 = vector.load %arg5[%c0_227, %c176, %c0_228] : memref<2x200x256xf32, #tpu.memory_space<vmem>>, vector<1x4x256xf32>
    %407 = vector.shape_cast %406 : vector<1x4x256xf32> to vector<4x256xf32>
    %408 = vector.shape_cast %405 : vector<4x256xf32> to vector<1x4x256xf32>
    tpu.vector_store %arg5[%c0_227, %c176, %c0_228], %408 {strides = array<i32>} : memref<2x200x256xf32, #tpu.memory_space<vmem>>, vector<1x4x256xf32>,
    %409 = vector.extract_strided_slice %404 {offsets = [4, 0], sizes = [4, 256], strides = [1, 1]} : vector<8x256xf32> to vector<4x256xf32>
    %c1_229 = arith.constant 1 : index
    %c176_230 = arith.constant 176 : index
    %c0_231 = arith.constant 0 : index
    %410 = vector.load %arg5[%c1_229, %c176_230, %c0_231] : memref<2x200x256xf32, #tpu.memory_space<vmem>>, vector<1x4x256xf32>
    %411 = vector.shape_cast %410 : vector<1x4x256xf32> to vector<4x256xf32>
    %412 = vector.shape_cast %409 : vector<4x256xf32> to vector<1x4x256xf32>
    tpu.vector_store %arg5[%c1_229, %c176_230, %c0_231], %412 {strides = array<i32>} : memref<2x200x256xf32, #tpu.memory_space<vmem>>, vector<1x4x256xf32>,
    %c157_i32 = arith.constant 157 : i32
    %413 = tpu.dynamic_rotate %0 by %c157_i32 dim 1 : vector<8x256xf32>, i32 -> vector<8x256xf32>
    %414 = vector.extract_strided_slice %413 {offsets = [0, 0], sizes = [4, 256], strides = [1, 1]} : vector<8x256xf32> to vector<4x256xf32>
    %c0_232 = arith.constant 0 : index
    %c180 = arith.constant 180 : index
    %c0_233 = arith.constant 0 : index
    %415 = vector.load %arg5[%c0_232, %c180, %c0_233] : memref<2x200x256xf32, #tpu.memory_space<vmem>>, vector<1x4x256xf32>
    %416 = vector.shape_cast %415 : vector<1x4x256xf32> to vector<4x256xf32>
    %417 = vector.shape_cast %414 : vector<4x256xf32> to vector<1x4x256xf32>
    tpu.vector_store %arg5[%c0_232, %c180, %c0_233], %417 {strides = array<i32>} : memref<2x200x256xf32, #tpu.memory_space<vmem>>, vector<1x4x256xf32>,
    %418 = vector.extract_strided_slice %413 {offsets = [4, 0], sizes = [4, 256], strides = [1, 1]} : vector<8x256xf32> to vector<4x256xf32>
    %c1_234 = arith.constant 1 : index
    %c180_235 = arith.constant 180 : index
    %c0_236 = arith.constant 0 : index
    %419 = vector.load %arg5[%c1_234, %c180_235, %c0_236] : memref<2x200x256xf32, #tpu.memory_space<vmem>>, vector<1x4x256xf32>
    %420 = vector.shape_cast %419 : vector<1x4x256xf32> to vector<4x256xf32>
    %421 = vector.shape_cast %418 : vector<4x256xf32> to vector<1x4x256xf32>
    tpu.vector_store %arg5[%c1_234, %c180_235, %c0_236], %421 {strides = array<i32>} : memref<2x200x256xf32, #tpu.memory_space<vmem>>, vector<1x4x256xf32>,
    %c156_i32 = arith.constant 156 : i32
    %422 = tpu.dynamic_rotate %0 by %c156_i32 dim 1 : vector<8x256xf32>, i32 -> vector<8x256xf32>
    %423 = vector.extract_strided_slice %422 {offsets = [0, 0], sizes = [4, 256], strides = [1, 1]} : vector<8x256xf32> to vector<4x256xf32>
    %c0_237 = arith.constant 0 : index
    %c184 = arith.constant 184 : index
    %c0_238 = arith.constant 0 : index
    %424 = vector.load %arg5[%c0_237, %c184, %c0_238] : memref<2x200x256xf32, #tpu.memory_space<vmem>>, vector<1x4x256xf32>
    %425 = vector.shape_cast %424 : vector<1x4x256xf32> to vector<4x256xf32>
    %426 = vector.shape_cast %423 : vector<4x256xf32> to vector<1x4x256xf32>
    tpu.vector_store %arg5[%c0_237, %c184, %c0_238], %426 {strides = array<i32>} : memref<2x200x256xf32, #tpu.memory_space<vmem>>, vector<1x4x256xf32>,
    %427 = vector.extract_strided_slice %422 {offsets = [4, 0], sizes = [4, 256], strides = [1, 1]} : vector<8x256xf32> to vector<4x256xf32>
    %c1_239 = arith.constant 1 : index
    %c184_240 = arith.constant 184 : index
    %c0_241 = arith.constant 0 : index
    %428 = vector.load %arg5[%c1_239, %c184_240, %c0_241] : memref<2x200x256xf32, #tpu.memory_space<vmem>>, vector<1x4x256xf32>
    %429 = vector.shape_cast %428 : vector<1x4x256xf32> to vector<4x256xf32>
    %430 = vector.shape_cast %427 : vector<4x256xf32> to vector<1x4x256xf32>
    tpu.vector_store %arg5[%c1_239, %c184_240, %c0_241], %430 {strides = array<i32>} : memref<2x200x256xf32, #tpu.memory_space<vmem>>, vector<1x4x256xf32>,
    %c155_i32 = arith.constant 155 : i32
    %431 = tpu.dynamic_rotate %0 by %c155_i32 dim 1 : vector<8x256xf32>, i32 -> vector<8x256xf32>
    %432 = vector.extract_strided_slice %431 {offsets = [0, 0], sizes = [4, 256], strides = [1, 1]} : vector<8x256xf32> to vector<4x256xf32>
    %c0_242 = arith.constant 0 : index
    %c188 = arith.constant 188 : index
    %c0_243 = arith.constant 0 : index
    %433 = vector.load %arg5[%c0_242, %c188, %c0_243] : memref<2x200x256xf32, #tpu.memory_space<vmem>>, vector<1x4x256xf32>
    %434 = vector.shape_cast %433 : vector<1x4x256xf32> to vector<4x256xf32>
    %435 = vector.shape_cast %432 : vector<4x256xf32> to vector<1x4x256xf32>
    tpu.vector_store %arg5[%c0_242, %c188, %c0_243], %435 {strides = array<i32>} : memref<2x200x256xf32, #tpu.memory_space<vmem>>, vector<1x4x256xf32>,
    %436 = vector.extract_strided_slice %431 {offsets = [4, 0], sizes = [4, 256], strides = [1, 1]} : vector<8x256xf32> to vector<4x256xf32>
    %c1_244 = arith.constant 1 : index
    %c188_245 = arith.constant 188 : index
    %c0_246 = arith.constant 0 : index
    %437 = vector.load %arg5[%c1_244, %c188_245, %c0_246] : memref<2x200x256xf32, #tpu.memory_space<vmem>>, vector<1x4x256xf32>
    %438 = vector.shape_cast %437 : vector<1x4x256xf32> to vector<4x256xf32>
    %439 = vector.shape_cast %436 : vector<4x256xf32> to vector<1x4x256xf32>
    tpu.vector_store %arg5[%c1_244, %c188_245, %c0_246], %439 {strides = array<i32>} : memref<2x200x256xf32, #tpu.memory_space<vmem>>, vector<1x4x256xf32>,
    %c154_i32 = arith.constant 154 : i32
    %440 = tpu.dynamic_rotate %0 by %c154_i32 dim 1 : vector<8x256xf32>, i32 -> vector<8x256xf32>
    %441 = vector.extract_strided_slice %440 {offsets = [0, 0], sizes = [4, 256], strides = [1, 1]} : vector<8x256xf32> to vector<4x256xf32>
    %c0_247 = arith.constant 0 : index
    %c192 = arith.constant 192 : index
    %c0_248 = arith.constant 0 : index
    %442 = vector.load %arg5[%c0_247, %c192, %c0_248] : memref<2x200x256xf32, #tpu.memory_space<vmem>>, vector<1x4x256xf32>
    %443 = vector.shape_cast %442 : vector<1x4x256xf32> to vector<4x256xf32>
    %444 = vector.shape_cast %441 : vector<4x256xf32> to vector<1x4x256xf32>
    tpu.vector_store %arg5[%c0_247, %c192, %c0_248], %444 {strides = array<i32>} : memref<2x200x256xf32, #tpu.memory_space<vmem>>, vector<1x4x256xf32>,
    %445 = vector.extract_strided_slice %440 {offsets = [4, 0], sizes = [4, 256], strides = [1, 1]} : vector<8x256xf32> to vector<4x256xf32>
    %c1_249 = arith.constant 1 : index
    %c192_250 = arith.constant 192 : index
    %c0_251 = arith.constant 0 : index
    %446 = vector.load %arg5[%c1_249, %c192_250, %c0_251] : memref<2x200x256xf32, #tpu.memory_space<vmem>>, vector<1x4x256xf32>
    %447 = vector.shape_cast %446 : vector<1x4x256xf32> to vector<4x256xf32>
    %448 = vector.shape_cast %445 : vector<4x256xf32> to vector<1x4x256xf32>
    tpu.vector_store %arg5[%c1_249, %c192_250, %c0_251], %448 {strides = array<i32>} : memref<2x200x256xf32, #tpu.memory_space<vmem>>, vector<1x4x256xf32>,
    %c0_252 = arith.constant 0 : index
    %c0_253 = arith.constant 0 : index
    %449 = vector.load %arg2[%c0_252, %c0_253] : memref<8x200xf32, #tpu.memory_space<vmem>>, vector<8x200xf32>
    %c0_254 = arith.constant 0 : index
    %c0_255 = arith.constant 0 : index
    %450 = vector.load %arg3[%c0_254, %c0_255] : memref<8x1xf32, #tpu.memory_space<vmem>>, vector<8x1xf32>
    %c0_256 = arith.constant 0 : index
    %c0_257 = arith.constant 0 : index
    %c0_258 = arith.constant 0 : index
    %451 = vector.load %arg5[%c0_256, %c0_257, %c0_258] : memref<2x200x256xf32, #tpu.memory_space<vmem>>, vector<1x200x256xf32>
    %452 = vector.shape_cast %451 : vector<1x200x256xf32> to vector<200x256xf32>
    %cst_259 = arith.constant dense<0.000000e+00> : vector<8x256xf32>
    %453 = tpu.matmul %449, %452, %cst_259 {dimension_numbers = #tpu.dot_dimension_numbers<[1], [0], [0], [1], [0, 0, 1, 1], [], []>} : vector<8x200xf32>, vector<200x256xf32>, vector<8x256xf32> -> vector<8x256xf32>
    %454 = vector.broadcast %450 : vector<8x1xf32> to vector<8x256xf32>
    %455 = arith.addf %453, %454 : vector<8x256xf32>
    %cst_260 = arith.constant 0.000000e+00 : f32
    %456 = vector.broadcast %cst_260 : f32 to vector<8x256xf32>
    %457 = arith.cmpf oge, %455, %456 : vector<8x256xf32>
    %cst_261 = arith.constant 0.000000e+00 : f32
    %458 = vector.broadcast %cst_261 : f32 to vector<8x256xf32>
    %459 = arith.mulf %458, %455 : vector<8x256xf32>
    %460 = arith.select %457, %455, %459 : vector<8x256xi1>, vector<8x256xf32>
    %c0_262 = arith.constant 0 : index
    %c0_263 = arith.constant 0 : index
    %c0_264 = arith.constant 0 : index
    %461 = vector.load %arg4[%c0_262, %c0_263, %c0_264] : memref<2x8x256xf32, #tpu.memory_space<vmem>>, vector<1x8x256xf32>
    %462 = vector.shape_cast %461 : vector<1x8x256xf32> to vector<8x256xf32>
    %463 = vector.shape_cast %460 : vector<8x256xf32> to vector<1x8x256xf32>
    tpu.vector_store %arg4[%c0_262, %c0_263, %c0_264], %463 {strides = array<i32>} : memref<2x8x256xf32, #tpu.memory_space<vmem>>, vector<1x8x256xf32>,
    %c1_265 = arith.constant 1 : index
    %c0_266 = arith.constant 0 : index
    %c0_267 = arith.constant 0 : index
    %464 = vector.load %arg5[%c1_265, %c0_266, %c0_267] : memref<2x200x256xf32, #tpu.memory_space<vmem>>, vector<1x200x256xf32>
    %465 = vector.shape_cast %464 : vector<1x200x256xf32> to vector<200x256xf32>
    %cst_268 = arith.constant dense<0.000000e+00> : vector<8x256xf32>
    %466 = tpu.matmul %449, %465, %cst_268 {dimension_numbers = #tpu.dot_dimension_numbers<[1], [0], [0], [1], [0, 0, 1, 1], [], []>} : vector<8x200xf32>, vector<200x256xf32>, vector<8x256xf32> -> vector<8x256xf32>
    %467 = vector.broadcast %450 : vector<8x1xf32> to vector<8x256xf32>
    %468 = arith.addf %466, %467 : vector<8x256xf32>
    %cst_269 = arith.constant 0.000000e+00 : f32
    %469 = vector.broadcast %cst_269 : f32 to vector<8x256xf32>
    %470 = arith.cmpf oge, %468, %469 : vector<8x256xf32>
    %cst_270 = arith.constant 0.000000e+00 : f32
    %471 = vector.broadcast %cst_270 : f32 to vector<8x256xf32>
    %472 = arith.mulf %471, %468 : vector<8x256xf32>
    %473 = arith.select %470, %468, %472 : vector<8x256xi1>, vector<8x256xf32>
    %c1_271 = arith.constant 1 : index
    %c0_272 = arith.constant 0 : index
    %c0_273 = arith.constant 0 : index
    %474 = vector.load %arg4[%c1_271, %c0_272, %c0_273] : memref<2x8x256xf32, #tpu.memory_space<vmem>>, vector<1x8x256xf32>
    %475 = vector.shape_cast %474 : vector<1x8x256xf32> to vector<8x256xf32>
    %476 = vector.shape_cast %473 : vector<8x256xf32> to vector<1x8x256xf32>
    tpu.vector_store %arg4[%c1_271, %c0_272, %c0_273], %476 {strides = array<i32>} : memref<2x8x256xf32, #tpu.memory_space<vmem>>, vector<1x8x256xf32>,
    return
  }
  func.func @transform_0(%arg0: i32) -> (i32, i32) {
    %c0_i32 = arith.constant 0 : i32
    %c0_i32_0 = arith.constant 0 : i32
    %c0_i32_1 = arith.constant 0 : i32
    return %c0_i32, %c0_i32_0 : i32, i32
  }
  func.func @transform_1(%arg0: i32) -> (i32, i32) {
    %c0_i32 = arith.constant 0 : i32
    %c0_i32_0 = arith.constant 0 : i32
    %c0_i32_1 = arith.constant 0 : i32
    return %c0_i32, %c0_i32_0 : i32, i32
  }
  func.func @transform_2(%arg0: i32) -> (i32, i32) {
    %c0_i32 = arith.constant 0 : i32
    %c0_i32_0 = arith.constant 0 : i32
    %c0_i32_1 = arith.constant 0 : i32
    return %c0_i32, %c0_i32_0 : i32, i32
  }
  func.func @transform_3(%arg0: i32) -> (i32, i32, i32) {
    %c0_i32 = arith.constant 0 : i32
    %c0_i32_0 = arith.constant 0 : i32
    %c0_i32_1 = arith.constant 0 : i32
    %c0_i32_2 = arith.constant 0 : i32
    return %c0_i32, %c0_i32_0, %c0_i32_1 : i32, i32, i32
  }
}

</mosaic_0001>

<bundles_post_ra>
// kernel: tpu_custom_call.1
= control target key start
LH: loop header
LB: loop body
LE: loop exit
PB: predicated region body
PF: predicated region fallthrough
CT: control target
= control target key end

     0   :  { %8 = vsyncpa [#allocation4], 0  ;;  %s1662_s0 = inlined_call_operand.hbm [shape: f32[8,256], index: 0, kind: input, shape index: {}]   ;;  %s1663_s1 = inlined_call_operand.hbm [shape: f32[8,200], index: 1, kind: input, shape index: {}]   ;;  %s1664_s2 = inlined_call_operand.vmem [shape: f32[8,1], index: 2, kind: input, shape index: {}]   ;;  %s1665_s3 = inlined_call_operand.hbm [shape: f32[2,8,256], index: 3, kind: output, shape index: {}]  }
   0x1   :  { %9 = vsyncpa [#allocation7], 0 }
   0x2   :  { %10 = vsyncpa [#allocation5], 0  ;;  %s16_s14 = sshll.u32 %s1662_s0, 4  ;;  %s1325_s15 = smov [#allocation3]   ;;  %s17_s14 = int_to_ptr.hbm [resolvable:$true] %s16_s14 }
   0x3   :  { %s18_s16 = sshll.u32 %s1325_s15, 4  ;;  %s27_s19 = sshll.u32 %s1663_s1, 4  ;;  %s19_s16 = int_to_ptr.vmem [resolvable:$true] %s18_s16  ;;  %s28_s19 = int_to_ptr.hbm [resolvable:$true] %s27_s19 }
   0x4   :  { %21 = dma.hbm_to_vmem [thread:$0]  %s17_s14, 256, %s19_s16, [#allocation4]  }
   0x5   :  { %s1326_s20 = smov [#allocation6]  }
   0x6   :  { %s29_s21 = sshll.u32 %s1326_s20, 4  ;;  %s30_s21 = int_to_ptr.vmem [resolvable:$true] %s29_s21 }
   0x7   :  { %32 = dma.hbm_to_vmem [thread:$0]  %s28_s19, 256, %s30_s21, [#allocation7]  }
   0x8   :  { %1319 = dma.done.wait [#allocation4], 256  }
   0x9   :  { %1320 = vsyncadd [#allocation4], 4294967040 }
   0xa   :  { %1321 = dma.done.wait [#allocation7], 256  }
   0xb   :  { %1322 = vsyncadd [#allocation7], 4294967040  ;;  %v1406_v0 = vld [vmem:[#allocation3] sm:$0xff]  ;;  %s1327_s0 = smov 126   ;;  %s1328_s22 = smov 127   ;;  %v1411_v1 = vld [vmem:[#allocation3 + $0x8] sm:$0xff]  ;;  %v64_v2 = vlaneseq }
   0xc   :  { %79 = vrot.lane.b32.xlu1 %v1406_v0, %s1327_s0  ;;  %50 = vst [vmem:[#allocation2 + $0x190] sm:$0xf] %v1406_v0  ;;  %60 = vrot.lane.b32.xlu0 %v1406_v0, %s1328_s22  ;;  %s1329_s1 = smov 125   ;;  %s1330_s23 = smov 124   ;;  %v55_v5 = vrot.slane %v1411_v1, 4  ;;  %v54_v6 = vrot.slane %v1406_v0, 4 }
   0xd   :  { %51 = vst [vmem:[#allocation2 + $0x1f0] sm:$0xf] %v1411_v1  ;;  %96 = vrot.lane.b32.xlu2 %v1406_v0, %s1329_s1  ;;  %s1331_s24 = smov 123   ;;  %s1332_s25 = smov 122   ;;  %v1449_v4 = vand.u32 127, %v64_v2 }
   0xe   :  { %s1333_s26 = smov 112   ;;  %s1334_s27 = smov 111   ;;  %59 = vst [vmem:[#allocation2 + $0x1b8] sm:$0xf] %v55_v5 }
   0xf   :  { %s1335_s28 = smov 110   ;;  %s1336_s29 = smov 109   ;;  %vm100_vm0 = vcmp.lt.s32.totalorder %v1449_v4, 125  ;;  %58 = vst [vmem:[#allocation2 + $0x1f8] sm:$0xf] %v54_v6  ;;  %vm83_vm1 = vcmp.lt.s32.totalorder %v1449_v4, 126 }
  0x10   :  { %s1337_s30 = smov 108   ;;  %s1338_s4 = smov 107   ;;  %vm66_vm2 = vcmp.lt.s32.totalorder %v1449_v4, 127  ;;  %vm117_vm3 = vcmp.lt.s32.totalorder %v1449_v4, 124  ;;  %vm151_vm4 = vcmp.lt.s32.totalorder %v1449_v4, 122  ;;  %vm134_vm5 = vcmp.lt.s32.totalorder %v1449_v4, 123 }
  0x11   :  { %s1339_s5 = smov 61   ;;  %s1340_s6 = smov 63   ;;  %vm168_vm6 = vcmp.lt.s32.totalorder %v1449_v4, 112  ;;  %vm202_vm7 = vcmp.lt.s32.totalorder %v1449_v4, 110  ;;  %vm185_vm8 = vcmp.lt.s32.totalorder %v1449_v4, 111  ;;  %vm219_vm9 = vcmp.lt.s32.totalorder %v1449_v4, 109 }
  0x12   :  { %s1341_s7 = smov 62   ;;  %s1342_s8 = smov 74   ;;  %vm236_vm10 = vcmp.lt.s32.totalorder %v1449_v4, 108  ;;  %vm542_vm11 = vcmp.lt.s32.totalorder %v1449_v4, 63  ;;  %vm576_vm12 = vcmp.lt.s32.totalorder %v1449_v4, 61  ;;  %vm559_vm13 = vcmp.lt.s32.totalorder %v1449_v4, 62 }
  0x13   :  { %s1343_s9 = smov 64   ;;  %s1344_s10 = smov 76   ;;  %vm525_vm14 = vcmp.lt.s32.totalorder %v1449_v4, 64  ;;  %vm508_vm15 = vcmp.lt.s32.totalorder %v1449_v4, 74 }
  0x14   :  { %81 = vrot.lane.b32.xlu1 %v1411_v1, %s1327_s0  ;;  %62 = vrot.lane.b32.xlu0 %v1411_v1, %s1328_s22  ;;  %s1345_s11 = smov 75   ;;  %s1346_s12 = smov 78  }
  0x15   :  { %98 = vrot.lane.b32.xlu2 %v1411_v1, %s1329_s1  ;;  %s1347_s13 = smov 77   ;;  %s1348_s14 = smov 80  }
  0x16   :  { %s1349_s15 = smov 79   ;;  %s1350_s16 = smov 91  }
  0x17   :  { %s1351_s17 = smov 90   ;;  %s1352_s18 = smov 93  }
  0x18   :  { %s1353_s19 = smov 92   ;;  %s1354_s20 = smov 95  }
  0x19   :  { %s1355_s21 = smov 94   ;;  %s1356_s0 = smov 27  }
  0x1a   :  { %s1357_s22 = smov 26   ;;  %s1358_s1 = smov 106  }
  0x1c   :  { %115 = vrot.lane.b32.xlu1 %v1411_v1, %s1330_s23  ;;  %113 = vrot.lane.b32.xlu0 %v1406_v0, %s1330_s23  ;;  %s1359_s23 = smov 96  }
  0x1d   :  { %130 = vrot.lane.b32.xlu2 %v1406_v0, %s1331_s24 }
  0x24   :  { %147 = vrot.lane.b32.xlu1 %v1406_v0, %s1332_s25  ;;  %132 = vrot.lane.b32.xlu0 %v1411_v1, %s1331_s24  ;;  %s1360_s24 = smov 29  }
  0x25   :  { %149 = vrot.lane.b32.xlu2 %v1411_v1, %s1332_s25  ;;  %s1361_s25 = smov 28  }
  0x2c   :  { %166 = vrot.lane.b32.xlu1 %v1411_v1, %s1333_s26  ;;  %164 = vrot.lane.b32.xlu0 %v1406_v0, %s1333_s26  ;;  %s1362_s26 = smov 31  }
  0x2d   :  { %181 = vrot.lane.b32.xlu2 %v1406_v0, %s1334_s27 }
  0x34   :  { %198 = vrot.lane.b32.xlu1 %v1406_v0, %s1335_s28  ;;  %183 = vrot.lane.b32.xlu0 %v1411_v1, %s1334_s27  ;;  %s1363_s27 = smov 30  }
  0x35   :  { %200 = vrot.lane.b32.xlu2 %v1411_v1, %s1335_s28  ;;  %s1364_s28 = smov 42  }
  0x3c   :  { %217 = vrot.lane.b32.xlu1 %v1411_v1, %s1336_s29  ;;  %215 = vrot.lane.b32.xlu0 %v1406_v0, %s1336_s29  ;;  %s1365_s29 = smov 32  }
  0x3d   :  { %232 = vrot.lane.b32.xlu2 %v1406_v0, %s1337_s30 }
  0x44   :  { %249 = vrot.lane.b32.xlu1 %v1406_v0, %s1338_s4  ;;  %234 = vrot.lane.b32.xlu0 %v1411_v1, %s1337_s30  ;;  %s1366_s30 = smov 44  }
  0x45   :  { %572 = vrot.lane.b32.xlu2 %v1406_v0, %s1339_s5 }
  0x4c   :  { %538 = vrot.lane.b32.xlu1 %v1406_v0, %s1340_s6  ;;  %574 = vrot.lane.b32.xlu0 %v1411_v1, %s1339_s5  ;;  %s1368_s5 = smov 46  }
  0x4d   :  { %540 = vrot.lane.b32.xlu2 %v1411_v1, %s1340_s6  ;;  %s1369_s6 = smov 45  }
  0x54   :  { %557 = vrot.lane.b32.xlu1 %v1411_v1, %s1341_s7  ;;  %555 = vrot.lane.b32.xlu0 %v1406_v0, %s1341_s7  ;;  %s1370_s7 = smov 48  }
  0x55   :  { %504 = vrot.lane.b32.xlu2 %v1406_v0, %s1342_s8 }
  0x5c   :  { %521 = vrot.lane.b32.xlu1 %v1406_v0, %s1343_s9  ;;  %506 = vrot.lane.b32.xlu0 %v1411_v1, %s1342_s8  ;;  %s1371_s8 = smov 47  }
  0x5d   :  { %523 = vrot.lane.b32.xlu2 %v1411_v1, %s1343_s9  ;;  %s1372_s9 = smov 59  }
  0x64   :  { %472 = vrot.lane.b32.xlu1 %v1411_v1, %s1344_s10  ;;  %470 = vrot.lane.b32.xlu0 %v1406_v0, %s1344_s10  ;;  %s1373_s10 = smov 58  }
  0x65   :  { %487 = vrot.lane.b32.xlu2 %v1406_v0, %s1345_s11 }
  0x67   :  { %v97_v3 = vpop.permute.xlu2 %96 }
  0x6c   :  { %436 = vrot.lane.b32.xlu1 %v1406_v0, %s1346_s12  ;;  %489 = vrot.lane.b32.xlu0 %v1411_v1, %s1345_s11  ;;  %s1374_s11 = smov 60  }
  0x6d   :  { %438 = vrot.lane.b32.xlu2 %v1411_v1, %s1346_s12 }
  0x6f   :  { %v99_v7 = vpop.permute.xlu2 %98 }
  0x70   :  { %v101_v8 = vsel %vm100_vm0, %v97_v3, %v99_v7  ;;  %v102_v9 = vsel %vm100_vm0, %v99_v7, %v97_v3  ;;  %vm474_vm0 = vcmp.lt.s32.totalorder %v1449_v4, 76 }
  0x71   :  { %v105_v10 = vrot.slane %v101_v8, 4  ;;  %v106_v11 = vrot.slane %v102_v9, 4  ;;  %111 = vst [vmem:[#allocation2 + $0x68] sm:$0xf0] %v101_v8 }
  0x72   :  { %112 = vst [vmem:[#allocation2 + $0x10] sm:$0xf0] %v102_v9 }
  0x73   :  { %109 = vst [vmem:[#allocation2 + $0x170] sm:$0xf0] %v105_v10 }
  0x74   :  { %455 = vrot.lane.b32.xlu1 %v1411_v1, %s1347_s13  ;;  %453 = vrot.lane.b32.xlu0 %v1406_v0, %s1347_s13  ;;  %110 = vst [vmem:[#allocation2 + $0x210] sm:$0xf0] %v106_v11 }
  0x75   :  { %402 = vrot.lane.b32.xlu2 %v1406_v0, %s1348_s14 }
  0x77   :  { %v1460_v12 = vpop.permute.xlu2 %130 }
  0x7c   :  { %419 = vrot.lane.b32.xlu1 %v1406_v0, %s1349_s15  ;;  %404 = vrot.lane.b32.xlu0 %v1411_v1, %s1348_s14 }
  0x7d   :  { %421 = vrot.lane.b32.xlu2 %v1411_v1, %s1349_s15 }
  0x7e   :  { %v80_v13 = vpop.permute.xlu1 %79  ;;  %v61_v14 = vpop.permute.xlu0 %60 }
  0x7f   :  { %v150_v15 = vpop.permute.xlu2 %149 }
  0x84   :  { %370 = vrot.lane.b32.xlu1 %v1411_v1, %s1350_s16  ;;  %368 = vrot.lane.b32.xlu0 %v1406_v0, %s1350_s16 }
  0x85   :  { %385 = vrot.lane.b32.xlu2 %v1406_v0, %s1351_s17 }
  0x86   :  { %v82_v16 = vpop.permute.xlu1 %81  ;;  %v63_v17 = vpop.permute.xlu0 %62 }
  0x87   :  { %v84_v18 = vsel %vm83_vm1, %v80_v13, %v82_v16  ;;  %v85_v19 = vsel %vm83_vm1, %v82_v16, %v80_v13  ;;  %v67_v20 = vsel %vm66_vm2, %v61_v14, %v63_v17  ;;  %v68_v21 = vsel %vm66_vm2, %v63_v17, %v61_v14  ;;  %v1470_v22 = vpop.permute.xlu2 %181 }
  0x88   :  { %86 = vst [vmem:[#allocation2 + $0x170] sm:$0xf] %v84_v18  ;;  %v90_v23 = vrot.slane %v84_v18, 4  ;;  %v91_v24 = vrot.slane %v85_v19, 4  ;;  %v71_v25 = vrot.slane %v67_v20, 4  ;;  %v72_v26 = vrot.slane %v68_v21, 4 }
  0x89   :  { %87 = vst [vmem:[#allocation2 + $0x210] sm:$0xf] %v85_v19  ;;  %vm440_vm1 = vcmp.lt.s32.totalorder %v1449_v4, 78  ;;  %vm491_vm2 = vcmp.lt.s32.totalorder %v1449_v4, 75 }
  0x8a   :  { %94 = vst [vmem:[#allocation2 + $0x68] sm:$0xf] %v90_v23 }
  0x8b   :  { %95 = vst [vmem:[#allocation2 + $0x10] sm:$0xf] %v91_v24 }
  0x8c   :  { %75 = vst [vmem:[#allocation2 + $0x190] sm:$0xf0] %v71_v25  ;;  %334 = vrot.lane.b32.xlu1 %v1406_v0, %s1352_s18  ;;  %387 = vrot.lane.b32.xlu0 %v1411_v1, %s1351_s17  ;;  %s1173_s17 = sshll.u32 %s1665_s3, 4  ;;  %s1174_s17 = int_to_ptr.hbm [resolvable:$true] %s1173_s17 }
  0x8d   :  { %76 = vst [vmem:[#allocation2 + $0x1f0] sm:$0xf0] %v72_v26  ;;  %336 = vrot.lane.b32.xlu2 %v1411_v1, %s1352_s18  ;;  %s1378_s18 = smov 256  }
  0x8e   :  { %77 = vst [vmem:[#allocation2 + $0x1f8] sm:$0xf0] %v67_v20  ;;  %v116_v27 = vpop.permute.xlu1 %115  ;;  %v114_v28 = vpop.permute.xlu0 %113 }
  0x8f   :  { %78 = vst [vmem:[#allocation2 + $0x1b8] sm:$0xf0] %v68_v21  ;;  %v118_v29 = vsel %vm117_vm3, %v114_v28, %v116_v27  ;;  %v119_v30 = vsel %vm117_vm3, %v116_v27, %v114_v28  ;;  %v201_v31 = vpop.permute.xlu2 %200  ;;  %vm457_vm3 = vcmp.lt.s32.totalorder %v1449_v4, 77 }
  0x90   :  { %120 = vst [vmem:[#allocation2 + $0x150] sm:$0xf] %v118_v29  ;;  %v124_v32 = vrot.slane %v118_v29, 4  ;;  %v125_v33 = vrot.slane %v119_v30, 4 }
  0x91   :  { %121 = vst [vmem:[#allocation2 + $0x300] sm:$0xf] %v119_v30 }
  0x92   :  { %128 = vst [vmem:[#allocation2 + $0x308] sm:$0xf] %v124_v32 }
  0x93   :  { %129 = vst [vmem:[#allocation2 + $0x2d8] sm:$0xf] %v125_v33 }
  0x94   :  { %353 = vrot.lane.b32.xlu1 %v1411_v1, %s1353_s19  ;;  %351 = vrot.lane.b32.xlu0 %v1406_v0, %s1353_s19  ;;  %s1379_s19 = smov 16  }
  0x95   :  { %300 = vrot.lane.b32.xlu2 %v1406_v0, %s1354_s20 }
  0x96   :  { %v148_v34 = vpop.permute.xlu1 %147  ;;  %v133_v35 = vpop.permute.xlu0 %132 }
  0x97   :  { %v152_v36 = vsel %vm151_vm4, %v148_v34, %v150_v15  ;;  %v153_v37 = vsel %vm151_vm4, %v150_v15, %v148_v34  ;;  %v135_v38 = vsel %vm134_vm5, %v1460_v12, %v133_v35  ;;  %v136_v39 = vsel %vm134_vm5, %v133_v35, %v1460_v12  ;;  %v1483_v40 = vpop.permute.xlu2 %232 }
  0x98   :  { %154 = vst [vmem:[#allocation2 + $0xb0] sm:$0xf] %v152_v36  ;;  %v158_v41 = vrot.slane %v152_v36, 4  ;;  %v159_v42 = vrot.slane %v153_v37, 4  ;;  %v139_v43 = vrot.slane %v135_v38, 4  ;;  %v140_v44 = vrot.slane %v136_v39, 4 }
  0x99   :  { %155 = vst [vmem:[#allocation2 + $0x240] sm:$0xf] %v153_v37  ;;  %vm423_vm4 = vcmp.lt.s32.totalorder %v1449_v4, 79  ;;  %vm406_vm5 = vcmp.lt.s32.totalorder %v1449_v4, 80 }
  0x9a   :  { %162 = vst [vmem:[#allocation2 + $0x90] sm:$0xf] %v158_v41 }
  0x9b   :  { %163 = vst [vmem:[#allocation2 + $0x158] sm:$0xf] %v159_v42 }
  0x9c   :  { %143 = vst [vmem:[#allocation2 + $0x150] sm:$0xf0] %v139_v43  ;;  %317 = vrot.lane.b32.xlu1 %v1406_v0, %s1355_s21  ;;  %302 = vrot.lane.b32.xlu0 %v1411_v1, %s1354_s20 }
  0x9d   :  { %144 = vst [vmem:[#allocation2 + $0x300] sm:$0xf0] %v140_v44  ;;  %319 = vrot.lane.b32.xlu2 %v1411_v1, %s1355_s21 }
  0x9e   :  { %145 = vst [vmem:[#allocation2 + $0x308] sm:$0xf0] %v135_v38  ;;  %v167_v45 = vpop.permute.xlu1 %166  ;;  %v165_v46 = vpop.permute.xlu0 %164 }
  0x9f   :  { %146 = vst [vmem:[#allocation2 + $0x2d8] sm:$0xf0] %v136_v39  ;;  %v169_v47 = vsel %vm168_vm6, %v165_v46, %v167_v45  ;;  %v170_v48 = vsel %vm168_vm6, %v167_v45, %v165_v46  ;;  %v1489_v49 = vpop.permute.xlu2 %572  ;;  %vm372_vm6 = vcmp.lt.s32.totalorder %v1449_v4, 91 }
  0xa0   :  { %v173_v50 = vrot.slane %v169_v47, 4  ;;  %v174_v51 = vrot.slane %v170_v48, 4  ;;  %179 = vst [vmem:[#allocation2 + $0x90] sm:$0xf0] %v169_v47 }
  0xa1   :  { %180 = vst [vmem:[#allocation2 + $0x158] sm:$0xf0] %v170_v48 }
  0xa2   :  { %177 = vst [vmem:[#allocation2 + $0xb0] sm:$0xf0] %v173_v50 }
  0xa3   :  { %178 = vst [vmem:[#allocation2 + $0x240] sm:$0xf0] %v174_v51 }
  0xa4   :  { %846 = vrot.lane.b32.xlu1 %v1411_v1, %s1356_s0  ;;  %844 = vrot.lane.b32.xlu0 %v1406_v0, %s1356_s0 }
  0xa5   :  { %861 = vrot.lane.b32.xlu2 %v1406_v0, %s1357_s22 }
  0xa6   :  { %v199_v52 = vpop.permute.xlu1 %198  ;;  %v184_v53 = vpop.permute.xlu0 %183 }
  0xa7   :  { %v203_v54 = vsel %vm202_vm7, %v199_v52, %v201_v31  ;;  %v204_v55 = vsel %vm202_vm7, %v201_v31, %v199_v52  ;;  %v186_v56 = vsel %vm185_vm8, %v1470_v22, %v184_v53  ;;  %v541_v57 = vpop.permute.xlu2 %540  ;;  %v187_v60 = vsel %vm185_vm8, %v184_v53, %v1470_v22 }
  0xa8   :  { %v207_v58 = vrot.slane %v203_v54, 4  ;;  %v208_v59 = vrot.slane %v204_v55, 4  ;;  %213 = vst [vmem:[#allocation2 + $0x30] sm:$0xf0] %v203_v54  ;;  %v192_v61 = vrot.slane %v186_v56, 4  ;;  %v193_v62 = vrot.slane %v187_v60, 4 }
  0xa9   :  { %214 = vst [vmem:[#allocation2 + $0x110] sm:$0xf0] %v204_v55  ;;  %vm338_vm7 = vcmp.lt.s32.totalorder %v1449_v4, 93  ;;  %vm389_vm8 = vcmp.lt.s32.totalorder %v1449_v4, 90 }
  0xaa   :  { %211 = vst [vmem:[#allocation2 + $0x120] sm:$0xf0] %v207_v58 }
  0xab   :  { %212 = vst [vmem:[#allocation2 + $0x70] sm:$0xf0] %v208_v59 }
  0xac   :  { %188 = vst [vmem:[#allocation2 + $0x120] sm:$0xf] %v186_v56  ;;  %266 = vrot.lane.b32.xlu1 %v1406_v0, %s1358_s1  ;;  %863 = vrot.lane.b32.xlu0 %v1411_v1, %s1357_s22 }
  0xad   :  { %189 = vst [vmem:[#allocation2 + $0x70] sm:$0xf] %v187_v60  ;;  %268 = vrot.lane.b32.xlu2 %v1411_v1, %s1358_s1 }
  0xae   :  { %196 = vst [vmem:[#allocation2 + $0x30] sm:$0xf] %v192_v61  ;;  %v218_v63 = vpop.permute.xlu1 %217  ;;  %v216_v2 = vpop.permute.xlu0 %215 }
  0xaf   :  { %197 = vst [vmem:[#allocation2 + $0x110] sm:$0xf] %v193_v62  ;;  %v220_v3 = vsel %vm219_vm9, %v216_v2, %v218_v63  ;;  %v221_v5 = vsel %vm219_vm9, %v218_v63, %v216_v2  ;;  %v1502_v6 = vpop.permute.xlu2 %504  ;;  %vm355_vm9 = vcmp.lt.s32.totalorder %v1449_v4, 92 }
  0xb0   :  { %222 = vst [vmem:[#allocation2 + $0x50] sm:$0xf] %v220_v3  ;;  %v226_v7 = vrot.slane %v220_v3, 4  ;;  %v227_v8 = vrot.slane %v221_v5, 4 }
  0xb1   :  { %223 = vst [vmem:[#allocation2 + $0x200] sm:$0xf] %v221_v5 }
  0xb2   :  { %230 = vst [vmem:[#allocation2 + $0xd8] sm:$0xf] %v226_v7 }
  0xb3   :  { %231 = vst [vmem:[#allocation2 + $0x298] sm:$0xf] %v227_v8 }
  0xb4   :  { %285 = vrot.lane.b32.xlu1 %v1411_v1, %s1359_s23  ;;  %283 = vrot.lane.b32.xlu0 %v1406_v0, %s1359_s23 }
  0xb5   :  { %810 = vrot.lane.b32.xlu2 %v1406_v0, %s1360_s24 }
  0xb6   :  { %v1508_v9 = vpop.permute.xlu1 %249  ;;  %v235_v10 = vpop.permute.xlu0 %234 }
  0xb7   :  { %v237_v11 = vsel %vm236_vm10, %v1483_v40, %v235_v10  ;;  %v238_v12 = vsel %vm236_vm10, %v235_v10, %v1483_v40  ;;  %v524_v13 = vpop.permute.xlu2 %523  ;;  %vm321_vm10 = vcmp.lt.s32.totalorder %v1449_v4, 94 }
  0xb8   :  { %v241_v14 = vrot.slane %v237_v11, 4  ;;  %v242_v15 = vrot.slane %v238_v12, 4  ;;  %247 = vst [vmem:[#allocation2 + $0xd8] sm:$0xf0] %v237_v11 }
  0xb9   :  { %248 = vst [vmem:[#allocation2 + $0x298] sm:$0xf0] %v238_v12 }
  0xba   :  { %245 = vst [vmem:[#allocation2 + $0x50] sm:$0xf0] %v241_v14 }
  0xbb   :  { %246 = vst [vmem:[#allocation2 + $0x200] sm:$0xf0] %v242_v15 }
  0xbc   :  { %827 = vrot.lane.b32.xlu1 %v1406_v0, %s1361_s25  ;;  %812 = vrot.lane.b32.xlu0 %v1411_v1, %s1360_s24 }
  0xbd   :  { %829 = vrot.lane.b32.xlu2 %v1411_v1, %s1361_s25 }
  0xbe   :  { %v539_v16 = vpop.permute.xlu1 %538  ;;  %v575_v17 = vpop.permute.xlu0 %574 }
  0xbf   :  { %v543_v18 = vsel %vm542_vm11, %v539_v16, %v541_v57  ;;  %v544_v19 = vsel %vm542_vm11, %v541_v57, %v539_v16  ;;  %v577_v20 = vsel %vm576_vm12, %v1489_v49, %v575_v17  ;;  %v578_v21 = vsel %vm576_vm12, %v575_v17, %v1489_v49  ;;  %v1519_v22 = vpop.permute.xlu2 %487 }
  0xc0   :  { %v547_v23 = vrot.slane %v543_v18, 4  ;;  %v548_v24 = vrot.slane %v544_v19, 4  ;;  %553 = vst [vmem:[#allocation2 + $0xa8] sm:$0xf0] %v543_v18  ;;  %v581_v25 = vrot.slane %v577_v20, 4  ;;  %v582_v26 = vrot.slane %v578_v21, 4 }
  0xc1   :  { %554 = vst [vmem:[#allocation2 + $0x250] sm:$0xf0] %v544_v19  ;;  %vm304_vm11 = vcmp.lt.s32.totalorder %v1449_v4, 95  ;;  %vm848_vm12 = vcmp.lt.s32.totalorder %v1449_v4, 27 }
  0xc2   :  { %551 = vst [vmem:[#allocation2 + $0x198] sm:$0xf0] %v547_v23 }
  0xc3   :  { %552 = vst [vmem:[#allocation2 + $0x248] sm:$0xf0] %v548_v24 }
  0xc4   :  { %585 = vst [vmem:[#allocation2 + $0x40] sm:$0xf0] %v581_v25  ;;  %776 = vrot.lane.b32.xlu1 %v1406_v0, %s1362_s26  ;;  %251 = vrot.lane.b32.xlu0 %v1411_v1, %s1338_s4  ;;  %s1367_s4 = smov 43  }
  0xc5   :  { %586 = vst [vmem:[#allocation2 + $0x88] sm:$0xf0] %v582_v26  ;;  %778 = vrot.lane.b32.xlu2 %v1411_v1, %s1362_s26 }
  0xc6   :  { %587 = vst [vmem:[#allocation2 + $0x288] sm:$0xf0] %v577_v20  ;;  %v558_v27 = vpop.permute.xlu1 %557  ;;  %v556_v28 = vpop.permute.xlu0 %555 }
  0xc7   :  { %588 = vst [vmem:[#allocation2 + $0x58] sm:$0xf0] %v578_v21  ;;  %v560_v29 = vsel %vm559_vm13, %v556_v28, %v558_v27  ;;  %v561_v30 = vsel %vm559_vm13, %v558_v27, %v556_v28  ;;  %v1526_v31 = vpop.permute.xlu2 %438  ;;  %vm270_vm13 = vcmp.lt.s32.totalorder %v1449_v4, 106 }
  0xc8   :  { %562 = vst [vmem:[#allocation2 + $0x40] sm:$0xf] %v560_v29  ;;  %v566_v32 = vrot.slane %v560_v29, 4  ;;  %v567_v33 = vrot.slane %v561_v30, 4 }
  0xc9   :  { %563 = vst [vmem:[#allocation2 + $0x88] sm:$0xf] %v561_v30 }
  0xca   :  { %570 = vst [vmem:[#allocation2 + $0x288] sm:$0xf] %v566_v32 }
  0xcb   :  { %571 = vst [vmem:[#allocation2 + $0x58] sm:$0xf] %v567_v33 }
  0xcc   :  { %795 = vrot.lane.b32.xlu1 %v1411_v1, %s1363_s27  ;;  %793 = vrot.lane.b32.xlu0 %v1406_v0, %s1363_s27 }
  0xcd   :  { %742 = vrot.lane.b32.xlu2 %v1406_v0, %s1364_s28 }
  0xce   :  { %v522_v34 = vpop.permute.xlu1 %521  ;;  %v507_v35 = vpop.permute.xlu0 %506 }
  0xcf   :  { %v526_v36 = vsel %vm525_vm14, %v522_v34, %v524_v13  ;;  %v527_v37 = vsel %vm525_vm14, %v524_v13, %v522_v34  ;;  %v509_v38 = vsel %vm508_vm15, %v1502_v6, %v507_v35  ;;  %v510_v39 = vsel %vm508_vm15, %v507_v35, %v1502_v6  ;;  %v911_v40 = vld [vmem:[#allocation2 + $0x40] sm:$0xff]  ;;  %v1535_v41 = vpop.permute.xlu2 %402 }
  0xd0   :  { %528 = vst [vmem:[#allocation2 + $0x198] sm:$0xf] %v526_v36  ;;  %v532_v42 = vrot.slane %v526_v36, 4  ;;  %v533_v43 = vrot.slane %v527_v37, 4  ;;  %v513_v44 = vrot.slane %v509_v38, 4  ;;  %940 = vmatpush.msra.mxu0 %v911_v40  ;;  %v514_v45 = vrot.slane %v510_v39, 4 }
  0xd1   :  { %529 = vst [vmem:[#allocation2 + $0x248] sm:$0xf] %v527_v37  ;;  %v912_v46 = vld [vmem:[#allocation2 + $0x88] sm:$0xff]  ;;  %vm865_vm14 = vcmp.lt.s32.totalorder %v1449_v4, 26  ;;  %vm287_vm15 = vcmp.lt.s32.totalorder %v1449_v4, 96 }
  0xd2   :  { %536 = vst [vmem:[#allocation2 + $0xa8] sm:$0xf] %v532_v42  ;;  %980 = vmatpush.msra.mxu2 %v912_v46 }
  0xd3   :  { %537 = vst [vmem:[#allocation2 + $0x250] sm:$0xf] %v533_v43 }
  0xd4   :  { %517 = vst [vmem:[#allocation2 + $0x60] sm:$0xf0] %v513_v44  ;;  %759 = vrot.lane.b32.xlu1 %v1406_v0, %s1365_s29  ;;  %744 = vrot.lane.b32.xlu0 %v1411_v1, %s1364_s28 }
  0xd5   :  { %518 = vst [vmem:[#allocation2 + $0x2b8] sm:$0xf0] %v514_v45  ;;  %761 = vrot.lane.b32.xlu2 %v1411_v1, %s1365_s29 }
  0xd6   :  { %519 = vst [vmem:[#allocation2 + $0x2e8] sm:$0xf0] %v509_v38  ;;  %v473_v47 = vpop.permute.xlu1 %472  ;;  %v471_v48 = vpop.permute.xlu0 %470 }
  0xd7   :  { %520 = vst [vmem:[#allocation2 + $0x228] sm:$0xf0] %v510_v39  ;;  %v475_v49 = vsel %vm474_vm0, %v471_v48, %v473_v47  ;;  %v476_v50 = vsel %vm474_vm0, %v473_v47, %v471_v48  ;;  %v909_v51 = vld [vmem:[#allocation2 + $0x198] sm:$0xff]  ;;  %v1541_v52 = vpop.permute.xlu2 %421  ;;  %vm831_vm0 = vcmp.lt.s32.totalorder %v1449_v4, 28 }
  0xd8   :  { %v479_v53 = vrot.slane %v475_v49, 4  ;;  %v480_v54 = vrot.slane %v476_v50, 4  ;;  %485 = vst [vmem:[#allocation2 + $0x280] sm:$0xf0] %v475_v49  ;;  %941 = vmatpush.msra.mxu0 %v909_v51  ;;  %v910_v55 = vld [vmem:[#allocation2 + $0x248] sm:$0xff] }
  0xd9   :  { %486 = vst [vmem:[#allocation2 + $0x1a8] sm:$0xf0] %v476_v50  ;;  %981 = vmatpush.msra.mxu2 %v910_v55 }
  0xda   :  { %483 = vst [vmem:[#allocation2 + $0xf8] sm:$0xf0] %v479_v53 }
  0xdb   :  { %484 = vst [vmem:[#allocation2 + $0x2f0] sm:$0xf0] %v480_v54 }
  0xdc   :  { %710 = vrot.lane.b32.xlu1 %v1411_v1, %s1366_s30  ;;  %708 = vrot.lane.b32.xlu0 %v1406_v0, %s1366_s30 }
  0xdd   :  { %725 = vrot.lane.b32.xlu2 %v1406_v0, %s1367_s4 }
  0xde   :  { %v437_v56 = vpop.permute.xlu1 %436  ;;  %v490_v57 = vpop.permute.xlu0 %489 }
  0xdf   :  { %v441_v58 = vsel %vm440_vm1, %v437_v56, %v1526_v31  ;;  %v442_v59 = vsel %vm440_vm1, %v1526_v31, %v437_v56  ;;  %v492_v60 = vsel %vm491_vm2, %v1519_v22, %v490_v57  ;;  %v1551_v61 = vpop.permute.xlu2 %385  ;;  %v493_v2 = vsel %vm491_vm2, %v490_v57, %v1519_v22 }
  0xe0   :  { %v445_v62 = vrot.slane %v441_v58, 4  ;;  %v446_v63 = vrot.slane %v442_v59, 4  ;;  %451 = vst [vmem:[#allocation2 + $0x8] sm:$0xf0] %v441_v58  ;;  %v498_v3 = vrot.slane %v492_v60, 4  ;;  %v499_v5 = vrot.slane %v493_v2, 4 }
  0xe1   :  { %452 = vst [vmem:[#allocation2 + $0x48] sm:$0xf0] %v442_v59  ;;  %v1375_v57 = vmov 0.0   ;;  %vm814_vm1 = vcmp.lt.s32.totalorder %v1449_v4, 29  ;;  %vm780_vm2 = vcmp.lt.s32.totalorder %v1449_v4, 31 }
  0xe2   :  { %449 = vst [vmem:[#allocation2 + $0x1b0] sm:$0xf0] %v445_v62 }
  0xe3   :  { %450 = vst [vmem:[#allocation2 + $0x20] sm:$0xf0] %v446_v63 }
  0xe4   :  { %494 = vst [vmem:[#allocation2 + $0x60] sm:$0xf] %v492_v60  ;;  %674 = vrot.lane.b32.xlu1 %v1406_v0, %s1368_s5  ;;  %727 = vrot.lane.b32.xlu0 %v1411_v1, %s1367_s4 }
  0xe5   :  { %495 = vst [vmem:[#allocation2 + $0x2b8] sm:$0xf] %v493_v2  ;;  %676 = vrot.lane.b32.xlu2 %v1411_v1, %s1368_s5 }
  0xe6   :  { %502 = vst [vmem:[#allocation2 + $0x2e8] sm:$0xf] %v498_v3  ;;  %v456_v6 = vpop.permute.xlu1 %455  ;;  %v454_v7 = vpop.permute.xlu0 %453 }
  0xe7   :  { %503 = vst [vmem:[#allocation2 + $0x228] sm:$0xf] %v499_v5  ;;  %v458_v8 = vsel %vm457_vm3, %v454_v7, %v456_v6  ;;  %v459_v10 = vsel %vm457_vm3, %v456_v6, %v454_v7  ;;  %v1558_v11 = vpop.permute.xlu2 %336  ;;  %vm253_vm3 = vcmp.lt.s32.totalorder %v1449_v4, 107 }
  0xe8   :  { %460 = vst [vmem:[#allocation2 + $0xf8] sm:$0xf] %v458_v8  ;;  %v464_v12 = vrot.slane %v458_v8, 4  ;;  %v465_v13 = vrot.slane %v459_v10, 4 }
  0xe9   :  { %461 = vst [vmem:[#allocation2 + $0x2f0] sm:$0xf] %v459_v10 }
  0xea   :  { %468 = vst [vmem:[#allocation2 + $0x280] sm:$0xf] %v464_v12 }
  0xeb   :  { %469 = vst [vmem:[#allocation2 + $0x1a8] sm:$0xf] %v465_v13  ;;  %v907_v14 = vld [vmem:[#allocation2 + $0x60] sm:$0xff] }
  0xec   :  { %942 = vmatpush.msra.mxu0 %v907_v14  ;;  %v908_v15 = vld [vmem:[#allocation2 + $0x2b8] sm:$0xff]  ;;  %693 = vrot.lane.b32.xlu1 %v1411_v1, %s1369_s6  ;;  %45 = vst [vmem:[#allocation2 + $0x2d0] sm:$0xf0] %v1375_v57 }
  0xed   :  { %982 = vmatpush.msra.mxu2 %v908_v15  ;;  %691 = vrot.lane.b32.xlu0 %v1406_v0, %s1369_s6  ;;  %46 = vst [vmem:[#allocation2 + $0x1e0] sm:$0xf0] %v1375_v57 }
  0xee   :  { %v420_v16 = vpop.permute.xlu1 %419  ;;  %v405_v17 = vpop.permute.xlu0 %404  ;;  %640 = vrot.lane.b32.xlu2 %v1406_v0, %s1370_s7  ;;  %48 = vst [vmem:[#allocation2 + $0x310] sm:$0xf0] %v1375_v57 }
  0xef   :  { %v424_v18 = vsel %vm423_vm4, %v420_v16, %v1541_v52  ;;  %v425_v19 = vsel %vm423_vm4, %v1541_v52, %v420_v16  ;;  %v407_v20 = vsel %vm406_vm5, %v1535_v41, %v405_v17  ;;  %v408_v21 = vsel %vm406_vm5, %v405_v17, %v1535_v41  ;;  %v905_v22 = vld [vmem:[#allocation2 + $0xf8] sm:$0xff]  ;;  %v1569_v23 = vpop.permute.xlu2 %300  ;;  %49 = vst [vmem:[#allocation2 + $0x18] sm:$0xf0] %v1375_v57 }
  0xf0   :  { %426 = vst [vmem:[#allocation2 + $0x1b0] sm:$0xf] %v424_v18  ;;  %v430_v24 = vrot.slane %v424_v18, 4  ;;  %v431_v25 = vrot.slane %v425_v19, 4  ;;  %v411_v26 = vrot.slane %v407_v20, 4  ;;  %943 = vmatpush.msra.mxu0 %v905_v22  ;;  %v412_v27 = vrot.slane %v408_v21, 4 }
  0xf1   :  { %427 = vst [vmem:[#allocation2 + $0x20] sm:$0xf] %v425_v19  ;;  %v906_v28 = vld [vmem:[#allocation2 + $0x2f0] sm:$0xff]  ;;  %vm797_vm4 = vcmp.lt.s32.totalorder %v1449_v4, 30  ;;  %vm763_vm5 = vcmp.lt.s32.totalorder %v1449_v4, 32 }
  0xf2   :  { %434 = vst [vmem:[#allocation2 + $0x8] sm:$0xf] %v430_v24  ;;  %983 = vmatpush.msra.mxu2 %v906_v28 }
  0xf3   :  { %435 = vst [vmem:[#allocation2 + $0x48] sm:$0xf] %v431_v25 }
  0xf4   :  { %415 = vst [vmem:[#allocation2 + $0x2c8] sm:$0xf0] %v411_v26  ;;  %657 = vrot.lane.b32.xlu1 %v1406_v0, %s1371_s8 }
  0xf5   :  { %416 = vst [vmem:[#allocation2 + $0x208] sm:$0xf0] %v412_v27  ;;  %642 = vrot.lane.b32.xlu0 %v1411_v1, %s1370_s7 }
  0xf6   :  { %417 = vst [vmem:[#allocation2 + $0x188] sm:$0xf0] %v407_v20  ;;  %v371_v29 = vpop.permute.xlu1 %370  ;;  %v369_v30 = vpop.permute.xlu0 %368  ;;  %659 = vrot.lane.b32.xlu2 %v1411_v1, %s1371_s8 }
  0xf7   :  { %418 = vst [vmem:[#allocation2 + $0x140] sm:$0xf0] %v408_v21  ;;  %v373_v31 = vsel %vm372_vm6, %v369_v30, %v371_v29  ;;  %v374_v32 = vsel %vm372_vm6, %v371_v29, %v369_v30  ;;  %v903_v33 = vld [vmem:[#allocation2 + $0x1b0] sm:$0xff]  ;;  %v1575_v34 = vpop.permute.xlu2 %319  ;;  %vm746_vm6 = vcmp.lt.s32.totalorder %v1449_v4, 42 }
  0xf8   :  { %v377_v35 = vrot.slane %v373_v31, 4  ;;  %v378_v36 = vrot.slane %v374_v32, 4  ;;  %383 = vst [vmem:[#allocation2 + $0x128] sm:$0xf0] %v373_v31  ;;  %944 = vmatpush.msra.mxu0 %v903_v33  ;;  %v904_v37 = vld [vmem:[#allocation2 + $0x20] sm:$0xff] }
  0xf9   :  { %384 = vst [vmem:[#allocation2 + $0xe0] sm:$0xf0] %v374_v32  ;;  %984 = vmatpush.msra.mxu2 %v904_v37 }
  0xfa   :  { %381 = vst [vmem:[#allocation2 + $0xc8] sm:$0xf0] %v377_v35 }
  0xfb   :  { %382 = vst [vmem:[#allocation2 + $0x290] sm:$0xf0] %v378_v36 }
  0xfc   :  { %608 = vrot.lane.b32.xlu1 %v1411_v1, %s1372_s9 }
  0xfd   :  { %606 = vrot.lane.b32.xlu0 %v1406_v0, %s1372_s9 }
  0xfe   :  { %v335_v38 = vpop.permute.xlu1 %334  ;;  %v388_v39 = vpop.permute.xlu0 %387  ;;  %623 = vrot.lane.b32.xlu2 %v1406_v0, %s1373_s10 }
  0xff   :  { %v339_v40 = vsel %vm338_vm7, %v335_v38, %v1558_v11  ;;  %v340_v41 = vsel %vm338_vm7, %v1558_v11, %v335_v38  ;;  %v390_v42 = vsel %vm389_vm8, %v1551_v61, %v388_v39  ;;  %v1585_v43 = vpop.permute.xlu2 %861  ;;  %v391_v46 = vsel %vm389_vm8, %v388_v39, %v1551_v61 }
 0x100   :  { %v343_v44 = vrot.slane %v339_v40, 4  ;;  %v344_v45 = vrot.slane %v340_v41, 4  ;;  %349 = vst [vmem:[#allocation2 + $0x100] sm:$0xf0] %v339_v40  ;;  %v396_v47 = vrot.slane %v390_v42, 4  ;;  %v397_v48 = vrot.slane %v391_v46, 4 }
 0x101   :  { %350 = vst [vmem:[#allocation2 + $0x1c0] sm:$0xf0] %v340_v41  ;;  %vm712_vm7 = vcmp.lt.s32.totalorder %v1449_v4, 44  ;;  %vm678_vm8 = vcmp.lt.s32.totalorder %v1449_v4, 46 }
 0x102   :  { %347 = vst [vmem:[#allocation2 + $0x1c8] sm:$0xf0] %v343_v44 }
 0x103   :  { %348 = vst [vmem:[#allocation2 + $0xc0] sm:$0xf0] %v344_v45 }
 0x104   :  { %392 = vst [vmem:[#allocation2 + $0x2c8] sm:$0xf] %v390_v42  ;;  %589 = vrot.lane.b32.xlu1 %v1406_v0, %s1374_s11 }
 0x105   :  { %393 = vst [vmem:[#allocation2 + $0x208] sm:$0xf] %v391_v46  ;;  %625 = vrot.lane.b32.xlu0 %v1411_v1, %s1373_s10 }
 0x106   :  { %400 = vst [vmem:[#allocation2 + $0x188] sm:$0xf] %v396_v47  ;;  %v354_v49 = vpop.permute.xlu1 %353  ;;  %v352_v50 = vpop.permute.xlu0 %351  ;;  %591 = vrot.lane.b32.xlu2 %v1411_v1, %s1374_s11 }
 0x107   :  { %401 = vst [vmem:[#allocation2 + $0x140] sm:$0xf] %v397_v48  ;;  %v356_v51 = vsel %vm355_vm9, %v352_v50, %v354_v49  ;;  %v357_v52 = vsel %vm355_vm9, %v354_v49, %v352_v50  ;;  %v1592_v53 = vpop.permute.xlu2 %268  ;;  %vm729_vm9 = vcmp.lt.s32.totalorder %v1449_v4, 43 }
 0x108   :  { %358 = vst [vmem:[#allocation2 + $0xc8] sm:$0xf] %v356_v51  ;;  %v362_v54 = vrot.slane %v356_v51, 4  ;;  %v363_v55 = vrot.slane %v357_v52, 4 }
 0x109   :  { %359 = vst [vmem:[#allocation2 + $0x290] sm:$0xf] %v357_v52 }
 0x10a   :  { %366 = vst [vmem:[#allocation2 + $0x128] sm:$0xf] %v362_v54 }
 0x10b   :  { %367 = vst [vmem:[#allocation2 + $0xe0] sm:$0xf] %v363_v55  ;;  %v901_v0 = vld [vmem:[#allocation2 + $0x2c8] sm:$0xff] }
 0x10c   :  { %945 = vmatpush.msra.mxu0 %v901_v0  ;;  %v902_v56 = vld [vmem:[#allocation2 + $0x208] sm:$0xff] }
 0x10d   :  { %985 = vmatpush.msra.mxu2 %v902_v56 }
 0x10e   :  { %v318_v1 = vpop.permute.xlu1 %317  ;;  %v303_v58 = vpop.permute.xlu0 %302 }
 0x10f   :  { %v322_v59 = vsel %vm321_vm10, %v318_v1, %v1575_v34  ;;  %v323_v60 = vsel %vm321_vm10, %v1575_v34, %v318_v1  ;;  %v305_v61 = vsel %vm304_vm11, %v1569_v23, %v303_v58  ;;  %v306_v62 = vsel %vm304_vm11, %v303_v58, %v1569_v23  ;;  %v899_v63 = vld [vmem:[#allocation2 + $0xc8] sm:$0xff]  ;;  %v1600_v2 = vpop.permute.xlu2 %810 }
 0x110   :  { %324 = vst [vmem:[#allocation2 + $0x1c8] sm:$0xf] %v322_v59  ;;  %v328_v3 = vrot.slane %v322_v59, 4  ;;  %v329_v5 = vrot.slane %v323_v60, 4  ;;  %v309_v6 = vrot.slane %v305_v61, 4  ;;  %946 = vmatpush.msra.mxu0 %v899_v63  ;;  %v310_v7 = vrot.slane %v306_v62, 4 }
 0x111   :  { %325 = vst [vmem:[#allocation2 + $0xc0] sm:$0xf] %v323_v60  ;;  %v900_v8 = vld [vmem:[#allocation2 + $0x290] sm:$0xff]  ;;  %vm695_vm10 = vcmp.lt.s32.totalorder %v1449_v4, 45  ;;  %vm661_vm11 = vcmp.lt.s32.totalorder %v1449_v4, 47 }
 0x112   :  { %332 = vst [vmem:[#allocation2 + $0x100] sm:$0xf] %v328_v3  ;;  %986 = vmatpush.msra.mxu2 %v900_v8 }
 0x113   :  { %333 = vst [vmem:[#allocation2 + $0x1c0] sm:$0xf] %v329_v5 }
 0x114   :  { %313 = vst [vmem:[#allocation2 + $0x1d0] sm:$0xf0] %v309_v6 }
 0x115   :  { %314 = vst [vmem:[#allocation2 + $0x2f8] sm:$0xf0] %v310_v7 }
 0x116   :  { %315 = vst [vmem:[#allocation2 + $0xd0] sm:$0xf0] %v305_v61  ;;  %v847_v10 = vpop.permute.xlu1 %846  ;;  %v845_v11 = vpop.permute.xlu0 %844 }
 0x117   :  { %316 = vst [vmem:[#allocation2 + $0x260] sm:$0xf0] %v306_v62  ;;  %v849_v12 = vsel %vm848_vm12, %v845_v11, %v847_v10  ;;  %v850_v13 = vsel %vm848_vm12, %v847_v10, %v845_v11  ;;  %v897_v14 = vld [vmem:[#allocation2 + $0x1c8] sm:$0xff]  ;;  %v830_v18 = vpop.permute.xlu2 %829  ;;  %v891_v10 = vld [vmem:[#allocation2 + $0x50] sm:$0xff]  ;;  %v892_v11 = vld [vmem:[#allocation2 + $0x200] sm:$0xff]  ;;  %vm644_vm12 = vcmp.lt.s32.totalorder %v1449_v4, 48 }
 0x118   :  { %v853_v15 = vrot.slane %v849_v12, 4  ;;  %v854_v16 = vrot.slane %v850_v13, 4  ;;  %859 = vst [vmem:[#allocation2 + $0x238] sm:$0xf0] %v849_v12  ;;  %947 = vmatpush.msra.mxu0 %v897_v14  ;;  %v898_v17 = vld [vmem:[#allocation2 + $0xc0] sm:$0xff] }
 0x119   :  { %860 = vst [vmem:[#allocation2 + $0x108] sm:$0xf0] %v850_v13  ;;  %987 = vmatpush.msra.mxu2 %v898_v17  ;;  %v889_v14 = vld [vmem:[#allocation2 + $0x120] sm:$0xff] }
 0x11a   :  { %857 = vst [vmem:[#allocation2 + $0x2e0] sm:$0xf0] %v853_v15 }
 0x11b   :  { %858 = vst [vmem:[#allocation2 + $0x258] sm:$0xf0] %v854_v16 }
 0x11e   :  { %v267_v19 = vpop.permute.xlu1 %266  ;;  %v864_v20 = vpop.permute.xlu0 %863 }
 0x11f   :  { %v271_v21 = vsel %vm270_vm13, %v267_v19, %v1592_v53  ;;  %v272_v22 = vsel %vm270_vm13, %v1592_v53, %v267_v19  ;;  %v866_v23 = vsel %vm865_vm14, %v1585_v43, %v864_v20  ;;  %v867_v26 = vsel %vm865_vm14, %v864_v20, %v1585_v43  ;;  %v779_v29 = vpop.permute.xlu2 %778  ;;  %v890_v20 = vld [vmem:[#allocation2 + $0x70] sm:$0xff] }
 0x120   :  { %v275_v24 = vrot.slane %v271_v21, 4  ;;  %v276_v25 = vrot.slane %v272_v22, 4  ;;  %281 = vst [vmem:[#allocation2 + $0x98] sm:$0xf0] %v271_v21  ;;  %v872_v27 = vrot.slane %v866_v23, 4  ;;  %v873_v28 = vrot.slane %v867_v26, 4 }
 0x121   :  { %282 = vst [vmem:[#allocation2 + $0x230] sm:$0xf0] %v272_v22  ;;  %vm610_vm13 = vcmp.lt.s32.totalorder %v1449_v4, 59  ;;  %vm593_vm14 = vcmp.lt.s32.totalorder %v1449_v4, 60 }
 0x122   :  { %279 = vst [vmem:[#allocation2 + $0x2b0] sm:$0xf0] %v275_v24  ;;  %v887_v24 = vld [vmem:[#allocation2 + $0xb0] sm:$0xff] }
 0x123   :  { %280 = vst [vmem:[#allocation2 + $0x2a0] sm:$0xf0] %v276_v25 }
 0x124   :  { %868 = vst [vmem:[#allocation2 + $0x2d0] sm:$0xf] %v866_v23 }
 0x125   :  { %869 = vst [vmem:[#allocation2 + $0x1e0] sm:$0xf] %v867_v26 }
 0x126   :  { %876 = vst [vmem:[#allocation2 + $0x310] sm:$0xf] %v872_v27  ;;  %v286_v30 = vpop.permute.xlu1 %285  ;;  %v284_v31 = vpop.permute.xlu0 %283  ;;  %v888_v27 = vld [vmem:[#allocation2 + $0x240] sm:$0xff] }
 0x127   :  { %877 = vst [vmem:[#allocation2 + $0x18] sm:$0xf] %v873_v28  ;;  %v288_v32 = vsel %vm287_vm15, %v284_v31, %v286_v30  ;;  %v289_v33 = vsel %vm287_vm15, %v286_v30, %v284_v31  ;;  %v1612_v38 = vpop.permute.xlu2 %742  ;;  %v885_v28 = vld [vmem:[#allocation2 + $0x150] sm:$0xff]  ;;  %v886_v30 = vld [vmem:[#allocation2 + $0x300] sm:$0xff]  ;;  %vm627_vm15 = vcmp.lt.s32.totalorder %v1449_v4, 58 }
 0x128   :  { %290 = vst [vmem:[#allocation2 + $0x1d0] sm:$0xf] %v288_v32  ;;  %v294_v34 = vrot.slane %v288_v32, 4  ;;  %v295_v35 = vrot.slane %v289_v33, 4  ;;  %v883_v31 = vld [vmem:[#allocation2 + $0x170] sm:$0xff] }
 0x129   :  { %291 = vst [vmem:[#allocation2 + $0x2f8] sm:$0xf] %v289_v33  ;;  %v884_v32 = vld [vmem:[#allocation2 + $0x210] sm:$0xff] }
 0x12a   :  { %298 = vst [vmem:[#allocation2 + $0xd0] sm:$0xf] %v294_v34 }
 0x12b   :  { %299 = vst [vmem:[#allocation2 + $0x260] sm:$0xf] %v295_v35  ;;  %v929_v36 = vld [vmem:[#allocation2 + $0x2d0] sm:$0xff] }
 0x12c   :  { %967 = vmatpush.msra.mxu1 %v929_v36  ;;  %v930_v37 = vld [vmem:[#allocation2 + $0x1e0] sm:$0xff]  ;;  %v881_v35 = vld [vmem:[#allocation2 + $0x190] sm:$0xff] }
 0x12d   :  { %1007 = vmatpush.msra.mxu3 %v930_v37  ;;  %v882_v36 = vld [vmem:[#allocation2 + $0x1f0] sm:$0xff] }
 0x12e   :  { %v828_v39 = vpop.permute.xlu1 %827  ;;  %v813_v40 = vpop.permute.xlu0 %812 }
 0x12f   :  { %v832_v41 = vsel %vm831_vm0, %v828_v39, %v830_v18  ;;  %v833_v42 = vsel %vm831_vm0, %v830_v18, %v828_v39  ;;  %v815_v43 = vsel %vm814_vm1, %v1600_v2, %v813_v40  ;;  %v816_v44 = vsel %vm814_vm1, %v813_v40, %v1600_v2  ;;  %v895_v45 = vld [vmem:[#allocation2 + $0x1d0] sm:$0xff]  ;;  %v762_v56 = vpop.permute.xlu2 %761  ;;  %v1059_v40 = vld [vmem:[#allocation2 + $0x58] sm:$0xff] }
 0x130   :  { %834 = vst [vmem:[#allocation2 + $0x2e0] sm:$0xf] %v832_v41  ;;  %v838_v46 = vrot.slane %v832_v41, 4  ;;  %v839_v47 = vrot.slane %v833_v42, 4  ;;  %v819_v48 = vrot.slane %v815_v43, 4  ;;  %948 = vmatpush.msra.mxu0 %v895_v45  ;;  %v820_v49 = vrot.slane %v816_v44, 4 }
 0x131   :  { %835 = vst [vmem:[#allocation2 + $0x258] sm:$0xf] %v833_v42  ;;  %v896_v50 = vld [vmem:[#allocation2 + $0x2f8] sm:$0xff]  ;;  %v1057_v45 = vld [vmem:[#allocation2 + $0x250] sm:$0xff]  ;;  %vm936_vm0 = vcmask 588800  }
 0x132   :  { %842 = vst [vmem:[#allocation2 + $0x238] sm:$0xf] %v838_v46  ;;  %988 = vmatpush.msra.mxu2 %v896_v50 }
 0x133   :  { %843 = vst [vmem:[#allocation2 + $0x108] sm:$0xf] %v839_v47  ;;  %v1055_v47 = vld [vmem:[#allocation2 + $0x228] sm:$0xff] }
 0x134   :  { %823 = vst [vmem:[#allocation2 + $0x130] sm:$0xf0] %v819_v48 }
 0x135   :  { %824 = vst [vmem:[#allocation2 + $0x138] sm:$0xf0] %v820_v49 }
 0x136   :  { %825 = vst [vmem:[#allocation2 + $0x220] sm:$0xf0] %v815_v43  ;;  %v777_v51 = vpop.permute.xlu1 %776  ;;  %v252_v52 = vpop.permute.xlu0 %251 }
 0x137   :  { %826 = vst [vmem:[#allocation2 + $0x218] sm:$0xf0] %v816_v44  ;;  %v781_v53 = vsel %vm780_vm2, %v777_v51, %v779_v29  ;;  %v782_v54 = vsel %vm780_vm2, %v779_v29, %v777_v51  ;;  %v254_v55 = vsel %vm253_vm3, %v1508_v9, %v252_v52  ;;  %v927_v0 = vld [vmem:[#allocation2 + $0x2e0] sm:$0xff]  ;;  %v255_v58 = vsel %vm253_vm3, %v252_v52, %v1508_v9  ;;  %v1621_v6 = vpop.permute.xlu2 %725  ;;  %v1077_v44 = vld [vmem:[#allocation2 + $0x18] sm:$0xff]  ;;  %v1053_v51 = vld [vmem:[#allocation2 + $0x1a8] sm:$0xff] }
 0x138   :  { %v785_v57 = vrot.slane %v781_v53, 4  ;;  %v786_v1 = vrot.slane %v782_v54, 4  ;;  %791 = vst [vmem:[#allocation2 + $0x278] sm:$0xf0] %v781_v53  ;;  %968 = vmatpush.msra.mxu1 %v927_v0  ;;  %v928_v59 = vld [vmem:[#allocation2 + $0x258] sm:$0xff]  ;;  %v260_v60 = vrot.slane %v254_v55, 4 }
 0x139   :  { %792 = vst [vmem:[#allocation2 + $0x178] sm:$0xf0] %v782_v54  ;;  %1008 = vmatpush.msra.mxu3 %v928_v59  ;;  %v261_v61 = vrot.slane %v255_v58, 4 }
 0x13a   :  { %789 = vst [vmem:[#allocation2 + $0x318] sm:$0xf0] %v785_v57  ;;  %v1075_v46 = vld [vmem:[#allocation2 + $0x108] sm:$0xff] }
 0x13b   :  { %790 = vst [vmem:[#allocation2 + $0x1e8] sm:$0xf0] %v786_v1 }
 0x13c   :  { %256 = vst [vmem:[#allocation2 + $0x2b0] sm:$0xf] %v254_v55 }
 0x13d   :  { %257 = vst [vmem:[#allocation2 + $0x2a0] sm:$0xf] %v255_v58 }
 0x13e   :  { %264 = vst [vmem:[#allocation2 + $0x98] sm:$0xf] %v260_v60  ;;  %v796_v62 = vpop.permute.xlu1 %795  ;;  %v794_v63 = vpop.permute.xlu0 %793  ;;  %v1049_v60 = vld [vmem:[#allocation2 + $0x140] sm:$0xff] }
 0x13f   :  { %265 = vst [vmem:[#allocation2 + $0x230] sm:$0xf] %v261_v61  ;;  %v798_v2 = vsel %vm797_vm4, %v794_v63, %v796_v62  ;;  %v799_v3 = vsel %vm797_vm4, %v796_v62, %v794_v63  ;;  %v677_v29 = vpop.permute.xlu2 %676  ;;  %v1047_v62 = vld [vmem:[#allocation2 + $0xe0] sm:$0xff] }
 0x140   :  { %800 = vst [vmem:[#allocation2 + $0x130] sm:$0xf] %v798_v2  ;;  %v804_v9 = vrot.slane %v798_v2, 4  ;;  %v805_v5 = vrot.slane %v799_v3, 4  ;;  %v1045_v63 = vld [vmem:[#allocation2 + $0x1c0] sm:$0xff] }
 0x141   :  { %801 = vst [vmem:[#allocation2 + $0x138] sm:$0xf] %v799_v3 }
 0x142   :  { %808 = vst [vmem:[#allocation2 + $0x220] sm:$0xf] %v804_v9  ;;  %v1043_v9 = vld [vmem:[#allocation2 + $0x260] sm:$0xff] }
 0x143   :  { %809 = vst [vmem:[#allocation2 + $0x218] sm:$0xf] %v805_v5  ;;  %v893_v7 = vld [vmem:[#allocation2 + $0x2b0] sm:$0xff] }
 0x144   :  { %949 = vmatpush.msra.mxu0 %v893_v7  ;;  %v894_v8 = vld [vmem:[#allocation2 + $0x2a0] sm:$0xff] }
 0x145   :  { %989 = vmatpush.msra.mxu2 %v894_v8 }
 0x146   :  { %950 = vmatpush.msra.mxu0 %v891_v10  ;;  %v760_v12 = vpop.permute.xlu1 %759  ;;  %v745_v13 = vpop.permute.xlu0 %744 }
 0x147   :  { %990 = vmatpush.msra.mxu2 %v892_v11  ;;  %v764_v15 = vsel %vm763_vm5, %v760_v12, %v762_v56  ;;  %v765_v16 = vsel %vm763_vm5, %v762_v56, %v760_v12  ;;  %v747_v17 = vsel %vm746_vm6, %v1612_v38, %v745_v13  ;;  %v748_v18 = vsel %vm746_vm6, %v745_v13, %v1612_v38  ;;  %v925_v19 = vld [vmem:[#allocation2 + $0x130] sm:$0xff]  ;;  %v1051_v56 = vld [vmem:[#allocation2 + $0x48] sm:$0xff] }
 0x148   :  { %951 = vmatpush.msra.mxu0 %v889_v14  ;;  %766 = vst [vmem:[#allocation2 + $0x318] sm:$0xf] %v764_v15  ;;  %v770_v21 = vrot.slane %v764_v15, 4  ;;  %v771_v22 = vrot.slane %v765_v16, 4  ;;  %v751_v23 = vrot.slane %v747_v17, 4  ;;  %969 = vmatpush.msra.mxu1 %v925_v19  ;;  %v752_v25 = vrot.slane %v748_v18, 4  ;;  %v1630_v50 = vpop.permute.xlu2 %640 }
 0x149   :  { %991 = vmatpush.msra.mxu2 %v890_v20  ;;  %767 = vst [vmem:[#allocation2 + $0x1e8] sm:$0xf] %v765_v16  ;;  %v926_v26 = vld [vmem:[#allocation2 + $0x138] sm:$0xff]  ;;  %v1041_v11 = vld [vmem:[#allocation2 + $0x230] sm:$0xff] }
 0x14a   :  { %774 = vst [vmem:[#allocation2 + $0x278] sm:$0xf] %v770_v21  ;;  %952 = vmatpush.msra.mxu0 %v887_v24  ;;  %1009 = vmatpush.msra.mxu3 %v926_v26  ;;  %v1073_v48 = vld [vmem:[#allocation2 + $0x218] sm:$0xff]  ;;  %v1037_v16 = vld [vmem:[#allocation2 + $0x110] sm:$0xff] }
 0x14b   :  { %775 = vst [vmem:[#allocation2 + $0x178] sm:$0xf] %v771_v22  ;;  %992 = vmatpush.msra.mxu2 %v888_v27  ;;  %v1039_v14 = vld [vmem:[#allocation2 + $0x298] sm:$0xff] }
 0x14c   :  { %755 = vst [vmem:[#allocation2 + $0x1d8] sm:$0xf0] %v751_v23  ;;  %953 = vmatpush.msra.mxu0 %v885_v28  ;;  %v1035_v21 = vld [vmem:[#allocation2 + $0x158] sm:$0xff] }
 0x14d   :  { %756 = vst [vmem:[#allocation2 + $0x38] sm:$0xf0] %v752_v25  ;;  %993 = vmatpush.msra.mxu2 %v886_v30  ;;  %v1033_v30 = vld [vmem:[#allocation2 + $0x2d8] sm:$0xff] }
 0x14e   :  { %757 = vst [vmem:[#allocation2 + $0xb8] sm:$0xf0] %v747_v17  ;;  %954 = vmatpush.msra.mxu0 %v883_v31  ;;  %v711_v33 = vpop.permute.xlu1 %710  ;;  %v709_v34 = vpop.permute.xlu0 %708 }
 0x14f   :  { %758 = vst [vmem:[#allocation2] sm:$0xf0] %v748_v18  ;;  %994 = vmatpush.msra.mxu2 %v884_v32  ;;  %v713_v37 = vsel %vm712_vm7, %v709_v34, %v711_v33  ;;  %v714_v38 = vsel %vm712_vm7, %v711_v33, %v709_v34  ;;  %v923_v39 = vld [vmem:[#allocation2 + $0x318] sm:$0xff]  ;;  %v1031_v33 = vld [vmem:[#allocation2 + $0x10] sm:$0xff] }
 0x150   :  { %955 = vmatpush.msra.mxu0 %v881_v35  ;;  %v717_v41 = vrot.slane %v713_v37, 4  ;;  %v718_v42 = vrot.slane %v714_v38, 4  ;;  %723 = vst [vmem:[#allocation2 + $0x148] sm:$0xf0] %v713_v37  ;;  %970 = vmatpush.msra.mxu1 %v923_v39  ;;  %v924_v43 = vld [vmem:[#allocation2 + $0x1e8] sm:$0xff]  ;;  %v660_v7 = vpop.permute.xlu2 %659  ;;  %v1029_v34 = vld [vmem:[#allocation2 + $0x1b8] sm:$0xff] }
 0x151   :  { %995 = vmatpush.msra.mxu2 %v882_v36  ;;  %724 = vst [vmem:[#allocation2 + $0x78] sm:$0xf0] %v714_v38  ;;  %1010 = vmatpush.msra.mxu3 %v924_v43 }
 0x152   :  { %1118 = vmatpush.msrb.mxu0 %v1059_v40  ;;  %721 = vst [vmem:[#allocation2 + $0xe8] sm:$0xf0] %v717_v41  ;;  %v1071_v49 = vld [vmem:[#allocation2 + $0x178] sm:$0xff] }
 0x153   :  { %1145 = vmatpush.msrb.mxu2 %v1077_v44  ;;  %722 = vst [vmem:[#allocation2 + $0x1a0] sm:$0xf0] %v718_v42 }
 0x154   :  { %1119 = vmatpush.msrb.mxu0 %v1057_v45 }
 0x155   :  { %1146 = vmatpush.msrb.mxu2 %v1075_v46  ;;  %v1646_v46 = vld [vmem:[#allocation6] sm:$0xff] }
 0x156   :  { %1120 = vmatpush.msrb.mxu0 %v1055_v47  ;;  %v675_v52 = vpop.permute.xlu1 %674  ;;  %v728_v53 = vpop.permute.xlu0 %727  ;;  %996 = vmatmul.f32.vlgmr.msra.gmra.mxu2 %v1646_v46 }
 0x157   :  { %1147 = vmatpush.msrb.mxu2 %v1073_v48  ;;  %v679_v54 = vsel %vm678_vm8, %v675_v52, %v677_v29  ;;  %v680_v55 = vsel %vm678_vm8, %v677_v29, %v675_v52  ;;  %v730_v0 = vsel %vm729_vm9, %v1621_v6, %v728_v53  ;;  %v731_v58 = vsel %vm729_vm9, %v728_v53, %v1621_v6 }
 0x158   :  { %1121 = vmatpush.msrb.mxu0 %v1053_v51  ;;  %v683_v57 = vrot.slane %v679_v54, 4  ;;  %v684_v1 = vrot.slane %v680_v55, 4  ;;  %689 = vst [vmem:[#allocation2 + $0x168] sm:$0xf0] %v679_v54  ;;  %v736_v59 = vrot.slane %v730_v0, 4  ;;  %v737_v61 = vrot.slane %v731_v58, 4  ;;  %v624_v31 = vpop.permute.xlu2 %623 }
 0x159   :  { %1148 = vmatpush.msrb.mxu2 %v1071_v49  ;;  %690 = vst [vmem:[#allocation2 + $0x270] sm:$0xf0] %v680_v55  ;;  %956 = vmatmul.f32.vlgmr.msra.gmra.mxu0 %v1646_v46 }
 0x15a   :  { %1122 = vmatpush.msrb.mxu0 %v1051_v56  ;;  %687 = vst [vmem:[#allocation2 + $0xf0] sm:$0xf0] %v683_v57  ;;  %v880_v56 = vld [vmem:[%s1664_s2] sm:$0xff]  ;;  %s1377_s2 = smov [#allocation8]  }
 0x15b   :  { %688 = vst [vmem:[#allocation2 + $0x268] sm:$0xf0] %v684_v1  ;;  %v1376_v1 = vmov 0   ;;  %s1171_s14 = sshll.u32 %s1377_s2, 4  ;;  %s1172_s14 = int_to_ptr.vmem [resolvable:$true] %s1171_s14 }
 0x15c   :  { %1123 = vmatpush.msrb.mxu0 %v1049_v60  ;;  %732 = vst [vmem:[#allocation2 + $0x1d8] sm:$0xf] %v730_v0  ;;  %1246 = vset.pattern.permute.xlu0 %v1376_v1  ;;  %v879_v60 = vld [vmem:[#allocation6 + $0x8] sm:$0xff] }
 0x15d   :  { %733 = vst [vmem:[#allocation2 + $0x38] sm:$0xf] %v731_v58  ;;  %933 = vperm.xlu0 %1246, %v880_v56  }
 0x15e   :  { %1124 = vmatpush.msrb.mxu0 %v1047_v62  ;;  %740 = vst [vmem:[#allocation2 + $0xb8] sm:$0xf] %v736_v59  ;;  %v694_v2 = vpop.permute.xlu1 %693  ;;  %v1076_v62 = vld [vmem:[#allocation2 + $0x310] sm:$0xff] }
 0x15f   :  { %741 = vst [vmem:[#allocation2] sm:$0xf] %v737_v61  ;;  %v692_v3 = vpop.permute.xlu0 %691  ;;  %v1058_v61 = vld [vmem:[#allocation2 + $0x288] sm:$0xff] }
 0x160   :  { %1125 = vmatpush.msrb.mxu0 %v1045_v63  ;;  %v696_v5 = vsel %vm695_vm10, %v692_v3, %v694_v2  ;;  %v697_v6 = vsel %vm695_vm10, %v694_v2, %v692_v3  ;;  %v592_v44 = vpop.permute.xlu2 %591  ;;  %v1056_v2 = vld [vmem:[#allocation2 + $0xa8] sm:$0xff]  ;;  %v1074_v3 = vld [vmem:[#allocation2 + $0x238] sm:$0xff] }
 0x161   :  { %698 = vst [vmem:[#allocation2 + $0xe8] sm:$0xf] %v696_v5  ;;  %v702_v8 = vrot.slane %v696_v5, 4  ;;  %v703_v10 = vrot.slane %v697_v6, 4  ;;  %v1072_v5 = vld [vmem:[#allocation2 + $0x220] sm:$0xff] }
 0x162   :  { %1126 = vmatpush.msrb.mxu0 %v1043_v9  ;;  %699 = vst [vmem:[#allocation2 + $0x1a0] sm:$0xf] %v697_v6  ;;  %v1054_v9 = vld [vmem:[#allocation2 + $0x2e8] sm:$0xff]  ;;  %v1052_v6 = vld [vmem:[#allocation2 + $0x280] sm:$0xff] }
 0x163   :  { %706 = vst [vmem:[#allocation2 + $0x148] sm:$0xf] %v702_v8  ;;  %v921_v12 = vld [vmem:[#allocation2 + $0x1d8] sm:$0xff]  ;;  %v1050_v8 = vld [vmem:[#allocation2 + $0x8] sm:$0xff] }
 0x164   :  { %1127 = vmatpush.msrb.mxu0 %v1041_v11  ;;  %707 = vst [vmem:[#allocation2 + $0x78] sm:$0xf] %v703_v10  ;;  %971 = vmatpush.msra.mxu1 %v921_v12  ;;  %v922_v13 = vld [vmem:[#allocation2 + $0x38] sm:$0xff]  ;;  %v1048_v11 = vld [vmem:[#allocation2 + $0x188] sm:$0xff] }
 0x165   :  { %1011 = vmatpush.msra.mxu3 %v922_v13  ;;  %v1068_v10 = vld [vmem:[#allocation2 + $0xb8] sm:$0xff]  ;;  %v1046_v13 = vld [vmem:[#allocation2 + $0x128] sm:$0xff] }
 0x166   :  { %1128 = vmatpush.msrb.mxu0 %v1039_v14  ;;  %v1069_v15 = vld [vmem:[#allocation2] sm:$0xff]  ;;  %v658_v17 = vpop.permute.xlu1 %657 }
 0x167   :  { %1149 = vmatpush.msrb.mxu2 %v1069_v15  ;;  %v662_v18 = vsel %vm661_vm11, %v658_v17, %v660_v7  ;;  %v663_v19 = vsel %vm661_vm11, %v660_v7, %v658_v17  ;;  %v643_v20 = vpop.permute.xlu0 %642  ;;  %v1070_v7 = vld [vmem:[#allocation2 + $0x278] sm:$0xff]  ;;  %v1044_v15 = vld [vmem:[#allocation2 + $0x100] sm:$0xff]  ;;  %v1042_v17 = vld [vmem:[#allocation2 + $0xd0] sm:$0xff] }
 0x168   :  { %1129 = vmatpush.msrb.mxu0 %v1037_v16  ;;  %664 = vst [vmem:[#allocation2 + $0xf0] sm:$0xf] %v662_v18  ;;  %v668_v22 = vrot.slane %v662_v18, 4  ;;  %v669_v23 = vrot.slane %v663_v19, 4  ;;  %v645_v24 = vsel %vm644_vm12, %v1630_v50, %v643_v20  ;;  %v646_v25 = vsel %vm644_vm12, %v643_v20, %v1630_v50  ;;  %v919_v26 = vld [vmem:[#allocation2 + $0xe8] sm:$0xff]  ;;  %v1038_v20 = vld [vmem:[#allocation2 + $0xd8] sm:$0xff] }
 0x169   :  { %665 = vst [vmem:[#allocation2 + $0x268] sm:$0xf] %v663_v19  ;;  %v649_v27 = vrot.slane %v645_v24, 4  ;;  %v650_v28 = vrot.slane %v646_v25, 4  ;;  %972 = vmatpush.msra.mxu1 %v919_v26  ;;  %v920_v29 = vld [vmem:[#allocation2 + $0x1a0] sm:$0xff]  ;;  %v1040_v19 = vld [vmem:[#allocation2 + $0x98] sm:$0xff] }
 0x16a   :  { %1130 = vmatpush.msrb.mxu0 %v1035_v21  ;;  %672 = vst [vmem:[#allocation2 + $0x168] sm:$0xf] %v668_v22  ;;  %1012 = vmatpush.msra.mxu3 %v920_v29  ;;  %v1066_v12 = vld [vmem:[#allocation2 + $0x148] sm:$0xff]  ;;  %v1036_v21 = vld [vmem:[#allocation2 + $0x30] sm:$0xff] }
 0x16b   :  { %673 = vst [vmem:[#allocation2 + $0x270] sm:$0xf] %v669_v23  ;;  %v1067_v32 = vld [vmem:[#allocation2 + $0x78] sm:$0xff]  ;;  %v1034_v22 = vld [vmem:[#allocation2 + $0x90] sm:$0xff]  ;;  %v1032_v23 = vld [vmem:[#allocation2 + $0x308] sm:$0xff] }
 0x16c   :  { %1131 = vmatpush.msrb.mxu0 %v1033_v30  ;;  %653 = vst [vmem:[#allocation2 + $0x2c0] sm:$0xf0] %v649_v27  ;;  %1150 = vmatpush.msrb.mxu2 %v1067_v32 }
 0x16d   :  { %654 = vst [vmem:[#allocation2 + $0x180] sm:$0xf0] %v650_v28 }
 0x16e   :  { %1132 = vmatpush.msrb.mxu0 %v1031_v33  ;;  %655 = vst [vmem:[#allocation2 + $0x80] sm:$0xf0] %v645_v24  ;;  %v609_v35 = vpop.permute.xlu1 %608  ;;  %v1030_v24 = vld [vmem:[#allocation2 + $0x68] sm:$0xff] }
 0x16f   :  { %656 = vst [vmem:[#allocation2 + $0x28] sm:$0xf0] %v646_v25  ;;  %v607_v36 = vpop.permute.xlu0 %606  ;;  %v917_v37 = vld [vmem:[#allocation2 + $0xf0] sm:$0xff]  ;;  %v1028_v25 = vld [vmem:[#allocation2 + $0x1f8] sm:$0xff] }
 0x170   :  { %1133 = vmatpush.msrb.mxu0 %v1029_v34  ;;  %v611_v38 = vsel %vm610_vm13, %v607_v36, %v609_v35  ;;  %v612_v39 = vsel %vm610_vm13, %v609_v35, %v607_v36  ;;  %973 = vmatpush.msra.mxu1 %v917_v37  ;;  %v918_v40 = vld [vmem:[#allocation2 + $0x268] sm:$0xff] }
 0x171   :  { %v615_v41 = vrot.slane %v611_v38, 4  ;;  %v616_v42 = vrot.slane %v612_v39, 4  ;;  %621 = vst [vmem:[#allocation2 + $0x2a8] sm:$0xf0] %v611_v38  ;;  %1013 = vmatpush.msra.mxu3 %v918_v40  ;;  %1134 = vmatmul.f32.vlgmr.msrb.gmra.mxu0 %v1646_v46  ;;  %v1064_v14 = vld [vmem:[#allocation2 + $0x168] sm:$0xff] }
 0x172   :  { %622 = vst [vmem:[#allocation2 + $0x160] sm:$0xf0] %v612_v39  ;;  %v1065_v43 = vld [vmem:[#allocation2 + $0x270] sm:$0xff] }
 0x173   :  { %619 = vst [vmem:[#allocation2 + $0x118] sm:$0xf0] %v615_v41  ;;  %1151 = vmatpush.msrb.mxu2 %v1065_v43 }
 0x174   :  { %620 = vst [vmem:[#allocation2 + $0xa0] sm:$0xf0] %v616_v42 }
 0x176   :  { %v590_v45 = vpop.permute.xlu1 %589 }
 0x177   :  { %v594_v47 = vsel %vm593_vm14, %v590_v45, %v592_v44  ;;  %v595_v48 = vsel %vm593_vm14, %v592_v44, %v590_v45  ;;  %v626_v49 = vpop.permute.xlu0 %625 }
 0x178   :  { %596 = vst [vmem:[#allocation2 + $0x118] sm:$0xf] %v594_v47  ;;  %v600_v50 = vrot.slane %v594_v47, 4  ;;  %v601_v51 = vrot.slane %v595_v48, 4  ;;  %v628_v52 = vsel %vm627_vm15, %v624_v31, %v626_v49  ;;  %v629_v53 = vsel %vm627_vm15, %v626_v49, %v624_v31 }
 0x179   :  { %597 = vst [vmem:[#allocation2 + $0xa0] sm:$0xf] %v595_v48  ;;  %v634_v54 = vrot.slane %v628_v52, 4  ;;  %v635_v4 = vrot.slane %v629_v53, 4 }
 0x17a   :  { %604 = vst [vmem:[#allocation2 + $0x2a8] sm:$0xf] %v600_v50 }
 0x17b   :  { %605 = vst [vmem:[#allocation2 + $0x160] sm:$0xf] %v601_v51 }
 0x17c   :  { %630 = vst [vmem:[#allocation2 + $0x2c0] sm:$0xf] %v628_v52 }
 0x17d   :  { %631 = vst [vmem:[#allocation2 + $0x180] sm:$0xf] %v629_v53 }
 0x17e   :  { %638 = vst [vmem:[#allocation2 + $0x80] sm:$0xf] %v634_v54 }
 0x17f   :  { %639 = vst [vmem:[#allocation2 + $0x28] sm:$0xf] %v635_v4  ;;  %v913_v57 = vld [vmem:[#allocation2 + $0x118] sm:$0xff] }
 0x180   :  { %v914_v58 = vld [vmem:[#allocation2 + $0xa0] sm:$0xff] }
 0x181   :  { %v1060_v18 = vld [vmem:[#allocation2 + $0x2a8] sm:$0xff] }
 0x182   :  { %v1061_v63 = vld [vmem:[#allocation2 + $0x160] sm:$0xff] }
 0x183   :  { %v915_v55 = vld [vmem:[#allocation2 + $0x2c0] sm:$0xff] }
 0x184   :  { %974 = vmatpush.msra.mxu1 %v915_v55  ;;  %v916_v0 = vld [vmem:[#allocation2 + $0x180] sm:$0xff] }
 0x185   :  { %1014 = vmatpush.msra.mxu3 %v916_v0  ;;  %v1062_v16 = vld [vmem:[#allocation2 + $0x80] sm:$0xff] }
 0x186   :  { %975 = vmatpush.msra.mxu1 %v913_v57  ;;  %v1063_v59 = vld [vmem:[#allocation2 + $0x28] sm:$0xff] }
 0x187   :  { %1015 = vmatpush.msra.mxu3 %v914_v58  ;;  %1152 = vmatpush.msrb.mxu2 %v1063_v59 }
 0x188   :  { %1078 = vmatpush.msrb.mxu1 %v1058_v61  ;;  %1188 = vmatmul.msk.f32.vlgmr.msra.gmra.mxu3 %vm936_vm0, %v879_v60 }
 0x189   :  { %1105 = vmatpush.msrb.mxu3 %v1076_v62  ;;  %1153 = vmatpush.msrb.mxu2 %v1061_v63 }
 0x18a   :  { %1079 = vmatpush.msrb.mxu1 %v1056_v2  ;;  %1190 = vmatmul.msk.f32.vlgmr.msrb.gmra.mxu2 %vm936_vm0, %v879_v60 }
 0x18b   :  { %1106 = vmatpush.msrb.mxu3 %v1074_v3  ;;  %1187 = vmatmul.msk.f32.vlgmr.msra.gmra.mxu1 %vm936_vm0, %v879_v60 }
 0x18c   :  { %1080 = vmatpush.msrb.mxu1 %v1054_v9 }
 0x18d   :  { %1107 = vmatpush.msrb.mxu3 %v1072_v5 }
 0x18e   :  { %1081 = vmatpush.msrb.mxu1 %v1052_v6 }
 0x18f   :  { %1108 = vmatpush.msrb.mxu3 %v1070_v7 }
 0x190   :  { %1082 = vmatpush.msrb.mxu1 %v1050_v8 }
 0x191   :  { %1109 = vmatpush.msrb.mxu3 %v1068_v10 }
 0x192   :  { %1083 = vmatpush.msrb.mxu1 %v1048_v11 }
 0x193   :  { %1110 = vmatpush.msrb.mxu3 %v1066_v12 }
 0x194   :  { %1084 = vmatpush.msrb.mxu1 %v1046_v13 }
 0x195   :  { %1111 = vmatpush.msrb.mxu3 %v1064_v14 }
 0x196   :  { %1085 = vmatpush.msrb.mxu1 %v1044_v15 }
 0x197   :  { %1112 = vmatpush.msrb.mxu3 %v1062_v16 }
 0x198   :  { %1086 = vmatpush.msrb.mxu1 %v1042_v17 }
 0x199   :  { %1113 = vmatpush.msrb.mxu3 %v1060_v18 }
 0x19a   :  { %1189 = vmatmul.msk.f32.vlgmr.msrb.gmra.mxu3 %vm936_vm0, %v879_v60  ;;  %1087 = vmatpush.msrb.mxu1 %v1040_v19 }
 0x19c   :  { %1088 = vmatpush.msrb.mxu1 %v1038_v20 }
 0x19e   :  { %1089 = vmatpush.msrb.mxu1 %v1036_v21 }
 0x1a0   :  { %1090 = vmatpush.msrb.mxu1 %v1034_v22 }
 0x1a2   :  { %1091 = vmatpush.msrb.mxu1 %v1032_v23 }
 0x1a4   :  { %1092 = vmatpush.msrb.mxu1 %v1030_v24 }
 0x1a6   :  { %1093 = vmatpush.msrb.mxu1 %v1028_v25 }
 0x1a7   :  { %1094 = vmatmul.f32.vlgmr.msrb.gmra.mxu1 %v1646_v46 }
 0x1cf   :  { %v934_v27 = vpop.permute.xlu0 %933 }
 0x1d6   :  { %v957_v26 = vpop.f32.mrf.mxu0 }
 0x1d7   :  { %v958_v28 = vadd.f32 %v957_v26, %v934_v27 }
 0x1d9   :  { %v997_v29 = vpop.f32.mrf.mxu2 }
 0x1da   :  { %v998_v33 = vadd.f32 %v997_v29, %v934_v27 }
 0x1ee   :  { %v1135_v31 = vpop.f32.mrf.mxu0 }
 0x1ef   :  { %v1136_v35 = vadd.f32 %v1135_v31, %v934_v27 }
 0x208   :  { %v977_v30 = vpop.f32.mrf.mxu1 }
 0x209   :  { %v978_v32 = vadd.f32 %v977_v30, %v958_v28 }
 0x20b   :  { %vm1020_vm1 = vcmp.ge.f32.partialorder %v978_v32, 0.0  ;;  %v1022_v34 = vmul.f32 0.0, %v978_v32  ;;  %v1017_v36 = vpop.f32.mrf.mxu3 }
 0x20c   :  { %v1018_v38 = vadd.f32 %v1017_v36, %v998_v33 }
 0x20d   :  { %v1024_v37 = vsel %vm1020_vm1, %v978_v32, %v1022_v34  ;;  %v1155_v39 = vpop.f32.mrf.mxu2 }
 0x20e   :  { %1026 = vst [vmem:[#allocation8] sm:$0xff] %v1024_v37  ;;  %vm1021_vm2 = vcmp.ge.f32.partialorder %v1018_v38, 0.0  ;;  %v1023_v40 = vmul.f32 0.0, %v1018_v38  ;;  %v1156_v41 = vadd.f32 %v1155_v39, %v1136_v35 }
 0x210   :  { %v1025_v42 = vsel %vm1021_vm2, %v1018_v38, %v1023_v40  ;;  %vm1159_vm3 = vcmp.ge.f32.partialorder %v1156_v41, 0.0  ;;  %v1161_v43 = vmul.f32 0.0, %v1156_v41 }
 0x211   :  { %1027 = vst [vmem:[#allocation8 + $0x8] sm:$0xff] %v1025_v42 }
 0x212   :  { %v1163_v44 = vsel %vm1159_vm3, %v1156_v41, %v1161_v43 }
 0x213   :  { %1166 = vst [vmem:[#allocation8 + $0x18] sm:$0xff] %v1163_v44 }
 0x21d   :  { %v1115_v46 = vpop.f32.mrf.mxu3 }
 0x224   :  { %v1095_v45 = vpop.f32.mrf.mxu1 }
 0x225   :  { %v1096_v47 = vadd.f32 %v1095_v45, %v934_v27 }
 0x227   :  { %v1116_v48 = vadd.f32 %v1115_v46, %v1096_v47 }
 0x229   :  { %vm1158_vm4 = vcmp.ge.f32.partialorder %v1116_v48, 0.0  ;;  %v1160_v49 = vmul.f32 0.0, %v1116_v48 }
 0x22b   :  { %v1162_v50 = vsel %vm1158_vm4, %v1116_v48, %v1160_v49 }
 0x22c   :  { %1165 = vst [vmem:[#allocation8 + $0x10] sm:$0xff] %v1162_v50 }
 0x22d   :  { %1179 = dma.vmem_to_hbm [thread:$0]  %s1172_s14, 512, %s1174_s17, [#allocation5], %s1378_s18, %s1378_s18, %s1379_s19  }
 0x22e   :  { %1323 = dma.done.wait [#allocation5], 512  }
 0x22f   :  { %1324 = vsyncadd [#allocation5], 4294966784 }
 0x230   :  { %1184 = vsyncpa [#allocation4], 1 }
 0x231   :  { %1185 = vsyncpa [#allocation7], 1 }
 0x232   :  { %1186 = vsyncpa [#allocation5], 1 }

</bundles_post_ra>
